<compile_context>
chip_gen: v5e
topology: v5e:2x2
jax: 0.10.0
libtpu: 0.0.40
codegen_flags: <defaults>
</compile_context>

<pallas_src>
import functools

import jax
import jax.numpy as jnp
from jax.experimental import pallas as pl
from jax.experimental.pallas import tpu as pltpu

LANE = 128


def _round_up(x, m):
    return (x + m - 1) // m * m


def _pad_to(a, axis, target):
    if a.shape[axis] == target:
        return a
    widths = [(0, 0)] * a.ndim
    widths[axis] = (0, target - a.shape[axis])
    return jnp.pad(a, widths)


# ---------------------------------------------------------------------------
# Kernel 1: fused multi-operand matmul   y = relu(sum_i x_i @ w_i + b)
# Implements 1x1 conv (+ folded BN / bias + ReLU) and "channel-concat followed
# by 1x1 conv" without materializing the concat.
# ---------------------------------------------------------------------------
def _make_fused_matmul_kernel(n_in, relu):
    def kernel(*refs):
        x_refs = refs[:n_in]
        w_refs = refs[n_in:2 * n_in]
        b_ref = refs[2 * n_in]
        o_ref = refs[2 * n_in + 1]
        acc = jnp.dot(x_refs[0][...], w_refs[0][...],
                      preferred_element_type=jnp.float32)
        for i in range(1, n_in):
            acc = acc + jnp.dot(x_refs[i][...], w_refs[i][...],
                                preferred_element_type=jnp.float32)
        y = acc + b_ref[...]
        if relu:
            y = jnp.maximum(y, 0.0)
        o_ref[...] = y.astype(o_ref.dtype)
    return kernel


def fused_matmul(xs, ws, bias, *, relu=True, tile_m=512,
                 out_dtype=jnp.bfloat16):
    """relu(sum_i xs[i] @ ws[i] + bias); xs[i]:(M,K_i) bf16, ws[i]:(K_i,Cout)."""
    n_in = len(xs)
    assert len(ws) == n_in
    M = xs[0].shape[0]
    cout = ws[0].shape[1]
    for x, w in zip(xs, ws):
        assert x.shape[0] == M and x.shape[1] == w.shape[0]
        assert w.shape[1] == cout

    # M tiling: pad rows (no whole-array fallback), larger tiles amortize
    # per-grid-step overhead.
    tm = min(tile_m, _round_up(M, 8))
    m_pad = _round_up(M, tm)
    xs_p = []
    for x in xs:
        x = x.astype(jnp.bfloat16)
        if m_pad != M:
            x = jnp.pad(x, ((0, m_pad - M), (0, 0)))
        xs_p.append(x)
    ws_p = [w.astype(jnp.bfloat16) for w in ws]
    bias2 = bias.reshape(1, cout).astype(jnp.float32)

    in_specs = (
        [pl.BlockSpec((tm, x.shape[1]), lambda i: (i, 0)) for x in xs_p]
        + [pl.BlockSpec(w.shape, lambda i: (0, 0)) for w in ws_p]
        + [pl.BlockSpec((1, cout), lambda i: (0, 0))]
    )
    out = pl.pallas_call(
        _make_fused_matmul_kernel(n_in, relu),
        out_shape=jax.ShapeDtypeStruct((m_pad, cout), out_dtype),
        grid_spec=pltpu.PrefetchScalarGridSpec(
            num_scalar_prefetch=0,
            grid=(m_pad // tm,),
            in_specs=in_specs,
            out_specs=pl.BlockSpec((tm, cout), lambda i: (i, 0)),
        ),
        compiler_params=pltpu.CompilerParams(
            dimension_semantics=("parallel",)),
    )(*xs_p, *ws_p, bias2)
    return out[:M] if m_pad != M else out


# ---------------------------------------------------------------------------
# Kernel 2: 3x3 dilated conv (+ folded BN / bias + ReLU) via in-kernel 9-tap
# accumulation on a pre-padded input (no HBM im2col).
# ---------------------------------------------------------------------------
def _make_conv3x3_kernel(H, W, d, pad, relu):
    def kernel(xp_ref, w_ref, b_ref, o_ref):
        cin = w_ref.shape[1]
        cout = w_ref.shape[2]
        acc = None
        for ky in range(3):
            oy = pad + (ky - 1) * d          # static offsets (pad >= d)
            for kx in range(3):
                ox = pad + (kx - 1) * d
                xs = xp_ref[0, oy:oy + H, ox:ox + W, :]
                xs = xs.reshape(H * W, cin).astype(jnp.bfloat16)
                c = jnp.dot(xs, w_ref[ky * 3 + kx],
                            preferred_element_type=jnp.float32)
                acc = c if acc is None else acc + c
        y = acc + b_ref[...]
        if relu:
            y = jnp.maximum(y, 0.0)
        o_ref[...] = y.reshape(1, H * W, cout).astype(o_ref.dtype)
    return kernel


def conv3x3_from_padded(xp, w9, bias, *, out_h, out_w, dilation, pad,
                        relu=True, out_dtype=jnp.bfloat16):
    """3x3 'same' conv with dilation on a pre-padded NHWC input.

    xp:   (N, out_h + 2*pad, out_w + 2*pad, Cin) float32, pad >= dilation
          (the three ASPP branches share one padded copy with pad = max d).
    w9:   (9, Cin, Cout), tap order (ky, kx), BN already folded in.
    bias: (Cout,) float32 additive shift.
    Returns (N * out_h * out_w, Cout).
    """
    N, hp, wp, cin = xp.shape
    assert hp == out_h + 2 * pad and wp == out_w + 2 * pad
    assert pad >= dilation
    cout = w9.shape[2]
    out = pl.pallas_call(
        _make_conv3x3_kernel(out_h, out_w, dilation, pad, relu),
        out_shape=jax.ShapeDtypeStruct((N, out_h * out_w, cout), out_dtype),
        grid_spec=pltpu.PrefetchScalarGridSpec(
            num_scalar_prefetch=0,
            grid=(N,),
            in_specs=[
                pl.BlockSpec((1, hp, wp, cin), lambda n: (n, 0, 0, 0)),
                pl.BlockSpec((9, cin, cout), lambda n: (0, 0, 0)),
                pl.BlockSpec((1, cout), lambda n: (0, 0)),
            ],
            out_specs=pl.BlockSpec((1, out_h * out_w, cout),
                                   lambda n: (n, 0, 0)),
        ),
        compiler_params=pltpu.CompilerParams(
            dimension_semantics=("parallel",)),
    )(xp.astype(jnp.float32), w9.astype(jnp.bfloat16),
      bias.reshape(1, cout).astype(jnp.float32))
    return out.reshape(N * out_h * out_w, cout)


# ---------------------------------------------------------------------------
# Glue: nearest upsampling (broadcast + reshape, no gather)
# ---------------------------------------------------------------------------
def upsample_nearest(x, factor):
    # nn.Upsample(scale_factor=f), default mode='nearest'
    N, H, W, C = x.shape
    x = jnp.broadcast_to(x[:, :, None, :, None, :],
                         (N, H, factor, W, factor, C))
    return x.reshape(N, H * factor, W * factor, C)


# ---------------------------------------------------------------------------
# Parameters (deterministic, synthetic) — built kernel-ready:
# BN folded, output channels padded to the 128-lane width, weights in bf16.
# ---------------------------------------------------------------------------
def _bn_fold(key, c, eps=1e-5):
    k1, k2, k3, k4 = jax.random.split(key, 4)
    gamma = 1.0 + 0.1 * jax.random.normal(k1, (c,), jnp.float32)
    beta = 0.1 * jax.random.normal(k2, (c,), jnp.float32)
    mean = 0.1 * jax.random.normal(k3, (c,), jnp.float32)
    var = 1.0 + 0.1 * jax.random.uniform(k4, (c,), jnp.float32)
    scale = gamma / jnp.sqrt(var + eps)
    shift = beta - mean * scale
    return scale, shift


def _w(key, shape, fan_in):
    return jax.random.normal(key, shape, jnp.float32) / jnp.sqrt(fan_in)


def init_params(key, cin, ca, num_classes):
    cap = _round_up(ca, LANE)            # padded ASPP/decoder channel width
    ncp = _round_up(num_classes, LANE)   # padded classifier width
    ks = iter(jax.random.split(key, 32))
    nxt = lambda: next(ks)

    def conv_bn_1x1(c_in):
        w = _w(nxt(), (c_in, ca), c_in)
        scale, shift = _bn_fold(nxt(), ca)
        return (_pad_to(w * scale[None, :], 1, cap).astype(jnp.bfloat16),
                _pad_to(shift, 0, cap))

    def conv_bn_3x3(c_in):
        w = _w(nxt(), (9, c_in, ca), 9 * c_in)
        scale, shift = _bn_fold(nxt(), ca)
        return (_pad_to(w * scale[None, None, :], 2, cap).astype(jnp.bfloat16),
                _pad_to(shift, 0, cap))

    p = {"aspp": {}}
    a = p["aspp"]
    a["c1_w"], a["c1_b"] = conv_bn_1x1(cin)          # 1x1 + BN
    a["c2_w"], a["c2_b"] = conv_bn_3x3(cin)          # 3x3 d=6  + BN
    a["c3_w"], a["c3_b"] = conv_bn_3x3(cin)          # 3x3 d=12 + BN
    a["c4_w"], a["c4_b"] = conv_bn_3x3(cin)          # 3x3 d=18 + BN
    # pooled branch stays in plain JAX -> keep folded weight in f32
    w5 = _w(nxt(), (cin, ca), cin)
    s5, sh5 = _bn_fold(nxt(), ca)
    a["c5_w"] = _pad_to(w5 * s5[None, :], 1, cap)
    a["c5_b"] = _pad_to(sh5, 0, cap)
    # convf consumes concat([x1..x5]): store as 5 per-branch weight slices
    wf = _w(nxt(), (5 * ca, ca), 5 * ca)
    sf, shf = _bn_fold(nxt(), ca)
    wf = wf * sf[None, :]
    a["cf_w"] = tuple(
        _pad_to(_pad_to(wf[i * ca:(i + 1) * ca], 0, cap), 1, cap)
        .astype(jnp.bfloat16) for i in range(5))
    a["cf_b"] = _pad_to(shf, 0, cap)

    # out1: Conv2d(256, 256, 1, bias=True) + ReLU
    w = _w(nxt(), (ca, ca), ca)
    p["out1_w"] = _pad_to(_pad_to(w, 0, cap), 1, cap).astype(jnp.bfloat16)
    p["out1_b"] = _pad_to(0.1 * jax.random.normal(nxt(), (ca,), jnp.float32),
                          0, cap)
    # decoder conv1x1: Conv2d(2048, 256, 1, bias=False) + ReLU
    p["dec1_w"] = _pad_to(_w(nxt(), (cin, ca), cin), 1, cap).astype(jnp.bfloat16)
    p["dec1_b"] = jnp.zeros((cap,), jnp.float32)
    # dec_conv: Conv2d(256, 256, 3, padding=1, bias=True) + ReLU
    w = _w(nxt(), (9, ca, ca), 9 * ca)
    p["dec3_w"] = _pad_to(_pad_to(w, 1, cap), 2, cap).astype(jnp.bfloat16)
    p["dec3_b"] = _pad_to(0.1 * jax.random.normal(nxt(), (ca,), jnp.float32),
                          0, cap)
    # classifier (1x1 on concat([out1, dec])) + ReLU: 2 per-branch slices
    wc = _w(nxt(), (2 * ca, num_classes), 2 * ca)
    p["cls_w"] = tuple(
        _pad_to(_pad_to(wc[i * ca:(i + 1) * ca], 0, cap), 1, ncp)
        .astype(jnp.bfloat16) for i in range(2))
    p["cls_b"] = _pad_to(
        0.1 * jax.random.normal(nxt(), (num_classes,), jnp.float32), 0, ncp)
    return p


# ---------------------------------------------------------------------------
# Model forward
# ---------------------------------------------------------------------------
def deeplabv3plus_forward(x, p, *, num_classes):
    # TODO(synk): Backbones registry is not defined in the reference; the
    # backbone is treated as identity on an already-extracted feature map.
    feat = x.astype(jnp.float32)
    N, H, W, cin = feat.shape
    M = N * H * W
    feat_flat = feat.reshape(M, cin)
    a = p["aspp"]
    cap = a["c1_w"].shape[1]

    # ---------------- ASPP ----------------
    x1 = fused_matmul([feat_flat], [a["c1_w"]], a["c1_b"])
    pad = 18  # shared zero-padding (max dilation) for the 3 dilated branches
    featp = jnp.pad(feat, ((0, 0), (pad, pad), (pad, pad), (0, 0)))
    x2 = conv3x3_from_padded(featp, a["c2_w"], a["c2_b"],
                             out_h=H, out_w=W, dilation=6, pad=pad)
    x3 = conv3x3_from_padded(featp, a["c3_w"], a["c3_b"],
                             out_h=H, out_w=W, dilation=12, pad=pad)
    x4 = conv3x3_from_padded(featp, a["c4_w"], a["c4_b"],
                             out_h=H, out_w=W, dilation=18, pad=pad)
    # Pooled branch: AdaptiveAvgPool2d(1) -> 1x1 conv+BN+ReLU -> bilinear
    # upsample from 1x1 == pure broadcast.  M == N rows -> plain JAX.
    pooled = jnp.mean(feat, axis=(1, 2))                    # (N, cin)
    x5 = jnp.maximum(pooled @ a["c5_w"] + a["c5_b"], 0.0)   # (N, cap)
    x5 = jnp.broadcast_to(x5[:, None, :], (N, H * W, cap)).reshape(M, cap)
    # concat([x1..x5]) + convf(1x1+BN)+ReLU fused as a sum of 5 matmuls.
    aspp = fused_matmul([x1, x2, x3, x4, x5], list(a["cf_w"]), a["cf_b"])

    # ------------- head output path -------------
    out1 = fused_matmul([aspp], [p["out1_w"]], p["out1_b"])
    # TODO(synk): Dropout(0.5) is identity here (eval-mode semantics).

    # ---------------- decoder path ----------------
    dec = fused_matmul([feat_flat], [p["dec1_w"]], p["dec1_b"],
                       out_dtype=jnp.float32)
    decp = jnp.pad(dec.reshape(N, H, W, cap),
                   ((0, 0), (1, 1), (1, 1), (0, 0)))
    dec = conv3x3_from_padded(decp, p["dec3_w"], p["dec3_b"],
                              out_h=H, out_w=W, dilation=1, pad=1)

    # ---------------- classifier ----------------
    # up4(out1), up4(dec) -> concat -> 1x1 conv+ReLU -> up4  commutes to
    # (concat -> 1x1 conv+ReLU) at low resolution followed by one x16 nearest
    # upsample (the conv is pointwise, the upsample is nearest).
    out = fused_matmul([out1, dec], list(p["cls_w"]), p["cls_b"],
                       out_dtype=jnp.float32)               # (M, ncp)
    out = out[:, :num_classes].reshape(N, H, W, num_classes)
    return upsample_nearest(out, 16)


if __name__ == "__main__":
    key = jax.random.PRNGKey(0)
    # scaled-down shapes: backbone channels 2048 -> 32, ASPP out 256 -> 16
    N, H, W = 2, 8, 8
    CIN, CA, NUM_CLASSES = 32, 16, 3

    kx, kp = jax.random.split(key)
    x = jax.random.normal(kx, (N, H, W, CIN), jnp.float32)  # backbone feature map (NHWC)
    params = init_params(kp, CIN, CA, NUM_CLASSES)

    fwd = jax.jit(functools.partial(deeplabv3plus_forward,
                                    num_classes=NUM_CLASSES))
    out = fwd(x, params)
    jax.block_until_ready(out)

    assert out.shape == (N, 16 * H, 16 * W, NUM_CLASSES), out.shape
    assert bool(jnp.all(jnp.isfinite(out)))
    print("KERNEL_OK")
</pallas_src>

<mosaic_0001>
module attributes {stable_mosaic.version = 11 : i64} {
  func.func @kernel(%arg0: i32, %arg1: memref<128x32xbf16, #tpu.memory_space<vmem>>, %arg2: memref<32x128xbf16, #tpu.memory_space<vmem>>, %arg3: memref<1x128xf32, #tpu.memory_space<vmem>>, %arg4: memref<128x128xbf16, #tpu.memory_space<vmem>>) attributes {dimension_semantics = [#tpu.dimension_semantics<parallel>], iteration_bounds = array<i64: 1>, scalar_prefetch = 0 : i64, scratch_operands = 0 : i64, tpu.core_type = #tpu.core_type<tc>, window_params = [{transform_indices = @transform_0, window_bounds = array<i64: 128, 32>}, {pipeline_mode = #tpu.pipeline_mode<synchronous>, transform_indices = @transform_1, window_bounds = array<i64: 32, 128>}, {pipeline_mode = #tpu.pipeline_mode<synchronous>, transform_indices = @transform_2, window_bounds = array<i64: 1, 128>}, {transform_indices = @transform_3, window_bounds = array<i64: 128, 128>}]} {
    %c0 = arith.constant 0 : index
    %c0_0 = arith.constant 0 : index
    %0 = vector.load %arg1[%c0, %c0_0] : memref<128x32xbf16, #tpu.memory_space<vmem>>, vector<128x32xbf16>
    %c0_1 = arith.constant 0 : index
    %c0_2 = arith.constant 0 : index
    %1 = vector.load %arg2[%c0_1, %c0_2] : memref<32x128xbf16, #tpu.memory_space<vmem>>, vector<32x128xbf16>
    %cst = arith.constant dense<0.000000e+00> : vector<128x128xf32>
    %2 = tpu.matmul %0, %1, %cst {dimension_numbers = #tpu.dot_dimension_numbers<[1], [0], [0], [1], [0, 0, 1, 1], [], []>} : vector<128x32xbf16>, vector<32x128xbf16>, vector<128x128xf32> -> vector<128x128xf32>
    %c0_3 = arith.constant 0 : index
    %c0_4 = arith.constant 0 : index
    %3 = vector.load %arg3[%c0_3, %c0_4] : memref<1x128xf32, #tpu.memory_space<vmem>>, vector<1x128xf32>
    %4 = vector.broadcast %3 : vector<1x128xf32> to vector<128x128xf32>
    %5 = arith.addf %2, %4 : vector<128x128xf32>
    %cst_5 = arith.constant 0.000000e+00 : f32
    %6 = vector.broadcast %cst_5 : f32 to vector<128x128xf32>
    %7 = arith.maximumf %5, %6 : vector<128x128xf32>
    %8 = arith.truncf %7 : vector<128x128xf32> to vector<128x128xbf16>
    %c0_6 = arith.constant 0 : index
    %c0_7 = arith.constant 0 : index
    %9 = vector.load %arg4[%c0_6, %c0_7] : memref<128x128xbf16, #tpu.memory_space<vmem>>, vector<128x128xbf16>
    tpu.vector_store %arg4[%c0_6, %c0_7], %8 {strides = array<i32>} : memref<128x128xbf16, #tpu.memory_space<vmem>>, vector<128x128xbf16>,
    return
  }
  func.func @transform_0(%arg0: i32) -> (i32, i32) {
    %c0_i32 = arith.constant 0 : i32
    %c0_i32_0 = arith.constant 0 : i32
    return %arg0, %c0_i32 : i32, i32
  }
  func.func @transform_1(%arg0: i32) -> (i32, i32) {
    %c0_i32 = arith.constant 0 : i32
    %c0_i32_0 = arith.constant 0 : i32
    %c0_i32_1 = arith.constant 0 : i32
    return %c0_i32, %c0_i32_0 : i32, i32
  }
  func.func @transform_2(%arg0: i32) -> (i32, i32) {
    %c0_i32 = arith.constant 0 : i32
    %c0_i32_0 = arith.constant 0 : i32
    %c0_i32_1 = arith.constant 0 : i32
    return %c0_i32, %c0_i32_0 : i32, i32
  }
  func.func @transform_3(%arg0: i32) -> (i32, i32) {
    %c0_i32 = arith.constant 0 : i32
    %c0_i32_0 = arith.constant 0 : i32
    return %arg0, %c0_i32 : i32, i32
  }
}

module attributes {stable_mosaic.version = 11 : i64} {
  func.func @kernel(%arg0: i32, %arg1: memref<128x32xbf16, #tpu.memory_space<vmem>>, %arg2: memref<32x128xbf16, #tpu.memory_space<vmem>>, %arg3: memref<1x128xf32, #tpu.memory_space<vmem>>, %arg4: memref<128x128xf32, #tpu.memory_space<vmem>>) attributes {dimension_semantics = [#tpu.dimension_semantics<parallel>], iteration_bounds = array<i64: 1>, scalar_prefetch = 0 : i64, scratch_operands = 0 : i64, tpu.core_type = #tpu.core_type<tc>, window_params = [{transform_indices = @transform_0, window_bounds = array<i64: 128, 32>}, {pipeline_mode = #tpu.pipeline_mode<synchronous>, transform_indices = @transform_1, window_bounds = array<i64: 32, 128>}, {pipeline_mode = #tpu.pipeline_mode<synchronous>, transform_indices = @transform_2, window_bounds = array<i64: 1, 128>}, {transform_indices = @transform_3, window_bounds = array<i64: 128, 128>}]} {
    %c0 = arith.constant 0 : index
    %c0_0 = arith.constant 0 : index
    %0 = vector.load %arg1[%c0, %c0_0] : memref<128x32xbf16, #tpu.memory_space<vmem>>, vector<128x32xbf16>
    %c0_1 = arith.constant 0 : index
    %c0_2 = arith.constant 0 : index
    %1 = vector.load %arg2[%c0_1, %c0_2] : memref<32x128xbf16, #tpu.memory_space<vmem>>, vector<32x128xbf16>
    %cst = arith.constant dense<0.000000e+00> : vector<128x128xf32>
    %2 = tpu.matmul %0, %1, %cst {dimension_numbers = #tpu.dot_dimension_numbers<[1], [0], [0], [1], [0, 0, 1, 1], [], []>} : vector<128x32xbf16>, vector<32x128xbf16>, vector<128x128xf32> -> vector<128x128xf32>
    %c0_3 = arith.constant 0 : index
    %c0_4 = arith.constant 0 : index
    %3 = vector.load %arg3[%c0_3, %c0_4] : memref<1x128xf32, #tpu.memory_space<vmem>>, vector<1x128xf32>
    %4 = vector.broadcast %3 : vector<1x128xf32> to vector<128x128xf32>
    %5 = arith.addf %2, %4 : vector<128x128xf32>
    %cst_5 = arith.constant 0.000000e+00 : f32
    %6 = vector.broadcast %cst_5 : f32 to vector<128x128xf32>
    %7 = arith.maximumf %5, %6 : vector<128x128xf32>
    %c0_6 = arith.constant 0 : index
    %c0_7 = arith.constant 0 : index
    %8 = vector.load %arg4[%c0_6, %c0_7] : memref<128x128xf32, #tpu.memory_space<vmem>>, vector<128x128xf32>
    tpu.vector_store %arg4[%c0_6, %c0_7], %7 {strides = array<i32>} : memref<128x128xf32, #tpu.memory_space<vmem>>, vector<128x128xf32>,
    return
  }
  func.func @transform_0(%arg0: i32) -> (i32, i32) {
    %c0_i32 = arith.constant 0 : i32
    %c0_i32_0 = arith.constant 0 : i32
    return %arg0, %c0_i32 : i32, i32
  }
  func.func @transform_1(%arg0: i32) -> (i32, i32) {
    %c0_i32 = arith.constant 0 : i32
    %c0_i32_0 = arith.constant 0 : i32
    %c0_i32_1 = arith.constant 0 : i32
    return %c0_i32, %c0_i32_0 : i32, i32
  }
  func.func @transform_2(%arg0: i32) -> (i32, i32) {
    %c0_i32 = arith.constant 0 : i32
    %c0_i32_0 = arith.constant 0 : i32
    %c0_i32_1 = arith.constant 0 : i32
    return %c0_i32, %c0_i32_0 : i32, i32
  }
  func.func @transform_3(%arg0: i32) -> (i32, i32) {
    %c0_i32 = arith.constant 0 : i32
    %c0_i32_0 = arith.constant 0 : i32
    return %arg0, %c0_i32 : i32, i32
  }
}

module attributes {stable_mosaic.version = 11 : i64} {
  func.func @kernel(%arg0: i32, %arg1: memref<1x10x10x128xf32, #tpu.memory_space<vmem>>, %arg2: memref<9x128x128xbf16, #tpu.memory_space<vmem>>, %arg3: memref<1x128xf32, #tpu.memory_space<vmem>>, %arg4: memref<1x64x128xbf16, #tpu.memory_space<vmem>>) attributes {dimension_semantics = [#tpu.dimension_semantics<parallel>], iteration_bounds = array<i64: 2>, scalar_prefetch = 0 : i64, scratch_operands = 0 : i64, tpu.core_type = #tpu.core_type<tc>, window_params = [{transform_indices = @transform_0, window_bounds = array<i64: 1, 10, 10, 128>}, {pipeline_mode = #tpu.pipeline_mode<synchronous>, transform_indices = @transform_1, window_bounds = array<i64: 9, 128, 128>}, {pipeline_mode = #tpu.pipeline_mode<synchronous>, transform_indices = @transform_2, window_bounds = array<i64: 1, 128>}, {transform_indices = @transform_3, window_bounds = array<i64: 1, 64, 128>}]} {
    %c0 = arith.constant 0 : index
    %c0_0 = arith.constant 0 : index
    %c0_1 = arith.constant 0 : index
    %c0_2 = arith.constant 0 : index
    %0 = vector.load %arg1[%c0, %c0_0, %c0_1, %c0_2] : memref<1x10x10x128xf32, #tpu.memory_space<vmem>>, vector<1x8x8x128xf32>
    %1 = vector.shape_cast %0 : vector<1x8x8x128xf32> to vector<8x8x128xf32>
    %2 = vector.shape_cast %1 : vector<8x8x128xf32> to vector<64x128xf32>
    %3 = arith.truncf %2 : vector<64x128xf32> to vector<64x128xbf16>
    %c0_3 = arith.constant 0 : index
    %c0_4 = arith.constant 0 : index
    %c0_5 = arith.constant 0 : index
    %4 = vector.load %arg2[%c0_3, %c0_4, %c0_5] : memref<9x128x128xbf16, #tpu.memory_space<vmem>>, vector<1x128x128xbf16>
    %5 = vector.shape_cast %4 : vector<1x128x128xbf16> to vector<128x128xbf16>
    %cst = arith.constant dense<0.000000e+00> : vector<64x128xf32>
    %6 = tpu.matmul %3, %5, %cst {dimension_numbers = #tpu.dot_dimension_numbers<[1], [0], [0], [1], [0, 0, 1, 1], [], []>} : vector<64x128xbf16>, vector<128x128xbf16>, vector<64x128xf32> -> vector<64x128xf32>
    %c0_6 = arith.constant 0 : index
    %c0_7 = arith.constant 0 : index
    %c1 = arith.constant 1 : index
    %c0_8 = arith.constant 0 : index
    %7 = vector.load %arg1[%c0_6, %c0_7, %c1, %c0_8] : memref<1x10x10x128xf32, #tpu.memory_space<vmem>>, vector<1x8x8x128xf32>
    %8 = vector.shape_cast %7 : vector<1x8x8x128xf32> to vector<8x8x128xf32>
    %9 = vector.shape_cast %8 : vector<8x8x128xf32> to vector<64x128xf32>
    %10 = arith.truncf %9 : vector<64x128xf32> to vector<64x128xbf16>
    %c1_9 = arith.constant 1 : index
    %c0_10 = arith.constant 0 : index
    %c0_11 = arith.constant 0 : index
    %11 = vector.load %arg2[%c1_9, %c0_10, %c0_11] : memref<9x128x128xbf16, #tpu.memory_space<vmem>>, vector<1x128x128xbf16>
    %12 = vector.shape_cast %11 : vector<1x128x128xbf16> to vector<128x128xbf16>
    %cst_12 = arith.constant dense<0.000000e+00> : vector<64x128xf32>
    %13 = tpu.matmul %10, %12, %cst_12 {dimension_numbers = #tpu.dot_dimension_numbers<[1], [0], [0], [1], [0, 0, 1, 1], [], []>} : vector<64x128xbf16>, vector<128x128xbf16>, vector<64x128xf32> -> vector<64x128xf32>
    %14 = arith.addf %6, %13 : vector<64x128xf32>
    %c0_13 = arith.constant 0 : index
    %c0_14 = arith.constant 0 : index
    %c2 = arith.constant 2 : index
    %c0_15 = arith.constant 0 : index
    %15 = vector.load %arg1[%c0_13, %c0_14, %c2, %c0_15] : memref<1x10x10x128xf32, #tpu.memory_space<vmem>>, vector<1x8x8x128xf32>
    %16 = vector.shape_cast %15 : vector<1x8x8x128xf32> to vector<8x8x128xf32>
    %17 = vector.shape_cast %16 : vector<8x8x128xf32> to vector<64x128xf32>
    %18 = arith.truncf %17 : vector<64x128xf32> to vector<64x128xbf16>
    %c2_16 = arith.constant 2 : index
    %c0_17 = arith.constant 0 : index
    %c0_18 = arith.constant 0 : index
    %19 = vector.load %arg2[%c2_16, %c0_17, %c0_18] : memref<9x128x128xbf16, #tpu.memory_space<vmem>>, vector<1x128x128xbf16>
    %20 = vector.shape_cast %19 : vector<1x128x128xbf16> to vector<128x128xbf16>
    %cst_19 = arith.constant dense<0.000000e+00> : vector<64x128xf32>
    %21 = tpu.matmul %18, %20, %cst_19 {dimension_numbers = #tpu.dot_dimension_numbers<[1], [0], [0], [1], [0, 0, 1, 1], [], []>} : vector<64x128xbf16>, vector<128x128xbf16>, vector<64x128xf32> -> vector<64x128xf32>
    %22 = arith.addf %14, %21 : vector<64x128xf32>
    %c0_20 = arith.constant 0 : index
    %c1_21 = arith.constant 1 : index
    %c0_22 = arith.constant 0 : index
    %c0_23 = arith.constant 0 : index
    %23 = vector.load %arg1[%c0_20, %c1_21, %c0_22, %c0_23] : memref<1x10x10x128xf32, #tpu.memory_space<vmem>>, vector<1x8x8x128xf32>
    %24 = vector.shape_cast %23 : vector<1x8x8x128xf32> to vector<8x8x128xf32>
    %25 = vector.shape_cast %24 : vector<8x8x128xf32> to vector<64x128xf32>
    %26 = arith.truncf %25 : vector<64x128xf32> to vector<64x128xbf16>
    %c3 = arith.constant 3 : index
    %c0_24 = arith.constant 0 : index
    %c0_25 = arith.constant 0 : index
    %27 = vector.load %arg2[%c3, %c0_24, %c0_25] : memref<9x128x128xbf16, #tpu.memory_space<vmem>>, vector<1x128x128xbf16>
    %28 = vector.shape_cast %27 : vector<1x128x128xbf16> to vector<128x128xbf16>
    %cst_26 = arith.constant dense<0.000000e+00> : vector<64x128xf32>
    %29 = tpu.matmul %26, %28, %cst_26 {dimension_numbers = #tpu.dot_dimension_numbers<[1], [0], [0], [1], [0, 0, 1, 1], [], []>} : vector<64x128xbf16>, vector<128x128xbf16>, vector<64x128xf32> -> vector<64x128xf32>
    %30 = arith.addf %22, %29 : vector<64x128xf32>
    %c0_27 = arith.constant 0 : index
    %c1_28 = arith.constant 1 : index
    %c1_29 = arith.constant 1 : index
    %c0_30 = arith.constant 0 : index
    %31 = vector.load %arg1[%c0_27, %c1_28, %c1_29, %c0_30] : memref<1x10x10x128xf32, #tpu.memory_space<vmem>>, vector<1x8x8x128xf32>
    %32 = vector.shape_cast %31 : vector<1x8x8x128xf32> to vector<8x8x128xf32>
    %33 = vector.shape_cast %32 : vector<8x8x128xf32> to vector<64x128xf32>
    %34 = arith.truncf %33 : vector<64x128xf32> to vector<64x128xbf16>
    %c4 = arith.constant 4 : index
    %c0_31 = arith.constant 0 : index
    %c0_32 = arith.constant 0 : index
    %35 = vector.load %arg2[%c4, %c0_31, %c0_32] : memref<9x128x128xbf16, #tpu.memory_space<vmem>>, vector<1x128x128xbf16>
    %36 = vector.shape_cast %35 : vector<1x128x128xbf16> to vector<128x128xbf16>
    %cst_33 = arith.constant dense<0.000000e+00> : vector<64x128xf32>
    %37 = tpu.matmul %34, %36, %cst_33 {dimension_numbers = #tpu.dot_dimension_numbers<[1], [0], [0], [1], [0, 0, 1, 1], [], []>} : vector<64x128xbf16>, vector<128x128xbf16>, vector<64x128xf32> -> vector<64x128xf32>
    %38 = arith.addf %30, %37 : vector<64x128xf32>
    %c0_34 = arith.constant 0 : index
    %c1_35 = arith.constant 1 : index
    %c2_36 = arith.constant 2 : index
    %c0_37 = arith.constant 0 : index
    %39 = vector.load %arg1[%c0_34, %c1_35, %c2_36, %c0_37] : memref<1x10x10x128xf32, #tpu.memory_space<vmem>>, vector<1x8x8x128xf32>
    %40 = vector.shape_cast %39 : vector<1x8x8x128xf32> to vector<8x8x128xf32>
    %41 = vector.shape_cast %40 : vector<8x8x128xf32> to vector<64x128xf32>
    %42 = arith.truncf %41 : vector<64x128xf32> to vector<64x128xbf16>
    %c5 = arith.constant 5 : index
    %c0_38 = arith.constant 0 : index
    %c0_39 = arith.constant 0 : index
    %43 = vector.load %arg2[%c5, %c0_38, %c0_39] : memref<9x128x128xbf16, #tpu.memory_space<vmem>>, vector<1x128x128xbf16>
    %44 = vector.shape_cast %43 : vector<1x128x128xbf16> to vector<128x128xbf16>
    %cst_40 = arith.constant dense<0.000000e+00> : vector<64x128xf32>
    %45 = tpu.matmul %42, %44, %cst_40 {dimension_numbers = #tpu.dot_dimension_numbers<[1], [0], [0], [1], [0, 0, 1, 1], [], []>} : vector<64x128xbf16>, vector<128x128xbf16>, vector<64x128xf32> -> vector<64x128xf32>
    %46 = arith.addf %38, %45 : vector<64x128xf32>
    %c0_41 = arith.constant 0 : index
    %c2_42 = arith.constant 2 : index
    %c0_43 = arith.constant 0 : index
    %c0_44 = arith.constant 0 : index
    %47 = vector.load %arg1[%c0_41, %c2_42, %c0_43, %c0_44] : memref<1x10x10x128xf32, #tpu.memory_space<vmem>>, vector<1x8x8x128xf32>
    %48 = vector.shape_cast %47 : vector<1x8x8x128xf32> to vector<8x8x128xf32>
    %49 = vector.shape_cast %48 : vector<8x8x128xf32> to vector<64x128xf32>
    %50 = arith.truncf %49 : vector<64x128xf32> to vector<64x128xbf16>
    %c6 = arith.constant 6 : index
    %c0_45 = arith.constant 0 : index
    %c0_46 = arith.constant 0 : index
    %51 = vector.load %arg2[%c6, %c0_45, %c0_46] : memref<9x128x128xbf16, #tpu.memory_space<vmem>>, vector<1x128x128xbf16>
    %52 = vector.shape_cast %51 : vector<1x128x128xbf16> to vector<128x128xbf16>
    %cst_47 = arith.constant dense<0.000000e+00> : vector<64x128xf32>
    %53 = tpu.matmul %50, %52, %cst_47 {dimension_numbers = #tpu.dot_dimension_numbers<[1], [0], [0], [1], [0, 0, 1, 1], [], []>} : vector<64x128xbf16>, vector<128x128xbf16>, vector<64x128xf32> -> vector<64x128xf32>
    %54 = arith.addf %46, %53 : vector<64x128xf32>
    %c0_48 = arith.constant 0 : index
    %c2_49 = arith.constant 2 : index
    %c1_50 = arith.constant 1 : index
    %c0_51 = arith.constant 0 : index
    %55 = vector.load %arg1[%c0_48, %c2_49, %c1_50, %c0_51] : memref<1x10x10x128xf32, #tpu.memory_space<vmem>>, vector<1x8x8x128xf32>
    %56 = vector.shape_cast %55 : vector<1x8x8x128xf32> to vector<8x8x128xf32>
    %57 = vector.shape_cast %56 : vector<8x8x128xf32> to vector<64x128xf32>
    %58 = arith.truncf %57 : vector<64x128xf32> to vector<64x128xbf16>
    %c7 = arith.constant 7 : index
    %c0_52 = arith.constant 0 : index
    %c0_53 = arith.constant 0 : index
    %59 = vector.load %arg2[%c7, %c0_52, %c0_53] : memref<9x128x128xbf16, #tpu.memory_space<vmem>>, vector<1x128x128xbf16>
    %60 = vector.shape_cast %59 : vector<1x128x128xbf16> to vector<128x128xbf16>
    %cst_54 = arith.constant dense<0.000000e+00> : vector<64x128xf32>
    %61 = tpu.matmul %58, %60, %cst_54 {dimension_numbers = #tpu.dot_dimension_numbers<[1], [0], [0], [1], [0, 0, 1, 1], [], []>} : vector<64x128xbf16>, vector<128x128xbf16>, vector<64x128xf32> -> vector<64x128xf32>
    %62 = arith.addf %54, %61 : vector<64x128xf32>
    %c0_55 = arith.constant 0 : index
    %c2_56 = arith.constant 2 : index
    %c2_57 = arith.constant 2 : index
    %c0_58 = arith.constant 0 : index
    %63 = vector.load %arg1[%c0_55, %c2_56, %c2_57, %c0_58] : memref<1x10x10x128xf32, #tpu.memory_space<vmem>>, vector<1x8x8x128xf32>
    %64 = vector.shape_cast %63 : vector<1x8x8x128xf32> to vector<8x8x128xf32>
    %65 = vector.shape_cast %64 : vector<8x8x128xf32> to vector<64x128xf32>
    %66 = arith.truncf %65 : vector<64x128xf32> to vector<64x128xbf16>
    %c8 = arith.constant 8 : index
    %c0_59 = arith.constant 0 : index
    %c0_60 = arith.constant 0 : index
    %67 = vector.load %arg2[%c8, %c0_59, %c0_60] : memref<9x128x128xbf16, #tpu.memory_space<vmem>>, vector<1x128x128xbf16>
    %68 = vector.shape_cast %67 : vector<1x128x128xbf16> to vector<128x128xbf16>
    %cst_61 = arith.constant dense<0.000000e+00> : vector<64x128xf32>
    %69 = tpu.matmul %66, %68, %cst_61 {dimension_numbers = #tpu.dot_dimension_numbers<[1], [0], [0], [1], [0, 0, 1, 1], [], []>} : vector<64x128xbf16>, vector<128x128xbf16>, vector<64x128xf32> -> vector<64x128xf32>
    %70 = arith.addf %62, %69 : vector<64x128xf32>
    %c0_62 = arith.constant 0 : index
    %c0_63 = arith.constant 0 : index
    %71 = vector.load %arg3[%c0_62, %c0_63] : memref<1x128xf32, #tpu.memory_space<vmem>>, vector<1x128xf32>
    %72 = vector.broadcast %71 : vector<1x128xf32> to vector<64x128xf32>
    %73 = arith.addf %70, %72 : vector<64x128xf32>
    %cst_64 = arith.constant 0.000000e+00 : f32
    %74 = vector.broadcast %cst_64 : f32 to vector<64x128xf32>
    %75 = arith.maximumf %73, %74 : vector<64x128xf32>
    %76 = vector.shape_cast %75 : vector<64x128xf32> to vector<1x64x128xf32>
    %77 = arith.truncf %76 : vector<1x64x128xf32> to vector<1x64x128xbf16>
    %c0_65 = arith.constant 0 : index
    %c0_66 = arith.constant 0 : index
    %c0_67 = arith.constant 0 : index
    %78 = vector.load %arg4[%c0_65, %c0_66, %c0_67] : memref<1x64x128xbf16, #tpu.memory_space<vmem>>, vector<1x64x128xbf16>
    tpu.vector_store %arg4[%c0_65, %c0_66, %c0_67], %77 {strides = array<i32>} : memref<1x64x128xbf16, #tpu.memory_space<vmem>>, vector<1x64x128xbf16>,
    return
  }
  func.func @transform_0(%arg0: i32) -> (i32, i32, i32, i32) {
    %c0_i32 = arith.constant 0 : i32
    %c0_i32_0 = arith.constant 0 : i32
    %c0_i32_1 = arith.constant 0 : i32
    %c0_i32_2 = arith.constant 0 : i32
    return %arg0, %c0_i32, %c0_i32_0, %c0_i32_1 : i32, i32, i32, i32
  }
  func.func @transform_1(%arg0: i32) -> (i32, i32, i32) {
    %c0_i32 = arith.constant 0 : i32
    %c0_i32_0 = arith.constant 0 : i32
    %c0_i32_1 = arith.constant 0 : i32
    %c0_i32_2 = arith.constant 0 : i32
    return %c0_i32, %c0_i32_0, %c0_i32_1 : i32, i32, i32
  }
  func.func @transform_2(%arg0: i32) -> (i32, i32) {
    %c0_i32 = arith.constant 0 : i32
    %c0_i32_0 = arith.constant 0 : i32
    %c0_i32_1 = arith.constant 0 : i32
    return %c0_i32, %c0_i32_0 : i32, i32
  }
  func.func @transform_3(%arg0: i32) -> (i32, i32, i32) {
    %c0_i32 = arith.constant 0 : i32
    %c0_i32_0 = arith.constant 0 : i32
    %c0_i32_1 = arith.constant 0 : i32
    return %arg0, %c0_i32, %c0_i32_0 : i32, i32, i32
  }
}

module attributes {stable_mosaic.version = 11 : i64} {
  func.func @kernel(%arg0: i32, %arg1: memref<1x44x44x32xf32, #tpu.memory_space<vmem>>, %arg2: memref<9x32x128xbf16, #tpu.memory_space<vmem>>, %arg3: memref<1x128xf32, #tpu.memory_space<vmem>>, %arg4: memref<1x64x128xbf16, #tpu.memory_space<vmem>>) attributes {dimension_semantics = [#tpu.dimension_semantics<parallel>], iteration_bounds = array<i64: 2>, scalar_prefetch = 0 : i64, scratch_operands = 0 : i64, tpu.core_type = #tpu.core_type<tc>, window_params = [{transform_indices = @transform_0, window_bounds = array<i64: 1, 44, 44, 32>}, {pipeline_mode = #tpu.pipeline_mode<synchronous>, transform_indices = @transform_1, window_bounds = array<i64: 9, 32, 128>}, {pipeline_mode = #tpu.pipeline_mode<synchronous>, transform_indices = @transform_2, window_bounds = array<i64: 1, 128>}, {transform_indices = @transform_3, window_bounds = array<i64: 1, 64, 128>}]} {
    %c0 = arith.constant 0 : index
    %c6 = arith.constant 6 : index
    %c6_0 = arith.constant 6 : index
    %c0_1 = arith.constant 0 : index
    %0 = vector.load %arg1[%c0, %c6, %c6_0, %c0_1] : memref<1x44x44x32xf32, #tpu.memory_space<vmem>>, vector<1x8x8x32xf32>
    %1 = vector.shape_cast %0 : vector<1x8x8x32xf32> to vector<8x8x32xf32>
    %2 = vector.shape_cast %1 : vector<8x8x32xf32> to vector<64x32xf32>
    %3 = arith.truncf %2 : vector<64x32xf32> to vector<64x32xbf16>
    %c0_2 = arith.constant 0 : index
    %c0_3 = arith.constant 0 : index
    %c0_4 = arith.constant 0 : index
    %4 = vector.load %arg2[%c0_2, %c0_3, %c0_4] : memref<9x32x128xbf16, #tpu.memory_space<vmem>>, vector<1x32x128xbf16>
    %5 = vector.shape_cast %4 : vector<1x32x128xbf16> to vector<32x128xbf16>
    %cst = arith.constant dense<0.000000e+00> : vector<64x128xf32>
    %6 = tpu.matmul %3, %5, %cst {dimension_numbers = #tpu.dot_dimension_numbers<[1], [0], [0], [1], [0, 0, 1, 1], [], []>} : vector<64x32xbf16>, vector<32x128xbf16>, vector<64x128xf32> -> vector<64x128xf32>
    %c0_5 = arith.constant 0 : index
    %c6_6 = arith.constant 6 : index
    %c18 = arith.constant 18 : index
    %c0_7 = arith.constant 0 : index
    %7 = vector.load %arg1[%c0_5, %c6_6, %c18, %c0_7] : memref<1x44x44x32xf32, #tpu.memory_space<vmem>>, vector<1x8x8x32xf32>
    %8 = vector.shape_cast %7 : vector<1x8x8x32xf32> to vector<8x8x32xf32>
    %9 = vector.shape_cast %8 : vector<8x8x32xf32> to vector<64x32xf32>
    %10 = arith.truncf %9 : vector<64x32xf32> to vector<64x32xbf16>
    %c1 = arith.constant 1 : index
    %c0_8 = arith.constant 0 : index
    %c0_9 = arith.constant 0 : index
    %11 = vector.load %arg2[%c1, %c0_8, %c0_9] : memref<9x32x128xbf16, #tpu.memory_space<vmem>>, vector<1x32x128xbf16>
    %12 = vector.shape_cast %11 : vector<1x32x128xbf16> to vector<32x128xbf16>
    %cst_10 = arith.constant dense<0.000000e+00> : vector<64x128xf32>
    %13 = tpu.matmul %10, %12, %cst_10 {dimension_numbers = #tpu.dot_dimension_numbers<[1], [0], [0], [1], [0, 0, 1, 1], [], []>} : vector<64x32xbf16>, vector<32x128xbf16>, vector<64x128xf32> -> vector<64x128xf32>
    %14 = arith.addf %6, %13 : vector<64x128xf32>
    %c0_11 = arith.constant 0 : index
    %c6_12 = arith.constant 6 : index
    %c30 = arith.constant 30 : index
    %c0_13 = arith.constant 0 : index
    %15 = vector.load %arg1[%c0_11, %c6_12, %c30, %c0_13] : memref<1x44x44x32xf32, #tpu.memory_space<vmem>>, vector<1x8x8x32xf32>
    %16 = vector.shape_cast %15 : vector<1x8x8x32xf32> to vector<8x8x32xf32>
    %17 = vector.shape_cast %16 : vector<8x8x32xf32> to vector<64x32xf32>
    %18 = arith.truncf %17 : vector<64x32xf32> to vector<64x32xbf16>
    %c2 = arith.constant 2 : index
    %c0_14 = arith.constant 0 : index
    %c0_15 = arith.constant 0 : index
    %19 = vector.load %arg2[%c2, %c0_14, %c0_15] : memref<9x32x128xbf16, #tpu.memory_space<vmem>>, vector<1x32x128xbf16>
    %20 = vector.shape_cast %19 : vector<1x32x128xbf16> to vector<32x128xbf16>
    %cst_16 = arith.constant dense<0.000000e+00> : vector<64x128xf32>
    %21 = tpu.matmul %18, %20, %cst_16 {dimension_numbers = #tpu.dot_dimension_numbers<[1], [0], [0], [1], [0, 0, 1, 1], [], []>} : vector<64x32xbf16>, vector<32x128xbf16>, vector<64x128xf32> -> vector<64x128xf32>
    %22 = arith.addf %14, %21 : vector<64x128xf32>
    %c0_17 = arith.constant 0 : index
    %c18_18 = arith.constant 18 : index
    %c6_19 = arith.constant 6 : index
    %c0_20 = arith.constant 0 : index
    %23 = vector.load %arg1[%c0_17, %c18_18, %c6_19, %c0_20] : memref<1x44x44x32xf32, #tpu.memory_space<vmem>>, vector<1x8x8x32xf32>
    %24 = vector.shape_cast %23 : vector<1x8x8x32xf32> to vector<8x8x32xf32>
    %25 = vector.shape_cast %24 : vector<8x8x32xf32> to vector<64x32xf32>
    %26 = arith.truncf %25 : vector<64x32xf32> to vector<64x32xbf16>
    %c3 = arith.constant 3 : index
    %c0_21 = arith.constant 0 : index
    %c0_22 = arith.constant 0 : index
    %27 = vector.load %arg2[%c3, %c0_21, %c0_22] : memref<9x32x128xbf16, #tpu.memory_space<vmem>>, vector<1x32x128xbf16>
    %28 = vector.shape_cast %27 : vector<1x32x128xbf16> to vector<32x128xbf16>
    %cst_23 = arith.constant dense<0.000000e+00> : vector<64x128xf32>
    %29 = tpu.matmul %26, %28, %cst_23 {dimension_numbers = #tpu.dot_dimension_numbers<[1], [0], [0], [1], [0, 0, 1, 1], [], []>} : vector<64x32xbf16>, vector<32x128xbf16>, vector<64x128xf32> -> vector<64x128xf32>
    %30 = arith.addf %22, %29 : vector<64x128xf32>
    %c0_24 = arith.constant 0 : index
    %c18_25 = arith.constant 18 : index
    %c18_26 = arith.constant 18 : index
    %c0_27 = arith.constant 0 : index
    %31 = vector.load %arg1[%c0_24, %c18_25, %c18_26, %c0_27] : memref<1x44x44x32xf32, #tpu.memory_space<vmem>>, vector<1x8x8x32xf32>
    %32 = vector.shape_cast %31 : vector<1x8x8x32xf32> to vector<8x8x32xf32>
    %33 = vector.shape_cast %32 : vector<8x8x32xf32> to vector<64x32xf32>
    %34 = arith.truncf %33 : vector<64x32xf32> to vector<64x32xbf16>
    %c4 = arith.constant 4 : index
    %c0_28 = arith.constant 0 : index
    %c0_29 = arith.constant 0 : index
    %35 = vector.load %arg2[%c4, %c0_28, %c0_29] : memref<9x32x128xbf16, #tpu.memory_space<vmem>>, vector<1x32x128xbf16>
    %36 = vector.shape_cast %35 : vector<1x32x128xbf16> to vector<32x128xbf16>
    %cst_30 = arith.constant dense<0.000000e+00> : vector<64x128xf32>
    %37 = tpu.matmul %34, %36, %cst_30 {dimension_numbers = #tpu.dot_dimension_numbers<[1], [0], [0], [1], [0, 0, 1, 1], [], []>} : vector<64x32xbf16>, vector<32x128xbf16>, vector<64x128xf32> -> vector<64x128xf32>
    %38 = arith.addf %30, %37 : vector<64x128xf32>
    %c0_31 = arith.constant 0 : index
    %c18_32 = arith.constant 18 : index
    %c30_33 = arith.constant 30 : index
    %c0_34 = arith.constant 0 : index
    %39 = vector.load %arg1[%c0_31, %c18_32, %c30_33, %c0_34] : memref<1x44x44x32xf32, #tpu.memory_space<vmem>>, vector<1x8x8x32xf32>
    %40 = vector.shape_cast %39 : vector<1x8x8x32xf32> to vector<8x8x32xf32>
    %41 = vector.shape_cast %40 : vector<8x8x32xf32> to vector<64x32xf32>
    %42 = arith.truncf %41 : vector<64x32xf32> to vector<64x32xbf16>
    %c5 = arith.constant 5 : index
    %c0_35 = arith.constant 0 : index
    %c0_36 = arith.constant 0 : index
    %43 = vector.load %arg2[%c5, %c0_35, %c0_36] : memref<9x32x128xbf16, #tpu.memory_space<vmem>>, vector<1x32x128xbf16>
    %44 = vector.shape_cast %43 : vector<1x32x128xbf16> to vector<32x128xbf16>
    %cst_37 = arith.constant dense<0.000000e+00> : vector<64x128xf32>
    %45 = tpu.matmul %42, %44, %cst_37 {dimension_numbers = #tpu.dot_dimension_numbers<[1], [0], [0], [1], [0, 0, 1, 1], [], []>} : vector<64x32xbf16>, vector<32x128xbf16>, vector<64x128xf32> -> vector<64x128xf32>
    %46 = arith.addf %38, %45 : vector<64x128xf32>
    %c0_38 = arith.constant 0 : index
    %c30_39 = arith.constant 30 : index
    %c6_40 = arith.constant 6 : index
    %c0_41 = arith.constant 0 : index
    %47 = vector.load %arg1[%c0_38, %c30_39, %c6_40, %c0_41] : memref<1x44x44x32xf32, #tpu.memory_space<vmem>>, vector<1x8x8x32xf32>
    %48 = vector.shape_cast %47 : vector<1x8x8x32xf32> to vector<8x8x32xf32>
    %49 = vector.shape_cast %48 : vector<8x8x32xf32> to vector<64x32xf32>
    %50 = arith.truncf %49 : vector<64x32xf32> to vector<64x32xbf16>
    %c6_42 = arith.constant 6 : index
    %c0_43 = arith.constant 0 : index
    %c0_44 = arith.constant 0 : index
    %51 = vector.load %arg2[%c6_42, %c0_43, %c0_44] : memref<9x32x128xbf16, #tpu.memory_space<vmem>>, vector<1x32x128xbf16>
    %52 = vector.shape_cast %51 : vector<1x32x128xbf16> to vector<32x128xbf16>
    %cst_45 = arith.constant dense<0.000000e+00> : vector<64x128xf32>
    %53 = tpu.matmul %50, %52, %cst_45 {dimension_numbers = #tpu.dot_dimension_numbers<[1], [0], [0], [1], [0, 0, 1, 1], [], []>} : vector<64x32xbf16>, vector<32x128xbf16>, vector<64x128xf32> -> vector<64x128xf32>
    %54 = arith.addf %46, %53 : vector<64x128xf32>
    %c0_46 = arith.constant 0 : index
    %c30_47 = arith.constant 30 : index
    %c18_48 = arith.constant 18 : index
    %c0_49 = arith.constant 0 : index
    %55 = vector.load %arg1[%c0_46, %c30_47, %c18_48, %c0_49] : memref<1x44x44x32xf32, #tpu.memory_space<vmem>>, vector<1x8x8x32xf32>
    %56 = vector.shape_cast %55 : vector<1x8x8x32xf32> to vector<8x8x32xf32>
    %57 = vector.shape_cast %56 : vector<8x8x32xf32> to vector<64x32xf32>
    %58 = arith.truncf %57 : vector<64x32xf32> to vector<64x32xbf16>
    %c7 = arith.constant 7 : index
    %c0_50 = arith.constant 0 : index
    %c0_51 = arith.constant 0 : index
    %59 = vector.load %arg2[%c7, %c0_50, %c0_51] : memref<9x32x128xbf16, #tpu.memory_space<vmem>>, vector<1x32x128xbf16>
    %60 = vector.shape_cast %59 : vector<1x32x128xbf16> to vector<32x128xbf16>
    %cst_52 = arith.constant dense<0.000000e+00> : vector<64x128xf32>
    %61 = tpu.matmul %58, %60, %cst_52 {dimension_numbers = #tpu.dot_dimension_numbers<[1], [0], [0], [1], [0, 0, 1, 1], [], []>} : vector<64x32xbf16>, vector<32x128xbf16>, vector<64x128xf32> -> vector<64x128xf32>
    %62 = arith.addf %54, %61 : vector<64x128xf32>
    %c0_53 = arith.constant 0 : index
    %c30_54 = arith.constant 30 : index
    %c30_55 = arith.constant 30 : index
    %c0_56 = arith.constant 0 : index
    %63 = vector.load %arg1[%c0_53, %c30_54, %c30_55, %c0_56] : memref<1x44x44x32xf32, #tpu.memory_space<vmem>>, vector<1x8x8x32xf32>
    %64 = vector.shape_cast %63 : vector<1x8x8x32xf32> to vector<8x8x32xf32>
    %65 = vector.shape_cast %64 : vector<8x8x32xf32> to vector<64x32xf32>
    %66 = arith.truncf %65 : vector<64x32xf32> to vector<64x32xbf16>
    %c8 = arith.constant 8 : index
    %c0_57 = arith.constant 0 : index
    %c0_58 = arith.constant 0 : index
    %67 = vector.load %arg2[%c8, %c0_57, %c0_58] : memref<9x32x128xbf16, #tpu.memory_space<vmem>>, vector<1x32x128xbf16>
    %68 = vector.shape_cast %67 : vector<1x32x128xbf16> to vector<32x128xbf16>
    %cst_59 = arith.constant dense<0.000000e+00> : vector<64x128xf32>
    %69 = tpu.matmul %66, %68, %cst_59 {dimension_numbers = #tpu.dot_dimension_numbers<[1], [0], [0], [1], [0, 0, 1, 1], [], []>} : vector<64x32xbf16>, vector<32x128xbf16>, vector<64x128xf32> -> vector<64x128xf32>
    %70 = arith.addf %62, %69 : vector<64x128xf32>
    %c0_60 = arith.constant 0 : index
    %c0_61 = arith.constant 0 : index
    %71 = vector.load %arg3[%c0_60, %c0_61] : memref<1x128xf32, #tpu.memory_space<vmem>>, vector<1x128xf32>
    %72 = vector.broadcast %71 : vector<1x128xf32> to vector<64x128xf32>
    %73 = arith.addf %70, %72 : vector<64x128xf32>
    %cst_62 = arith.constant 0.000000e+00 : f32
    %74 = vector.broadcast %cst_62 : f32 to vector<64x128xf32>
    %75 = arith.maximumf %73, %74 : vector<64x128xf32>
    %76 = vector.shape_cast %75 : vector<64x128xf32> to vector<1x64x128xf32>
    %77 = arith.truncf %76 : vector<1x64x128xf32> to vector<1x64x128xbf16>
    %c0_63 = arith.constant 0 : index
    %c0_64 = arith.constant 0 : index
    %c0_65 = arith.constant 0 : index
    %78 = vector.load %arg4[%c0_63, %c0_64, %c0_65] : memref<1x64x128xbf16, #tpu.memory_space<vmem>>, vector<1x64x128xbf16>
    tpu.vector_store %arg4[%c0_63, %c0_64, %c0_65], %77 {strides = array<i32>} : memref<1x64x128xbf16, #tpu.memory_space<vmem>>, vector<1x64x128xbf16>,
    return
  }
  func.func @transform_0(%arg0: i32) -> (i32, i32, i32, i32) {
    %c0_i32 = arith.constant 0 : i32
    %c0_i32_0 = arith.constant 0 : i32
    %c0_i32_1 = arith.constant 0 : i32
    %c0_i32_2 = arith.constant 0 : i32
    return %arg0, %c0_i32, %c0_i32_0, %c0_i32_1 : i32, i32, i32, i32
  }
  func.func @transform_1(%arg0: i32) -> (i32, i32, i32) {
    %c0_i32 = arith.constant 0 : i32
    %c0_i32_0 = arith.constant 0 : i32
    %c0_i32_1 = arith.constant 0 : i32
    %c0_i32_2 = arith.constant 0 : i32
    return %c0_i32, %c0_i32_0, %c0_i32_1 : i32, i32, i32
  }
  func.func @transform_2(%arg0: i32) -> (i32, i32) {
    %c0_i32 = arith.constant 0 : i32
    %c0_i32_0 = arith.constant 0 : i32
    %c0_i32_1 = arith.constant 0 : i32
    return %c0_i32, %c0_i32_0 : i32, i32
  }
  func.func @transform_3(%arg0: i32) -> (i32, i32, i32) {
    %c0_i32 = arith.constant 0 : i32
    %c0_i32_0 = arith.constant 0 : i32
    %c0_i32_1 = arith.constant 0 : i32
    return %arg0, %c0_i32, %c0_i32_0 : i32, i32, i32
  }
}

module attributes {stable_mosaic.version = 11 : i64} {
  func.func @kernel(%arg0: i32, %arg1: memref<1x44x44x32xf32, #tpu.memory_space<vmem>>, %arg2: memref<9x32x128xbf16, #tpu.memory_space<vmem>>, %arg3: memref<1x128xf32, #tpu.memory_space<vmem>>, %arg4: memref<1x64x128xbf16, #tpu.memory_space<vmem>>) attributes {dimension_semantics = [#tpu.dimension_semantics<parallel>], iteration_bounds = array<i64: 2>, scalar_prefetch = 0 : i64, scratch_operands = 0 : i64, tpu.core_type = #tpu.core_type<tc>, window_params = [{transform_indices = @transform_0, window_bounds = array<i64: 1, 44, 44, 32>}, {pipeline_mode = #tpu.pipeline_mode<synchronous>, transform_indices = @transform_1, window_bounds = array<i64: 9, 32, 128>}, {pipeline_mode = #tpu.pipeline_mode<synchronous>, transform_indices = @transform_2, window_bounds = array<i64: 1, 128>}, {transform_indices = @transform_3, window_bounds = array<i64: 1, 64, 128>}]} {
    %c0 = arith.constant 0 : index
    %c0_0 = arith.constant 0 : index
    %c0_1 = arith.constant 0 : index
    %c0_2 = arith.constant 0 : index
    %0 = vector.load %arg1[%c0, %c0_0, %c0_1, %c0_2] : memref<1x44x44x32xf32, #tpu.memory_space<vmem>>, vector<1x8x8x32xf32>
    %1 = vector.shape_cast %0 : vector<1x8x8x32xf32> to vector<8x8x32xf32>
    %2 = vector.shape_cast %1 : vector<8x8x32xf32> to vector<64x32xf32>
    %3 = arith.truncf %2 : vector<64x32xf32> to vector<64x32xbf16>
    %c0_3 = arith.constant 0 : index
    %c0_4 = arith.constant 0 : index
    %c0_5 = arith.constant 0 : index
    %4 = vector.load %arg2[%c0_3, %c0_4, %c0_5] : memref<9x32x128xbf16, #tpu.memory_space<vmem>>, vector<1x32x128xbf16>
    %5 = vector.shape_cast %4 : vector<1x32x128xbf16> to vector<32x128xbf16>
    %cst = arith.constant dense<0.000000e+00> : vector<64x128xf32>
    %6 = tpu.matmul %3, %5, %cst {dimension_numbers = #tpu.dot_dimension_numbers<[1], [0], [0], [1], [0, 0, 1, 1], [], []>} : vector<64x32xbf16>, vector<32x128xbf16>, vector<64x128xf32> -> vector<64x128xf32>
    %c0_6 = arith.constant 0 : index
    %c0_7 = arith.constant 0 : index
    %c18 = arith.constant 18 : index
    %c0_8 = arith.constant 0 : index
    %7 = vector.load %arg1[%c0_6, %c0_7, %c18, %c0_8] : memref<1x44x44x32xf32, #tpu.memory_space<vmem>>, vector<1x8x8x32xf32>
    %8 = vector.shape_cast %7 : vector<1x8x8x32xf32> to vector<8x8x32xf32>
    %9 = vector.shape_cast %8 : vector<8x8x32xf32> to vector<64x32xf32>
    %10 = arith.truncf %9 : vector<64x32xf32> to vector<64x32xbf16>
    %c1 = arith.constant 1 : index
    %c0_9 = arith.constant 0 : index
    %c0_10 = arith.constant 0 : index
    %11 = vector.load %arg2[%c1, %c0_9, %c0_10] : memref<9x32x128xbf16, #tpu.memory_space<vmem>>, vector<1x32x128xbf16>
    %12 = vector.shape_cast %11 : vector<1x32x128xbf16> to vector<32x128xbf16>
    %cst_11 = arith.constant dense<0.000000e+00> : vector<64x128xf32>
    %13 = tpu.matmul %10, %12, %cst_11 {dimension_numbers = #tpu.dot_dimension_numbers<[1], [0], [0], [1], [0, 0, 1, 1], [], []>} : vector<64x32xbf16>, vector<32x128xbf16>, vector<64x128xf32> -> vector<64x128xf32>
    %14 = arith.addf %6, %13 : vector<64x128xf32>
    %c0_12 = arith.constant 0 : index
    %c0_13 = arith.constant 0 : index
    %c36 = arith.constant 36 : index
    %c0_14 = arith.constant 0 : index
    %15 = vector.load %arg1[%c0_12, %c0_13, %c36, %c0_14] : memref<1x44x44x32xf32, #tpu.memory_space<vmem>>, vector<1x8x8x32xf32>
    %16 = vector.shape_cast %15 : vector<1x8x8x32xf32> to vector<8x8x32xf32>
    %17 = vector.shape_cast %16 : vector<8x8x32xf32> to vector<64x32xf32>
    %18 = arith.truncf %17 : vector<64x32xf32> to vector<64x32xbf16>
    %c2 = arith.constant 2 : index
    %c0_15 = arith.constant 0 : index
    %c0_16 = arith.constant 0 : index
    %19 = vector.load %arg2[%c2, %c0_15, %c0_16] : memref<9x32x128xbf16, #tpu.memory_space<vmem>>, vector<1x32x128xbf16>
    %20 = vector.shape_cast %19 : vector<1x32x128xbf16> to vector<32x128xbf16>
    %cst_17 = arith.constant dense<0.000000e+00> : vector<64x128xf32>
    %21 = tpu.matmul %18, %20, %cst_17 {dimension_numbers = #tpu.dot_dimension_numbers<[1], [0], [0], [1], [0, 0, 1, 1], [], []>} : vector<64x32xbf16>, vector<32x128xbf16>, vector<64x128xf32> -> vector<64x128xf32>
    %22 = arith.addf %14, %21 : vector<64x128xf32>
    %c0_18 = arith.constant 0 : index
    %c18_19 = arith.constant 18 : index
    %c0_20 = arith.constant 0 : index
    %c0_21 = arith.constant 0 : index
    %23 = vector.load %arg1[%c0_18, %c18_19, %c0_20, %c0_21] : memref<1x44x44x32xf32, #tpu.memory_space<vmem>>, vector<1x8x8x32xf32>
    %24 = vector.shape_cast %23 : vector<1x8x8x32xf32> to vector<8x8x32xf32>
    %25 = vector.shape_cast %24 : vector<8x8x32xf32> to vector<64x32xf32>
    %26 = arith.truncf %25 : vector<64x32xf32> to vector<64x32xbf16>
    %c3 = arith.constant 3 : index
    %c0_22 = arith.constant 0 : index
    %c0_23 = arith.constant 0 : index
    %27 = vector.load %arg2[%c3, %c0_22, %c0_23] : memref<9x32x128xbf16, #tpu.memory_space<vmem>>, vector<1x32x128xbf16>
    %28 = vector.shape_cast %27 : vector<1x32x128xbf16> to vector<32x128xbf16>
    %cst_24 = arith.constant dense<0.000000e+00> : vector<64x128xf32>
    %29 = tpu.matmul %26, %28, %cst_24 {dimension_numbers = #tpu.dot_dimension_numbers<[1], [0], [0], [1], [0, 0, 1, 1], [], []>} : vector<64x32xbf16>, vector<32x128xbf16>, vector<64x128xf32> -> vector<64x128xf32>
    %30 = arith.addf %22, %29 : vector<64x128xf32>
    %c0_25 = arith.constant 0 : index
    %c18_26 = arith.constant 18 : index
    %c18_27 = arith.constant 18 : index
    %c0_28 = arith.constant 0 : index
    %31 = vector.load %arg1[%c0_25, %c18_26, %c18_27, %c0_28] : memref<1x44x44x32xf32, #tpu.memory_space<vmem>>, vector<1x8x8x32xf32>
    %32 = vector.shape_cast %31 : vector<1x8x8x32xf32> to vector<8x8x32xf32>
    %33 = vector.shape_cast %32 : vector<8x8x32xf32> to vector<64x32xf32>
    %34 = arith.truncf %33 : vector<64x32xf32> to vector<64x32xbf16>
    %c4 = arith.constant 4 : index
    %c0_29 = arith.constant 0 : index
    %c0_30 = arith.constant 0 : index
    %35 = vector.load %arg2[%c4, %c0_29, %c0_30] : memref<9x32x128xbf16, #tpu.memory_space<vmem>>, vector<1x32x128xbf16>
    %36 = vector.shape_cast %35 : vector<1x32x128xbf16> to vector<32x128xbf16>
    %cst_31 = arith.constant dense<0.000000e+00> : vector<64x128xf32>
    %37 = tpu.matmul %34, %36, %cst_31 {dimension_numbers = #tpu.dot_dimension_numbers<[1], [0], [0], [1], [0, 0, 1, 1], [], []>} : vector<64x32xbf16>, vector<32x128xbf16>, vector<64x128xf32> -> vector<64x128xf32>
    %38 = arith.addf %30, %37 : vector<64x128xf32>
    %c0_32 = arith.constant 0 : index
    %c18_33 = arith.constant 18 : index
    %c36_34 = arith.constant 36 : index
    %c0_35 = arith.constant 0 : index
    %39 = vector.load %arg1[%c0_32, %c18_33, %c36_34, %c0_35] : memref<1x44x44x32xf32, #tpu.memory_space<vmem>>, vector<1x8x8x32xf32>
    %40 = vector.shape_cast %39 : vector<1x8x8x32xf32> to vector<8x8x32xf32>
    %41 = vector.shape_cast %40 : vector<8x8x32xf32> to vector<64x32xf32>
    %42 = arith.truncf %41 : vector<64x32xf32> to vector<64x32xbf16>
    %c5 = arith.constant 5 : index
    %c0_36 = arith.constant 0 : index
    %c0_37 = arith.constant 0 : index
    %43 = vector.load %arg2[%c5, %c0_36, %c0_37] : memref<9x32x128xbf16, #tpu.memory_space<vmem>>, vector<1x32x128xbf16>
    %44 = vector.shape_cast %43 : vector<1x32x128xbf16> to vector<32x128xbf16>
    %cst_38 = arith.constant dense<0.000000e+00> : vector<64x128xf32>
    %45 = tpu.matmul %42, %44, %cst_38 {dimension_numbers = #tpu.dot_dimension_numbers<[1], [0], [0], [1], [0, 0, 1, 1], [], []>} : vector<64x32xbf16>, vector<32x128xbf16>, vector<64x128xf32> -> vector<64x128xf32>
    %46 = arith.addf %38, %45 : vector<64x128xf32>
    %c0_39 = arith.constant 0 : index
    %c36_40 = arith.constant 36 : index
    %c0_41 = arith.constant 0 : index
    %c0_42 = arith.constant 0 : index
    %47 = vector.load %arg1[%c0_39, %c36_40, %c0_41, %c0_42] : memref<1x44x44x32xf32, #tpu.memory_space<vmem>>, vector<1x8x8x32xf32>
    %48 = vector.shape_cast %47 : vector<1x8x8x32xf32> to vector<8x8x32xf32>
    %49 = vector.shape_cast %48 : vector<8x8x32xf32> to vector<64x32xf32>
    %50 = arith.truncf %49 : vector<64x32xf32> to vector<64x32xbf16>
    %c6 = arith.constant 6 : index
    %c0_43 = arith.constant 0 : index
    %c0_44 = arith.constant 0 : index
    %51 = vector.load %arg2[%c6, %c0_43, %c0_44] : memref<9x32x128xbf16, #tpu.memory_space<vmem>>, vector<1x32x128xbf16>
    %52 = vector.shape_cast %51 : vector<1x32x128xbf16> to vector<32x128xbf16>
    %cst_45 = arith.constant dense<0.000000e+00> : vector<64x128xf32>
    %53 = tpu.matmul %50, %52, %cst_45 {dimension_numbers = #tpu.dot_dimension_numbers<[1], [0], [0], [1], [0, 0, 1, 1], [], []>} : vector<64x32xbf16>, vector<32x128xbf16>, vector<64x128xf32> -> vector<64x128xf32>
    %54 = arith.addf %46, %53 : vector<64x128xf32>
    %c0_46 = arith.constant 0 : index
    %c36_47 = arith.constant 36 : index
    %c18_48 = arith.constant 18 : index
    %c0_49 = arith.constant 0 : index
    %55 = vector.load %arg1[%c0_46, %c36_47, %c18_48, %c0_49] : memref<1x44x44x32xf32, #tpu.memory_space<vmem>>, vector<1x8x8x32xf32>
    %56 = vector.shape_cast %55 : vector<1x8x8x32xf32> to vector<8x8x32xf32>
    %57 = vector.shape_cast %56 : vector<8x8x32xf32> to vector<64x32xf32>
    %58 = arith.truncf %57 : vector<64x32xf32> to vector<64x32xbf16>
    %c7 = arith.constant 7 : index
    %c0_50 = arith.constant 0 : index
    %c0_51 = arith.constant 0 : index
    %59 = vector.load %arg2[%c7, %c0_50, %c0_51] : memref<9x32x128xbf16, #tpu.memory_space<vmem>>, vector<1x32x128xbf16>
    %60 = vector.shape_cast %59 : vector<1x32x128xbf16> to vector<32x128xbf16>
    %cst_52 = arith.constant dense<0.000000e+00> : vector<64x128xf32>
    %61 = tpu.matmul %58, %60, %cst_52 {dimension_numbers = #tpu.dot_dimension_numbers<[1], [0], [0], [1], [0, 0, 1, 1], [], []>} : vector<64x32xbf16>, vector<32x128xbf16>, vector<64x128xf32> -> vector<64x128xf32>
    %62 = arith.addf %54, %61 : vector<64x128xf32>
    %c0_53 = arith.constant 0 : index
    %c36_54 = arith.constant 36 : index
    %c36_55 = arith.constant 36 : index
    %c0_56 = arith.constant 0 : index
    %63 = vector.load %arg1[%c0_53, %c36_54, %c36_55, %c0_56] : memref<1x44x44x32xf32, #tpu.memory_space<vmem>>, vector<1x8x8x32xf32>
    %64 = vector.shape_cast %63 : vector<1x8x8x32xf32> to vector<8x8x32xf32>
    %65 = vector.shape_cast %64 : vector<8x8x32xf32> to vector<64x32xf32>
    %66 = arith.truncf %65 : vector<64x32xf32> to vector<64x32xbf16>
    %c8 = arith.constant 8 : index
    %c0_57 = arith.constant 0 : index
    %c0_58 = arith.constant 0 : index
    %67 = vector.load %arg2[%c8, %c0_57, %c0_58] : memref<9x32x128xbf16, #tpu.memory_space<vmem>>, vector<1x32x128xbf16>
    %68 = vector.shape_cast %67 : vector<1x32x128xbf16> to vector<32x128xbf16>
    %cst_59 = arith.constant dense<0.000000e+00> : vector<64x128xf32>
    %69 = tpu.matmul %66, %68, %cst_59 {dimension_numbers = #tpu.dot_dimension_numbers<[1], [0], [0], [1], [0, 0, 1, 1], [], []>} : vector<64x32xbf16>, vector<32x128xbf16>, vector<64x128xf32> -> vector<64x128xf32>
    %70 = arith.addf %62, %69 : vector<64x128xf32>
    %c0_60 = arith.constant 0 : index
    %c0_61 = arith.constant 0 : index
    %71 = vector.load %arg3[%c0_60, %c0_61] : memref<1x128xf32, #tpu.memory_space<vmem>>, vector<1x128xf32>
    %72 = vector.broadcast %71 : vector<1x128xf32> to vector<64x128xf32>
    %73 = arith.addf %70, %72 : vector<64x128xf32>
    %cst_62 = arith.constant 0.000000e+00 : f32
    %74 = vector.broadcast %cst_62 : f32 to vector<64x128xf32>
    %75 = arith.maximumf %73, %74 : vector<64x128xf32>
    %76 = vector.shape_cast %75 : vector<64x128xf32> to vector<1x64x128xf32>
    %77 = arith.truncf %76 : vector<1x64x128xf32> to vector<1x64x128xbf16>
    %c0_63 = arith.constant 0 : index
    %c0_64 = arith.constant 0 : index
    %c0_65 = arith.constant 0 : index
    %78 = vector.load %arg4[%c0_63, %c0_64, %c0_65] : memref<1x64x128xbf16, #tpu.memory_space<vmem>>, vector<1x64x128xbf16>
    tpu.vector_store %arg4[%c0_63, %c0_64, %c0_65], %77 {strides = array<i32>} : memref<1x64x128xbf16, #tpu.memory_space<vmem>>, vector<1x64x128xbf16>,
    return
  }
  func.func @transform_0(%arg0: i32) -> (i32, i32, i32, i32) {
    %c0_i32 = arith.constant 0 : i32
    %c0_i32_0 = arith.constant 0 : i32
    %c0_i32_1 = arith.constant 0 : i32
    %c0_i32_2 = arith.constant 0 : i32
    return %arg0, %c0_i32, %c0_i32_0, %c0_i32_1 : i32, i32, i32, i32
  }
  func.func @transform_1(%arg0: i32) -> (i32, i32, i32) {
    %c0_i32 = arith.constant 0 : i32
    %c0_i32_0 = arith.constant 0 : i32
    %c0_i32_1 = arith.constant 0 : i32
    %c0_i32_2 = arith.constant 0 : i32
    return %c0_i32, %c0_i32_0, %c0_i32_1 : i32, i32, i32
  }
  func.func @transform_2(%arg0: i32) -> (i32, i32) {
    %c0_i32 = arith.constant 0 : i32
    %c0_i32_0 = arith.constant 0 : i32
    %c0_i32_1 = arith.constant 0 : i32
    return %c0_i32, %c0_i32_0 : i32, i32
  }
  func.func @transform_3(%arg0: i32) -> (i32, i32, i32) {
    %c0_i32 = arith.constant 0 : i32
    %c0_i32_0 = arith.constant 0 : i32
    %c0_i32_1 = arith.constant 0 : i32
    return %arg0, %c0_i32, %c0_i32_0 : i32, i32, i32
  }
}

module attributes {stable_mosaic.version = 11 : i64} {
  func.func @kernel(%arg0: i32, %arg1: memref<1x44x44x32xf32, #tpu.memory_space<vmem>>, %arg2: memref<9x32x128xbf16, #tpu.memory_space<vmem>>, %arg3: memref<1x128xf32, #tpu.memory_space<vmem>>, %arg4: memref<1x64x128xbf16, #tpu.memory_space<vmem>>) attributes {dimension_semantics = [#tpu.dimension_semantics<parallel>], iteration_bounds = array<i64: 2>, scalar_prefetch = 0 : i64, scratch_operands = 0 : i64, tpu.core_type = #tpu.core_type<tc>, window_params = [{transform_indices = @transform_0, window_bounds = array<i64: 1, 44, 44, 32>}, {pipeline_mode = #tpu.pipeline_mode<synchronous>, transform_indices = @transform_1, window_bounds = array<i64: 9, 32, 128>}, {pipeline_mode = #tpu.pipeline_mode<synchronous>, transform_indices = @transform_2, window_bounds = array<i64: 1, 128>}, {transform_indices = @transform_3, window_bounds = array<i64: 1, 64, 128>}]} {
    %c0 = arith.constant 0 : index
    %c12 = arith.constant 12 : index
    %c12_0 = arith.constant 12 : index
    %c0_1 = arith.constant 0 : index
    %0 = vector.load %arg1[%c0, %c12, %c12_0, %c0_1] : memref<1x44x44x32xf32, #tpu.memory_space<vmem>>, vector<1x8x8x32xf32>
    %1 = vector.shape_cast %0 : vector<1x8x8x32xf32> to vector<8x8x32xf32>
    %2 = vector.shape_cast %1 : vector<8x8x32xf32> to vector<64x32xf32>
    %3 = arith.truncf %2 : vector<64x32xf32> to vector<64x32xbf16>
    %c0_2 = arith.constant 0 : index
    %c0_3 = arith.constant 0 : index
    %c0_4 = arith.constant 0 : index
    %4 = vector.load %arg2[%c0_2, %c0_3, %c0_4] : memref<9x32x128xbf16, #tpu.memory_space<vmem>>, vector<1x32x128xbf16>
    %5 = vector.shape_cast %4 : vector<1x32x128xbf16> to vector<32x128xbf16>
    %cst = arith.constant dense<0.000000e+00> : vector<64x128xf32>
    %6 = tpu.matmul %3, %5, %cst {dimension_numbers = #tpu.dot_dimension_numbers<[1], [0], [0], [1], [0, 0, 1, 1], [], []>} : vector<64x32xbf16>, vector<32x128xbf16>, vector<64x128xf32> -> vector<64x128xf32>
    %c0_5 = arith.constant 0 : index
    %c12_6 = arith.constant 12 : index
    %c18 = arith.constant 18 : index
    %c0_7 = arith.constant 0 : index
    %7 = vector.load %arg1[%c0_5, %c12_6, %c18, %c0_7] : memref<1x44x44x32xf32, #tpu.memory_space<vmem>>, vector<1x8x8x32xf32>
    %8 = vector.shape_cast %7 : vector<1x8x8x32xf32> to vector<8x8x32xf32>
    %9 = vector.shape_cast %8 : vector<8x8x32xf32> to vector<64x32xf32>
    %10 = arith.truncf %9 : vector<64x32xf32> to vector<64x32xbf16>
    %c1 = arith.constant 1 : index
    %c0_8 = arith.constant 0 : index
    %c0_9 = arith.constant 0 : index
    %11 = vector.load %arg2[%c1, %c0_8, %c0_9] : memref<9x32x128xbf16, #tpu.memory_space<vmem>>, vector<1x32x128xbf16>
    %12 = vector.shape_cast %11 : vector<1x32x128xbf16> to vector<32x128xbf16>
    %cst_10 = arith.constant dense<0.000000e+00> : vector<64x128xf32>
    %13 = tpu.matmul %10, %12, %cst_10 {dimension_numbers = #tpu.dot_dimension_numbers<[1], [0], [0], [1], [0, 0, 1, 1], [], []>} : vector<64x32xbf16>, vector<32x128xbf16>, vector<64x128xf32> -> vector<64x128xf32>
    %14 = arith.addf %6, %13 : vector<64x128xf32>
    %c0_11 = arith.constant 0 : index
    %c12_12 = arith.constant 12 : index
    %c24 = arith.constant 24 : index
    %c0_13 = arith.constant 0 : index
    %15 = vector.load %arg1[%c0_11, %c12_12, %c24, %c0_13] : memref<1x44x44x32xf32, #tpu.memory_space<vmem>>, vector<1x8x8x32xf32>
    %16 = vector.shape_cast %15 : vector<1x8x8x32xf32> to vector<8x8x32xf32>
    %17 = vector.shape_cast %16 : vector<8x8x32xf32> to vector<64x32xf32>
    %18 = arith.truncf %17 : vector<64x32xf32> to vector<64x32xbf16>
    %c2 = arith.constant 2 : index
    %c0_14 = arith.constant 0 : index
    %c0_15 = arith.constant 0 : index
    %19 = vector.load %arg2[%c2, %c0_14, %c0_15] : memref<9x32x128xbf16, #tpu.memory_space<vmem>>, vector<1x32x128xbf16>
    %20 = vector.shape_cast %19 : vector<1x32x128xbf16> to vector<32x128xbf16>
    %cst_16 = arith.constant dense<0.000000e+00> : vector<64x128xf32>
    %21 = tpu.matmul %18, %20, %cst_16 {dimension_numbers = #tpu.dot_dimension_numbers<[1], [0], [0], [1], [0, 0, 1, 1], [], []>} : vector<64x32xbf16>, vector<32x128xbf16>, vector<64x128xf32> -> vector<64x128xf32>
    %22 = arith.addf %14, %21 : vector<64x128xf32>
    %c0_17 = arith.constant 0 : index
    %c18_18 = arith.constant 18 : index
    %c12_19 = arith.constant 12 : index
    %c0_20 = arith.constant 0 : index
    %23 = vector.load %arg1[%c0_17, %c18_18, %c12_19, %c0_20] : memref<1x44x44x32xf32, #tpu.memory_space<vmem>>, vector<1x8x8x32xf32>
    %24 = vector.shape_cast %23 : vector<1x8x8x32xf32> to vector<8x8x32xf32>
    %25 = vector.shape_cast %24 : vector<8x8x32xf32> to vector<64x32xf32>
    %26 = arith.truncf %25 : vector<64x32xf32> to vector<64x32xbf16>
    %c3 = arith.constant 3 : index
    %c0_21 = arith.constant 0 : index
    %c0_22 = arith.constant 0 : index
    %27 = vector.load %arg2[%c3, %c0_21, %c0_22] : memref<9x32x128xbf16, #tpu.memory_space<vmem>>, vector<1x32x128xbf16>
    %28 = vector.shape_cast %27 : vector<1x32x128xbf16> to vector<32x128xbf16>
    %cst_23 = arith.constant dense<0.000000e+00> : vector<64x128xf32>
    %29 = tpu.matmul %26, %28, %cst_23 {dimension_numbers = #tpu.dot_dimension_numbers<[1], [0], [0], [1], [0, 0, 1, 1], [], []>} : vector<64x32xbf16>, vector<32x128xbf16>, vector<64x128xf32> -> vector<64x128xf32>
    %30 = arith.addf %22, %29 : vector<64x128xf32>
    %c0_24 = arith.constant 0 : index
    %c18_25 = arith.constant 18 : index
    %c18_26 = arith.constant 18 : index
    %c0_27 = arith.constant 0 : index
    %31 = vector.load %arg1[%c0_24, %c18_25, %c18_26, %c0_27] : memref<1x44x44x32xf32, #tpu.memory_space<vmem>>, vector<1x8x8x32xf32>
    %32 = vector.shape_cast %31 : vector<1x8x8x32xf32> to vector<8x8x32xf32>
    %33 = vector.shape_cast %32 : vector<8x8x32xf32> to vector<64x32xf32>
    %34 = arith.truncf %33 : vector<64x32xf32> to vector<64x32xbf16>
    %c4 = arith.constant 4 : index
    %c0_28 = arith.constant 0 : index
    %c0_29 = arith.constant 0 : index
    %35 = vector.load %arg2[%c4, %c0_28, %c0_29] : memref<9x32x128xbf16, #tpu.memory_space<vmem>>, vector<1x32x128xbf16>
    %36 = vector.shape_cast %35 : vector<1x32x128xbf16> to vector<32x128xbf16>
    %cst_30 = arith.constant dense<0.000000e+00> : vector<64x128xf32>
    %37 = tpu.matmul %34, %36, %cst_30 {dimension_numbers = #tpu.dot_dimension_numbers<[1], [0], [0], [1], [0, 0, 1, 1], [], []>} : vector<64x32xbf16>, vector<32x128xbf16>, vector<64x128xf32> -> vector<64x128xf32>
    %38 = arith.addf %30, %37 : vector<64x128xf32>
    %c0_31 = arith.constant 0 : index
    %c18_32 = arith.constant 18 : index
    %c24_33 = arith.constant 24 : index
    %c0_34 = arith.constant 0 : index
    %39 = vector.load %arg1[%c0_31, %c18_32, %c24_33, %c0_34] : memref<1x44x44x32xf32, #tpu.memory_space<vmem>>, vector<1x8x8x32xf32>
    %40 = vector.shape_cast %39 : vector<1x8x8x32xf32> to vector<8x8x32xf32>
    %41 = vector.shape_cast %40 : vector<8x8x32xf32> to vector<64x32xf32>
    %42 = arith.truncf %41 : vector<64x32xf32> to vector<64x32xbf16>
    %c5 = arith.constant 5 : index
    %c0_35 = arith.constant 0 : index
    %c0_36 = arith.constant 0 : index
    %43 = vector.load %arg2[%c5, %c0_35, %c0_36] : memref<9x32x128xbf16, #tpu.memory_space<vmem>>, vector<1x32x128xbf16>
    %44 = vector.shape_cast %43 : vector<1x32x128xbf16> to vector<32x128xbf16>
    %cst_37 = arith.constant dense<0.000000e+00> : vector<64x128xf32>
    %45 = tpu.matmul %42, %44, %cst_37 {dimension_numbers = #tpu.dot_dimension_numbers<[1], [0], [0], [1], [0, 0, 1, 1], [], []>} : vector<64x32xbf16>, vector<32x128xbf16>, vector<64x128xf32> -> vector<64x128xf32>
    %46 = arith.addf %38, %45 : vector<64x128xf32>
    %c0_38 = arith.constant 0 : index
    %c24_39 = arith.constant 24 : index
    %c12_40 = arith.constant 12 : index
    %c0_41 = arith.constant 0 : index
    %47 = vector.load %arg1[%c0_38, %c24_39, %c12_40, %c0_41] : memref<1x44x44x32xf32, #tpu.memory_space<vmem>>, vector<1x8x8x32xf32>
    %48 = vector.shape_cast %47 : vector<1x8x8x32xf32> to vector<8x8x32xf32>
    %49 = vector.shape_cast %48 : vector<8x8x32xf32> to vector<64x32xf32>
    %50 = arith.truncf %49 : vector<64x32xf32> to vector<64x32xbf16>
    %c6 = arith.constant 6 : index
    %c0_42 = arith.constant 0 : index
    %c0_43 = arith.constant 0 : index
    %51 = vector.load %arg2[%c6, %c0_42, %c0_43] : memref<9x32x128xbf16, #tpu.memory_space<vmem>>, vector<1x32x128xbf16>
    %52 = vector.shape_cast %51 : vector<1x32x128xbf16> to vector<32x128xbf16>
    %cst_44 = arith.constant dense<0.000000e+00> : vector<64x128xf32>
    %53 = tpu.matmul %50, %52, %cst_44 {dimension_numbers = #tpu.dot_dimension_numbers<[1], [0], [0], [1], [0, 0, 1, 1], [], []>} : vector<64x32xbf16>, vector<32x128xbf16>, vector<64x128xf32> -> vector<64x128xf32>
    %54 = arith.addf %46, %53 : vector<64x128xf32>
    %c0_45 = arith.constant 0 : index
    %c24_46 = arith.constant 24 : index
    %c18_47 = arith.constant 18 : index
    %c0_48 = arith.constant 0 : index
    %55 = vector.load %arg1[%c0_45, %c24_46, %c18_47, %c0_48] : memref<1x44x44x32xf32, #tpu.memory_space<vmem>>, vector<1x8x8x32xf32>
    %56 = vector.shape_cast %55 : vector<1x8x8x32xf32> to vector<8x8x32xf32>
    %57 = vector.shape_cast %56 : vector<8x8x32xf32> to vector<64x32xf32>
    %58 = arith.truncf %57 : vector<64x32xf32> to vector<64x32xbf16>
    %c7 = arith.constant 7 : index
    %c0_49 = arith.constant 0 : index
    %c0_50 = arith.constant 0 : index
    %59 = vector.load %arg2[%c7, %c0_49, %c0_50] : memref<9x32x128xbf16, #tpu.memory_space<vmem>>, vector<1x32x128xbf16>
    %60 = vector.shape_cast %59 : vector<1x32x128xbf16> to vector<32x128xbf16>
    %cst_51 = arith.constant dense<0.000000e+00> : vector<64x128xf32>
    %61 = tpu.matmul %58, %60, %cst_51 {dimension_numbers = #tpu.dot_dimension_numbers<[1], [0], [0], [1], [0, 0, 1, 1], [], []>} : vector<64x32xbf16>, vector<32x128xbf16>, vector<64x128xf32> -> vector<64x128xf32>
    %62 = arith.addf %54, %61 : vector<64x128xf32>
    %c0_52 = arith.constant 0 : index
    %c24_53 = arith.constant 24 : index
    %c24_54 = arith.constant 24 : index
    %c0_55 = arith.constant 0 : index
    %63 = vector.load %arg1[%c0_52, %c24_53, %c24_54, %c0_55] : memref<1x44x44x32xf32, #tpu.memory_space<vmem>>, vector<1x8x8x32xf32>
    %64 = vector.shape_cast %63 : vector<1x8x8x32xf32> to vector<8x8x32xf32>
    %65 = vector.shape_cast %64 : vector<8x8x32xf32> to vector<64x32xf32>
    %66 = arith.truncf %65 : vector<64x32xf32> to vector<64x32xbf16>
    %c8 = arith.constant 8 : index
    %c0_56 = arith.constant 0 : index
    %c0_57 = arith.constant 0 : index
    %67 = vector.load %arg2[%c8, %c0_56, %c0_57] : memref<9x32x128xbf16, #tpu.memory_space<vmem>>, vector<1x32x128xbf16>
    %68 = vector.shape_cast %67 : vector<1x32x128xbf16> to vector<32x128xbf16>
    %cst_58 = arith.constant dense<0.000000e+00> : vector<64x128xf32>
    %69 = tpu.matmul %66, %68, %cst_58 {dimension_numbers = #tpu.dot_dimension_numbers<[1], [0], [0], [1], [0, 0, 1, 1], [], []>} : vector<64x32xbf16>, vector<32x128xbf16>, vector<64x128xf32> -> vector<64x128xf32>
    %70 = arith.addf %62, %69 : vector<64x128xf32>
    %c0_59 = arith.constant 0 : index
    %c0_60 = arith.constant 0 : index
    %71 = vector.load %arg3[%c0_59, %c0_60] : memref<1x128xf32, #tpu.memory_space<vmem>>, vector<1x128xf32>
    %72 = vector.broadcast %71 : vector<1x128xf32> to vector<64x128xf32>
    %73 = arith.addf %70, %72 : vector<64x128xf32>
    %cst_61 = arith.constant 0.000000e+00 : f32
    %74 = vector.broadcast %cst_61 : f32 to vector<64x128xf32>
    %75 = arith.maximumf %73, %74 : vector<64x128xf32>
    %76 = vector.shape_cast %75 : vector<64x128xf32> to vector<1x64x128xf32>
    %77 = arith.truncf %76 : vector<1x64x128xf32> to vector<1x64x128xbf16>
    %c0_62 = arith.constant 0 : index
    %c0_63 = arith.constant 0 : index
    %c0_64 = arith.constant 0 : index
    %78 = vector.load %arg4[%c0_62, %c0_63, %c0_64] : memref<1x64x128xbf16, #tpu.memory_space<vmem>>, vector<1x64x128xbf16>
    tpu.vector_store %arg4[%c0_62, %c0_63, %c0_64], %77 {strides = array<i32>} : memref<1x64x128xbf16, #tpu.memory_space<vmem>>, vector<1x64x128xbf16>,
    return
  }
  func.func @transform_0(%arg0: i32) -> (i32, i32, i32, i32) {
    %c0_i32 = arith.constant 0 : i32
    %c0_i32_0 = arith.constant 0 : i32
    %c0_i32_1 = arith.constant 0 : i32
    %c0_i32_2 = arith.constant 0 : i32
    return %arg0, %c0_i32, %c0_i32_0, %c0_i32_1 : i32, i32, i32, i32
  }
  func.func @transform_1(%arg0: i32) -> (i32, i32, i32) {
    %c0_i32 = arith.constant 0 : i32
    %c0_i32_0 = arith.constant 0 : i32
    %c0_i32_1 = arith.constant 0 : i32
    %c0_i32_2 = arith.constant 0 : i32
    return %c0_i32, %c0_i32_0, %c0_i32_1 : i32, i32, i32
  }
  func.func @transform_2(%arg0: i32) -> (i32, i32) {
    %c0_i32 = arith.constant 0 : i32
    %c0_i32_0 = arith.constant 0 : i32
    %c0_i32_1 = arith.constant 0 : i32
    return %c0_i32, %c0_i32_0 : i32, i32
  }
  func.func @transform_3(%arg0: i32) -> (i32, i32, i32) {
    %c0_i32 = arith.constant 0 : i32
    %c0_i32_0 = arith.constant 0 : i32
    %c0_i32_1 = arith.constant 0 : i32
    return %arg0, %c0_i32, %c0_i32_0 : i32, i32, i32
  }
}

module attributes {stable_mosaic.version = 11 : i64} {
  func.func @kernel(%arg0: i32, %arg1: memref<128x128xbf16, #tpu.memory_space<vmem>>, %arg2: memref<128x128xbf16, #tpu.memory_space<vmem>>, %arg3: memref<128x128xbf16, #tpu.memory_space<vmem>>, %arg4: memref<128x128xbf16, #tpu.memory_space<vmem>>, %arg5: memref<128x128xbf16, #tpu.memory_space<vmem>>, %arg6: memref<128x128xbf16, #tpu.memory_space<vmem>>, %arg7: memref<128x128xbf16, #tpu.memory_space<vmem>>, %arg8: memref<128x128xbf16, #tpu.memory_space<vmem>>, %arg9: memref<128x128xbf16, #tpu.memory_space<vmem>>, %arg10: memref<128x128xbf16, #tpu.memory_space<vmem>>, %arg11: memref<1x128xf32, #tpu.memory_space<vmem>>, %arg12: memref<128x128xbf16, #tpu.memory_space<vmem>>) attributes {dimension_semantics = [#tpu.dimension_semantics<parallel>], iteration_bounds = array<i64: 1>, scalar_prefetch = 0 : i64, scratch_operands = 0 : i64, tpu.core_type = #tpu.core_type<tc>, window_params = [{transform_indices = @transform_0, window_bounds = array<i64: 128, 128>}, {transform_indices = @transform_1, window_bounds = array<i64: 128, 128>}, {transform_indices = @transform_2, window_bounds = array<i64: 128, 128>}, {transform_indices = @transform_3, window_bounds = array<i64: 128, 128>}, {transform_indices = @transform_4, window_bounds = array<i64: 128, 128>}, {pipeline_mode = #tpu.pipeline_mode<synchronous>, transform_indices = @transform_5, window_bounds = array<i64: 128, 128>}, {pipeline_mode = #tpu.pipeline_mode<synchronous>, transform_indices = @transform_6, window_bounds = array<i64: 128, 128>}, {pipeline_mode = #tpu.pipeline_mode<synchronous>, transform_indices = @transform_7, window_bounds = array<i64: 128, 128>}, {pipeline_mode = #tpu.pipeline_mode<synchronous>, transform_indices = @transform_8, window_bounds = array<i64: 128, 128>}, {pipeline_mode = #tpu.pipeline_mode<synchronous>, transform_indices = @transform_9, window_bounds = array<i64: 128, 128>}, {pipeline_mode = #tpu.pipeline_mode<synchronous>, transform_indices = @transform_10, window_bounds = array<i64: 1, 128>}, {transform_indices = @transform_11, window_bounds = array<i64: 128, 128>}]} {
    %c0 = arith.constant 0 : index
    %c0_0 = arith.constant 0 : index
    %0 = vector.load %arg1[%c0, %c0_0] : memref<128x128xbf16, #tpu.memory_space<vmem>>, vector<128x128xbf16>
    %c0_1 = arith.constant 0 : index
    %c0_2 = arith.constant 0 : index
    %1 = vector.load %arg6[%c0_1, %c0_2] : memref<128x128xbf16, #tpu.memory_space<vmem>>, vector<128x128xbf16>
    %cst = arith.constant dense<0.000000e+00> : vector<128x128xf32>
    %2 = tpu.matmul %0, %1, %cst {dimension_numbers = #tpu.dot_dimension_numbers<[1], [0], [0], [1], [0, 0, 1, 1], [], []>} : vector<128x128xbf16>, vector<128x128xbf16>, vector<128x128xf32> -> vector<128x128xf32>
    %c0_3 = arith.constant 0 : index
    %c0_4 = arith.constant 0 : index
    %3 = vector.load %arg2[%c0_3, %c0_4] : memref<128x128xbf16, #tpu.memory_space<vmem>>, vector<128x128xbf16>
    %c0_5 = arith.constant 0 : index
    %c0_6 = arith.constant 0 : index
    %4 = vector.load %arg7[%c0_5, %c0_6] : memref<128x128xbf16, #tpu.memory_space<vmem>>, vector<128x128xbf16>
    %cst_7 = arith.constant dense<0.000000e+00> : vector<128x128xf32>
    %5 = tpu.matmul %3, %4, %cst_7 {dimension_numbers = #tpu.dot_dimension_numbers<[1], [0], [0], [1], [0, 0, 1, 1], [], []>} : vector<128x128xbf16>, vector<128x128xbf16>, vector<128x128xf32> -> vector<128x128xf32>
    %6 = arith.addf %2, %5 : vector<128x128xf32>
    %c0_8 = arith.constant 0 : index
    %c0_9 = arith.constant 0 : index
    %7 = vector.load %arg3[%c0_8, %c0_9] : memref<128x128xbf16, #tpu.memory_space<vmem>>, vector<128x128xbf16>
    %c0_10 = arith.constant 0 : index
    %c0_11 = arith.constant 0 : index
    %8 = vector.load %arg8[%c0_10, %c0_11] : memref<128x128xbf16, #tpu.memory_space<vmem>>, vector<128x128xbf16>
    %cst_12 = arith.constant dense<0.000000e+00> : vector<128x128xf32>
    %9 = tpu.matmul %7, %8, %cst_12 {dimension_numbers = #tpu.dot_dimension_numbers<[1], [0], [0], [1], [0, 0, 1, 1], [], []>} : vector<128x128xbf16>, vector<128x128xbf16>, vector<128x128xf32> -> vector<128x128xf32>
    %10 = arith.addf %6, %9 : vector<128x128xf32>
    %c0_13 = arith.constant 0 : index
    %c0_14 = arith.constant 0 : index
    %11 = vector.load %arg4[%c0_13, %c0_14] : memref<128x128xbf16, #tpu.memory_space<vmem>>, vector<128x128xbf16>
    %c0_15 = arith.constant 0 : index
    %c0_16 = arith.constant 0 : index
    %12 = vector.load %arg9[%c0_15, %c0_16] : memref<128x128xbf16, #tpu.memory_space<vmem>>, vector<128x128xbf16>
    %cst_17 = arith.constant dense<0.000000e+00> : vector<128x128xf32>
    %13 = tpu.matmul %11, %12, %cst_17 {dimension_numbers = #tpu.dot_dimension_numbers<[1], [0], [0], [1], [0, 0, 1, 1], [], []>} : vector<128x128xbf16>, vector<128x128xbf16>, vector<128x128xf32> -> vector<128x128xf32>
    %14 = arith.addf %10, %13 : vector<128x128xf32>
    %c0_18 = arith.constant 0 : index
    %c0_19 = arith.constant 0 : index
    %15 = vector.load %arg5[%c0_18, %c0_19] : memref<128x128xbf16, #tpu.memory_space<vmem>>, vector<128x128xbf16>
    %c0_20 = arith.constant 0 : index
    %c0_21 = arith.constant 0 : index
    %16 = vector.load %arg10[%c0_20, %c0_21] : memref<128x128xbf16, #tpu.memory_space<vmem>>, vector<128x128xbf16>
    %cst_22 = arith.constant dense<0.000000e+00> : vector<128x128xf32>
    %17 = tpu.matmul %15, %16, %cst_22 {dimension_numbers = #tpu.dot_dimension_numbers<[1], [0], [0], [1], [0, 0, 1, 1], [], []>} : vector<128x128xbf16>, vector<128x128xbf16>, vector<128x128xf32> -> vector<128x128xf32>
    %18 = arith.addf %14, %17 : vector<128x128xf32>
    %c0_23 = arith.constant 0 : index
    %c0_24 = arith.constant 0 : index
    %19 = vector.load %arg11[%c0_23, %c0_24] : memref<1x128xf32, #tpu.memory_space<vmem>>, vector<1x128xf32>
    %20 = vector.broadcast %19 : vector<1x128xf32> to vector<128x128xf32>
    %21 = arith.addf %18, %20 : vector<128x128xf32>
    %cst_25 = arith.constant 0.000000e+00 : f32
    %22 = vector.broadcast %cst_25 : f32 to vector<128x128xf32>
    %23 = arith.maximumf %21, %22 : vector<128x128xf32>
    %24 = arith.truncf %23 : vector<128x128xf32> to vector<128x128xbf16>
    %c0_26 = arith.constant 0 : index
    %c0_27 = arith.constant 0 : index
    %25 = vector.load %arg12[%c0_26, %c0_27] : memref<128x128xbf16, #tpu.memory_space<vmem>>, vector<128x128xbf16>
    tpu.vector_store %arg12[%c0_26, %c0_27], %24 {strides = array<i32>} : memref<128x128xbf16, #tpu.memory_space<vmem>>, vector<128x128xbf16>,
    return
  }
  func.func @transform_0(%arg0: i32) -> (i32, i32) {
    %c0_i32 = arith.constant 0 : i32
    %c0_i32_0 = arith.constant 0 : i32
    return %arg0, %c0_i32 : i32, i32
  }
  func.func @transform_1(%arg0: i32) -> (i32, i32) {
    %c0_i32 = arith.constant 0 : i32
    %c0_i32_0 = arith.constant 0 : i32
    return %arg0, %c0_i32 : i32, i32
  }
  func.func @transform_2(%arg0: i32) -> (i32, i32) {
    %c0_i32 = arith.constant 0 : i32
    %c0_i32_0 = arith.constant 0 : i32
    return %arg0, %c0_i32 : i32, i32
  }
  func.func @transform_3(%arg0: i32) -> (i32, i32) {
    %c0_i32 = arith.constant 0 : i32
    %c0_i32_0 = arith.constant 0 : i32
    return %arg0, %c0_i32 : i32, i32
  }
  func.func @transform_4(%arg0: i32) -> (i32, i32) {
    %c0_i32 = arith.constant 0 : i32
    %c0_i32_0 = arith.constant 0 : i32
    return %arg0, %c0_i32 : i32, i32
  }
  func.func @transform_5(%arg0: i32) -> (i32, i32) {
    %c0_i32 = arith.constant 0 : i32
    %c0_i32_0 = arith.constant 0 : i32
    %c0_i32_1 = arith.constant 0 : i32
    return %c0_i32, %c0_i32_0 : i32, i32
  }
  func.func @transform_6(%arg0: i32) -> (i32, i32) {
    %c0_i32 = arith.constant 0 : i32
    %c0_i32_0 = arith.constant 0 : i32
    %c0_i32_1 = arith.constant 0 : i32
    return %c0_i32, %c0_i32_0 : i32, i32
  }
  func.func @transform_7(%arg0: i32) -> (i32, i32) {
    %c0_i32 = arith.constant 0 : i32
    %c0_i32_0 = arith.constant 0 : i32
    %c0_i32_1 = arith.constant 0 : i32
    return %c0_i32, %c0_i32_0 : i32, i32
  }
  func.func @transform_8(%arg0: i32) -> (i32, i32) {
    %c0_i32 = arith.constant 0 : i32
    %c0_i32_0 = arith.constant 0 : i32
    %c0_i32_1 = arith.constant 0 : i32
    return %c0_i32, %c0_i32_0 : i32, i32
  }
  func.func @transform_9(%arg0: i32) -> (i32, i32) {
    %c0_i32 = arith.constant 0 : i32
    %c0_i32_0 = arith.constant 0 : i32
    %c0_i32_1 = arith.constant 0 : i32
    return %c0_i32, %c0_i32_0 : i32, i32
  }
  func.func @transform_10(%arg0: i32) -> (i32, i32) {
    %c0_i32 = arith.constant 0 : i32
    %c0_i32_0 = arith.constant 0 : i32
    %c0_i32_1 = arith.constant 0 : i32
    return %c0_i32, %c0_i32_0 : i32, i32
  }
  func.func @transform_11(%arg0: i32) -> (i32, i32) {
    %c0_i32 = arith.constant 0 : i32
    %c0_i32_0 = arith.constant 0 : i32
    return %arg0, %c0_i32 : i32, i32
  }
}

module attributes {stable_mosaic.version = 11 : i64} {
  func.func @kernel(%arg0: i32, %arg1: memref<128x128xbf16, #tpu.memory_space<vmem>>, %arg2: memref<128x128xbf16, #tpu.memory_space<vmem>>, %arg3: memref<1x128xf32, #tpu.memory_space<vmem>>, %arg4: memref<128x128xbf16, #tpu.memory_space<vmem>>) attributes {dimension_semantics = [#tpu.dimension_semantics<parallel>], iteration_bounds = array<i64: 1>, scalar_prefetch = 0 : i64, scratch_operands = 0 : i64, tpu.core_type = #tpu.core_type<tc>, window_params = [{transform_indices = @transform_0, window_bounds = array<i64: 128, 128>}, {pipeline_mode = #tpu.pipeline_mode<synchronous>, transform_indices = @transform_1, window_bounds = array<i64: 128, 128>}, {pipeline_mode = #tpu.pipeline_mode<synchronous>, transform_indices = @transform_2, window_bounds = array<i64: 1, 128>}, {transform_indices = @transform_3, window_bounds = array<i64: 128, 128>}]} {
    %c0 = arith.constant 0 : index
    %c0_0 = arith.constant 0 : index
    %0 = vector.load %arg1[%c0, %c0_0] : memref<128x128xbf16, #tpu.memory_space<vmem>>, vector<128x128xbf16>
    %c0_1 = arith.constant 0 : index
    %c0_2 = arith.constant 0 : index
    %1 = vector.load %arg2[%c0_1, %c0_2] : memref<128x128xbf16, #tpu.memory_space<vmem>>, vector<128x128xbf16>
    %cst = arith.constant dense<0.000000e+00> : vector<128x128xf32>
    %2 = tpu.matmul %0, %1, %cst {dimension_numbers = #tpu.dot_dimension_numbers<[1], [0], [0], [1], [0, 0, 1, 1], [], []>} : vector<128x128xbf16>, vector<128x128xbf16>, vector<128x128xf32> -> vector<128x128xf32>
    %c0_3 = arith.constant 0 : index
    %c0_4 = arith.constant 0 : index
    %3 = vector.load %arg3[%c0_3, %c0_4] : memref<1x128xf32, #tpu.memory_space<vmem>>, vector<1x128xf32>
    %4 = vector.broadcast %3 : vector<1x128xf32> to vector<128x128xf32>
    %5 = arith.addf %2, %4 : vector<128x128xf32>
    %cst_5 = arith.constant 0.000000e+00 : f32
    %6 = vector.broadcast %cst_5 : f32 to vector<128x128xf32>
    %7 = arith.maximumf %5, %6 : vector<128x128xf32>
    %8 = arith.truncf %7 : vector<128x128xf32> to vector<128x128xbf16>
    %c0_6 = arith.constant 0 : index
    %c0_7 = arith.constant 0 : index
    %9 = vector.load %arg4[%c0_6, %c0_7] : memref<128x128xbf16, #tpu.memory_space<vmem>>, vector<128x128xbf16>
    tpu.vector_store %arg4[%c0_6, %c0_7], %8 {strides = array<i32>} : memref<128x128xbf16, #tpu.memory_space<vmem>>, vector<128x128xbf16>,
    return
  }
  func.func @transform_0(%arg0: i32) -> (i32, i32) {
    %c0_i32 = arith.constant 0 : i32
    %c0_i32_0 = arith.constant 0 : i32
    return %arg0, %c0_i32 : i32, i32
  }
  func.func @transform_1(%arg0: i32) -> (i32, i32) {
    %c0_i32 = arith.constant 0 : i32
    %c0_i32_0 = arith.constant 0 : i32
    %c0_i32_1 = arith.constant 0 : i32
    return %c0_i32, %c0_i32_0 : i32, i32
  }
  func.func @transform_2(%arg0: i32) -> (i32, i32) {
    %c0_i32 = arith.constant 0 : i32
    %c0_i32_0 = arith.constant 0 : i32
    %c0_i32_1 = arith.constant 0 : i32
    return %c0_i32, %c0_i32_0 : i32, i32
  }
  func.func @transform_3(%arg0: i32) -> (i32, i32) {
    %c0_i32 = arith.constant 0 : i32
    %c0_i32_0 = arith.constant 0 : i32
    return %arg0, %c0_i32 : i32, i32
  }
}

module attributes {stable_mosaic.version = 11 : i64} {
  func.func @kernel(%arg0: i32, %arg1: memref<128x128xbf16, #tpu.memory_space<vmem>>, %arg2: memref<128x128xbf16, #tpu.memory_space<vmem>>, %arg3: memref<128x128xbf16, #tpu.memory_space<vmem>>, %arg4: memref<128x128xbf16, #tpu.memory_space<vmem>>, %arg5: memref<1x128xf32, #tpu.memory_space<vmem>>, %arg6: memref<128x128xf32, #tpu.memory_space<vmem>>) attributes {dimension_semantics = [#tpu.dimension_semantics<parallel>], iteration_bounds = array<i64: 1>, scalar_prefetch = 0 : i64, scratch_operands = 0 : i64, tpu.core_type = #tpu.core_type<tc>, window_params = [{transform_indices = @transform_0, window_bounds = array<i64: 128, 128>}, {transform_indices = @transform_1, window_bounds = array<i64: 128, 128>}, {pipeline_mode = #tpu.pipeline_mode<synchronous>, transform_indices = @transform_2, window_bounds = array<i64: 128, 128>}, {pipeline_mode = #tpu.pipeline_mode<synchronous>, transform_indices = @transform_3, window_bounds = array<i64: 128, 128>}, {pipeline_mode = #tpu.pipeline_mode<synchronous>, transform_indices = @transform_4, window_bounds = array<i64: 1, 128>}, {transform_indices = @transform_5, window_bounds = array<i64: 128, 128>}]} {
    %c0 = arith.constant 0 : index
    %c0_0 = arith.constant 0 : index
    %0 = vector.load %arg1[%c0, %c0_0] : memref<128x128xbf16, #tpu.memory_space<vmem>>, vector<128x128xbf16>
    %c0_1 = arith.constant 0 : index
    %c0_2 = arith.constant 0 : index
    %1 = vector.load %arg3[%c0_1, %c0_2] : memref<128x128xbf16, #tpu.memory_space<vmem>>, vector<128x128xbf16>
    %cst = arith.constant dense<0.000000e+00> : vector<128x128xf32>
    %2 = tpu.matmul %0, %1, %cst {dimension_numbers = #tpu.dot_dimension_numbers<[1], [0], [0], [1], [0, 0, 1, 1], [], []>} : vector<128x128xbf16>, vector<128x128xbf16>, vector<128x128xf32> -> vector<128x128xf32>
    %c0_3 = arith.constant 0 : index
    %c0_4 = arith.constant 0 : index
    %3 = vector.load %arg2[%c0_3, %c0_4] : memref<128x128xbf16, #tpu.memory_space<vmem>>, vector<128x128xbf16>
    %c0_5 = arith.constant 0 : index
    %c0_6 = arith.constant 0 : index
    %4 = vector.load %arg4[%c0_5, %c0_6] : memref<128x128xbf16, #tpu.memory_space<vmem>>, vector<128x128xbf16>
    %cst_7 = arith.constant dense<0.000000e+00> : vector<128x128xf32>
    %5 = tpu.matmul %3, %4, %cst_7 {dimension_numbers = #tpu.dot_dimension_numbers<[1], [0], [0], [1], [0, 0, 1, 1], [], []>} : vector<128x128xbf16>, vector<128x128xbf16>, vector<128x128xf32> -> vector<128x128xf32>
    %6 = arith.addf %2, %5 : vector<128x128xf32>
    %c0_8 = arith.constant 0 : index
    %c0_9 = arith.constant 0 : index
    %7 = vector.load %arg5[%c0_8, %c0_9] : memref<1x128xf32, #tpu.memory_space<vmem>>, vector<1x128xf32>
    %8 = vector.broadcast %7 : vector<1x128xf32> to vector<128x128xf32>
    %9 = arith.addf %6, %8 : vector<128x128xf32>
    %cst_10 = arith.constant 0.000000e+00 : f32
    %10 = vector.broadcast %cst_10 : f32 to vector<128x128xf32>
    %11 = arith.maximumf %9, %10 : vector<128x128xf32>
    %c0_11 = arith.constant 0 : index
    %c0_12 = arith.constant 0 : index
    %12 = vector.load %arg6[%c0_11, %c0_12] : memref<128x128xf32, #tpu.memory_space<vmem>>, vector<128x128xf32>
    tpu.vector_store %arg6[%c0_11, %c0_12], %11 {strides = array<i32>} : memref<128x128xf32, #tpu.memory_space<vmem>>, vector<128x128xf32>,
    return
  }
  func.func @transform_0(%arg0: i32) -> (i32, i32) {
    %c0_i32 = arith.constant 0 : i32
    %c0_i32_0 = arith.constant 0 : i32
    return %arg0, %c0_i32 : i32, i32
  }
  func.func @transform_1(%arg0: i32) -> (i32, i32) {
    %c0_i32 = arith.constant 0 : i32
    %c0_i32_0 = arith.constant 0 : i32
    return %arg0, %c0_i32 : i32, i32
  }
  func.func @transform_2(%arg0: i32) -> (i32, i32) {
    %c0_i32 = arith.constant 0 : i32
    %c0_i32_0 = arith.constant 0 : i32
    %c0_i32_1 = arith.constant 0 : i32
    return %c0_i32, %c0_i32_0 : i32, i32
  }
  func.func @transform_3(%arg0: i32) -> (i32, i32) {
    %c0_i32 = arith.constant 0 : i32
    %c0_i32_0 = arith.constant 0 : i32
    %c0_i32_1 = arith.constant 0 : i32
    return %c0_i32, %c0_i32_0 : i32, i32
  }
  func.func @transform_4(%arg0: i32) -> (i32, i32) {
    %c0_i32 = arith.constant 0 : i32
    %c0_i32_0 = arith.constant 0 : i32
    %c0_i32_1 = arith.constant 0 : i32
    return %c0_i32, %c0_i32_0 : i32, i32
  }
  func.func @transform_5(%arg0: i32) -> (i32, i32) {
    %c0_i32 = arith.constant 0 : i32
    %c0_i32_0 = arith.constant 0 : i32
    return %arg0, %c0_i32 : i32, i32
  }
}

</mosaic_0001>

<bundles_post_ra>
// kernel: deeplabv3plus_forward.15
= control target key start
LH: loop header
LB: loop body
LE: loop exit
PB: predicated region body
PF: predicated region fallthrough
CT: control target
= control target key end

     0   :  { %8 = vsyncpa [#allocation3], 0  ;;  %s464_s0 = inlined_call_operand.vmem [shape: bf16[128,32], index: 0, kind: input, shape index: {}]   ;;  %s465_s1 = inlined_call_operand.hbm [shape: bf16[32,128], index: 1, kind: input, shape index: {}]   ;;  %s466_s2 = inlined_call_operand.hbm [shape: f32[1,128], index: 2, kind: input, shape index: {}]   ;;  %s467_s3 = inlined_call_operand.vmem [shape: f32[128,128], index: 3, kind: output, shape index: {}]  }
   0x1   :  { %s16_s14 = sshll.u32 %s465_s1, 4  ;;  %s17_s14 = int_to_ptr.hbm [resolvable:$true] %s16_s14 }
   0x2   :  { %9 = vsyncpa [#allocation5], 0  ;;  %s354_s15 = smov [#allocation2]   ;;  %s30_s19 = sshll.u32 %s466_s2, 4  ;;  %s31_s19 = int_to_ptr.hbm [resolvable:$true] %s30_s19 }
   0x3   :  { %s18_s16 = sshll.u32 %s354_s15, 4  ;;  %s355_s20 = smov 64   ;;  %s19_s16 = int_to_ptr.vmem [resolvable:$true] %s18_s16 }
   0x4   :  { %s356_s21 = smov 4   ;;  %s357_s22 = smov [#allocation4]  }
   0x5   :  { %24 = dma.hbm_to_vmem [thread:$0]  %s17_s14, 256, %s19_s16, [#allocation3], %s355_s20, %s355_s20, %s356_s21  }
   0x6   :  { %s32_s23 = sshll.u32 %s357_s22, 4  ;;  %s33_s23 = int_to_ptr.vmem [resolvable:$true] %s32_s23 }
   0x7   :  { %35 = dma.hbm_to_vmem [thread:$0]  %s31_s19, 16, %s33_s23, [#allocation5]  }
   0x8   :  { %350 = dma.done.wait [#allocation3], 256  }
   0x9   :  { %351 = vsyncadd [#allocation3], 4294967040 }
   0xa   :  { %352 = dma.done.wait [#allocation5], 16  }
   0xb   :  { %353 = vsyncadd [#allocation5], 4294967280  ;;  %v290_v0 = vld [vmem:[#allocation2 + $0x8] sm:$0xff]  ;;  %v289_v1 = vld [vmem:[#allocation2] sm:$0xff]  ;;  %vm121_vm0 = vcmask 261120  }
   0xc   :  { %152 = vmatpush.bf16.msra.mxu0 %v290_v0  ;;  %291 = vmatpush.bf16.msra.mxu1 %v290_v0  ;;  %v281_v2 = vld [vmem:[%s464_s0] sm:$0xff]  ;;  %v283_v3 = vld [vmem:[%s464_s0 + $0x10] sm:$0xff]  ;;  %v282_v6 = vld [vmem:[%s464_s0 + $0x8] sm:$0xff] }
   0xd   :  { %292 = vmatpush.bf16.msra.mxu2 %v290_v0  ;;  %293 = vmatpush.bf16.msra.mxu3 %v290_v0  ;;  %v285_v4 = vld [vmem:[%s464_s0 + $0x20] sm:$0xff]  ;;  %v287_v5 = vld [vmem:[%s464_s0 + $0x30] sm:$0xff]  ;;  %v284_v7 = vld [vmem:[%s464_s0 + $0x18] sm:$0xff] }
   0xe   :  { %v286_v8 = vld [vmem:[%s464_s0 + $0x28] sm:$0xff]  ;;  %v288_v9 = vld [vmem:[%s464_s0 + $0x38] sm:$0xff]  ;;  %v301_v10 = vld [vmem:[#allocation4] ss:$0 sm:$0xff] }
  0x10   :  { %153 = vmatpush.bf16.msra.mxu0 %v289_v1  ;;  %294 = vmatpush.bf16.msra.mxu1 %v289_v1 }
  0x11   :  { %295 = vmatpush.bf16.msra.mxu2 %v289_v1  ;;  %296 = vmatpush.bf16.msra.mxu3 %v289_v1 }
  0x13   :  { %273 = vmatmul.msk.bf16.vlgmr.msra.gmra.mxu0 %vm121_vm0, %v281_v2  ;;  %275 = vmatmul.msk.bf16.vlgmr.msra.gmra.mxu1 %vm121_vm0, %v283_v3 }
  0x14   :  { %277 = vmatmul.msk.bf16.vlgmr.msra.gmra.mxu2 %vm121_vm0, %v285_v4  ;;  %279 = vmatmul.msk.bf16.vlgmr.msra.gmra.mxu3 %vm121_vm0, %v287_v5 }
  0x23   :  { %274 = vmatmul.msk.bf16.gmra.mxu0 %vm121_vm0, %v282_v6  ;;  %276 = vmatmul.msk.bf16.gmra.mxu1 %vm121_vm0, %v284_v7 }
  0x24   :  { %278 = vmatmul.msk.bf16.gmra.mxu2 %vm121_vm0, %v286_v8  ;;  %280 = vmatmul.msk.bf16.gmra.mxu3 %vm121_vm0, %v288_v9 }
  0x90   :  { %v155_v11 = vpop.f32.mrf.mxu0  ;;  %v165_v12 = vpop.f32.mrf.mxu1 }
  0x91   :  { %v156_v13 = vadd.f32 %v301_v10, %v155_v11  ;;  %v166_v14 = vadd.f32 %v301_v10, %v165_v12 }
  0x93   :  { %v195_v15 = vmax.f32 %v156_v13, 0.0  ;;  %v199_v16 = vmax.f32 %v166_v14, 0.0 }
  0x95   :  { %211 = vst [vmem:[%s467_s3] sm:$0xff] %v195_v15 }
  0x96   :  { %215 = vst [vmem:[%s467_s3 + $0x20] sm:$0xff] %v199_v16 }
  0x97   :  { %v175_v17 = vpop.f32.mrf.mxu2  ;;  %v185_v18 = vpop.f32.mrf.mxu3 }
  0x98   :  { %v176_v19 = vadd.f32 %v301_v10, %v175_v17  ;;  %v186_v20 = vadd.f32 %v301_v10, %v185_v18  ;;  %v157_v21 = vpop.f32.mrf.mxu0  ;;  %v167_v22 = vpop.f32.mrf.mxu1 }
  0x99   :  { %v158_v23 = vadd.f32 %v301_v10, %v157_v21  ;;  %v168_v24 = vadd.f32 %v301_v10, %v167_v22 }
  0x9a   :  { %v203_v25 = vmax.f32 %v176_v19, 0.0  ;;  %v207_v26 = vmax.f32 %v186_v20, 0.0 }
  0x9b   :  { %v196_v27 = vmax.f32 %v158_v23, 0.0  ;;  %v200_v28 = vmax.f32 %v168_v24, 0.0 }
  0x9c   :  { %219 = vst [vmem:[%s467_s3 + $0x40] sm:$0xff] %v203_v25 }
  0x9d   :  { %223 = vst [vmem:[%s467_s3 + $0x60] sm:$0xff] %v207_v26 }
  0x9e   :  { %212 = vst [vmem:[%s467_s3 + $0x8] sm:$0xff] %v196_v27 }
  0x9f   :  { %216 = vst [vmem:[%s467_s3 + $0x28] sm:$0xff] %v200_v28  ;;  %v177_v29 = vpop.f32.mrf.mxu2  ;;  %v187_v30 = vpop.f32.mrf.mxu3 }
  0xa0   :  { %v178_v31 = vadd.f32 %v301_v10, %v177_v29  ;;  %v188_v32 = vadd.f32 %v301_v10, %v187_v30  ;;  %v160_v33 = vpop.f32.mrf.mxu0  ;;  %v170_v34 = vpop.f32.mrf.mxu1 }
  0xa1   :  { %v161_v35 = vadd.f32 %v301_v10, %v160_v33  ;;  %v171_v36 = vadd.f32 %v301_v10, %v170_v34 }
  0xa2   :  { %v204_v37 = vmax.f32 %v178_v31, 0.0  ;;  %v208_v38 = vmax.f32 %v188_v32, 0.0 }
  0xa3   :  { %v197_v39 = vmax.f32 %v161_v35, 0.0  ;;  %v201_v40 = vmax.f32 %v171_v36, 0.0 }
  0xa4   :  { %220 = vst [vmem:[%s467_s3 + $0x48] sm:$0xff] %v204_v37 }
  0xa5   :  { %224 = vst [vmem:[%s467_s3 + $0x68] sm:$0xff] %v208_v38 }
  0xa6   :  { %213 = vst [vmem:[%s467_s3 + $0x10] sm:$0xff] %v197_v39 }
  0xa7   :  { %217 = vst [vmem:[%s467_s3 + $0x30] sm:$0xff] %v201_v40  ;;  %v180_v41 = vpop.f32.mrf.mxu2  ;;  %v190_v42 = vpop.f32.mrf.mxu3 }
  0xa8   :  { %v181_v43 = vadd.f32 %v301_v10, %v180_v41  ;;  %v191_v44 = vadd.f32 %v301_v10, %v190_v42  ;;  %v162_v45 = vpop.f32.mrf.mxu0  ;;  %v172_v46 = vpop.f32.mrf.mxu1 }
  0xa9   :  { %v163_v47 = vadd.f32 %v301_v10, %v162_v45  ;;  %v173_v48 = vadd.f32 %v301_v10, %v172_v46 }
  0xaa   :  { %v205_v49 = vmax.f32 %v181_v43, 0.0  ;;  %v209_v50 = vmax.f32 %v191_v44, 0.0 }
  0xab   :  { %v198_v51 = vmax.f32 %v163_v47, 0.0  ;;  %v202_v52 = vmax.f32 %v173_v48, 0.0 }
  0xac   :  { %221 = vst [vmem:[%s467_s3 + $0x50] sm:$0xff] %v205_v49 }
  0xad   :  { %225 = vst [vmem:[%s467_s3 + $0x70] sm:$0xff] %v209_v50 }
  0xae   :  { %214 = vst [vmem:[%s467_s3 + $0x18] sm:$0xff] %v198_v51 }
  0xaf   :  { %218 = vst [vmem:[%s467_s3 + $0x38] sm:$0xff] %v202_v52  ;;  %v182_v53 = vpop.f32.mrf.mxu2  ;;  %v192_v54 = vpop.f32.mrf.mxu3 }
  0xb0   :  { %v183_v55 = vadd.f32 %v301_v10, %v182_v53  ;;  %v193_v56 = vadd.f32 %v301_v10, %v192_v54 }
  0xb2   :  { %v206_v57 = vmax.f32 %v183_v55, 0.0  ;;  %v210_v58 = vmax.f32 %v193_v56, 0.0 }
  0xb4   :  { %222 = vst [vmem:[%s467_s3 + $0x58] sm:$0xff] %v206_v57 }
  0xb5   :  { %226 = vst [vmem:[%s467_s3 + $0x78] sm:$0xff] %v210_v58 }
  0xb6   :  { %231 = vsyncpa [#allocation3], 1 }
  0xb7   :  { %232 = vsyncpa [#allocation5], 1 }

// kernel: deeplabv3plus_forward.9
= control target key start
LH: loop header
LB: loop body
LE: loop exit
PB: predicated region body
PF: predicated region fallthrough
CT: control target
= control target key end

     0   :  { %8 = vsyncpa [#allocation3], 0  ;;  %s503_s0 = inlined_call_operand.vmem [shape: bf16[128,32], index: 0, kind: input, shape index: {}]   ;;  %s504_s1 = inlined_call_operand.hbm [shape: bf16[32,128], index: 1, kind: input, shape index: {}]   ;;  %s505_s2 = inlined_call_operand.hbm [shape: f32[1,128], index: 2, kind: input, shape index: {}]   ;;  %s506_s3 = inlined_call_operand.vmem [shape: bf16[128,128], index: 3, kind: output, shape index: {}]  }
   0x1   :  { %s16_s14 = sshll.u32 %s504_s1, 4  ;;  %s17_s14 = int_to_ptr.hbm [resolvable:$true] %s16_s14 }
   0x2   :  { %9 = vsyncpa [#allocation5], 0  ;;  %s417_s15 = smov [#allocation2]   ;;  %s30_s19 = sshll.u32 %s505_s2, 4  ;;  %s31_s19 = int_to_ptr.hbm [resolvable:$true] %s30_s19 }
   0x3   :  { %s18_s16 = sshll.u32 %s417_s15, 4  ;;  %s418_s20 = smov 64   ;;  %s19_s16 = int_to_ptr.vmem [resolvable:$true] %s18_s16 }
   0x4   :  { %s419_s21 = smov 4   ;;  %s420_s22 = smov [#allocation4]  }
   0x5   :  { %24 = dma.hbm_to_vmem [thread:$0]  %s17_s14, 256, %s19_s16, [#allocation3], %s418_s20, %s418_s20, %s419_s21  }
   0x6   :  { %s32_s23 = sshll.u32 %s420_s22, 4  ;;  %s33_s23 = int_to_ptr.vmem [resolvable:$true] %s32_s23 }
   0x7   :  { %35 = dma.hbm_to_vmem [thread:$0]  %s31_s19, 16, %s33_s23, [#allocation5]  }
   0x8   :  { %413 = dma.done.wait [#allocation3], 256  }
   0x9   :  { %414 = vsyncadd [#allocation3], 4294967040 }
   0xa   :  { %415 = dma.done.wait [#allocation5], 16  }
   0xb   :  { %416 = vsyncadd [#allocation5], 4294967280  ;;  %v306_v0 = vld [vmem:[#allocation2 + $0x8] sm:$0xff]  ;;  %v305_v1 = vld [vmem:[#allocation2] sm:$0xff]  ;;  %vm121_vm0 = vcmask 261120  }
   0xc   :  { %152 = vmatpush.bf16.msra.mxu0 %v306_v0  ;;  %354 = vmatpush.bf16.msra.mxu1 %v306_v0  ;;  %v297_v2 = vld [vmem:[%s503_s0] sm:$0xff]  ;;  %v299_v3 = vld [vmem:[%s503_s0 + $0x10] sm:$0xff]  ;;  %v298_v6 = vld [vmem:[%s503_s0 + $0x8] sm:$0xff] }
   0xd   :  { %355 = vmatpush.bf16.msra.mxu2 %v306_v0  ;;  %356 = vmatpush.bf16.msra.mxu3 %v306_v0  ;;  %v301_v4 = vld [vmem:[%s503_s0 + $0x20] sm:$0xff]  ;;  %v303_v5 = vld [vmem:[%s503_s0 + $0x30] sm:$0xff]  ;;  %v300_v7 = vld [vmem:[%s503_s0 + $0x18] sm:$0xff] }
   0xe   :  { %v302_v8 = vld [vmem:[%s503_s0 + $0x28] sm:$0xff]  ;;  %v304_v9 = vld [vmem:[%s503_s0 + $0x38] sm:$0xff]  ;;  %v364_v12 = vld [vmem:[#allocation4] ss:$0 sm:$0xff] }
  0x10   :  { %153 = vmatpush.bf16.msra.mxu0 %v305_v1  ;;  %357 = vmatpush.bf16.msra.mxu1 %v305_v1 }
  0x11   :  { %358 = vmatpush.bf16.msra.mxu2 %v305_v1  ;;  %359 = vmatpush.bf16.msra.mxu3 %v305_v1 }
  0x13   :  { %289 = vmatmul.msk.bf16.vlgmr.msra.gmra.mxu0 %vm121_vm0, %v297_v2  ;;  %291 = vmatmul.msk.bf16.vlgmr.msra.gmra.mxu1 %vm121_vm0, %v299_v3 }
  0x14   :  { %293 = vmatmul.msk.bf16.vlgmr.msra.gmra.mxu2 %vm121_vm0, %v301_v4  ;;  %295 = vmatmul.msk.bf16.vlgmr.msra.gmra.mxu3 %vm121_vm0, %v303_v5 }
  0x23   :  { %290 = vmatmul.msk.bf16.gmra.mxu0 %vm121_vm0, %v298_v6  ;;  %292 = vmatmul.msk.bf16.gmra.mxu1 %vm121_vm0, %v300_v7 }
  0x24   :  { %294 = vmatmul.msk.bf16.gmra.mxu2 %vm121_vm0, %v302_v8  ;;  %296 = vmatmul.msk.bf16.gmra.mxu3 %vm121_vm0, %v304_v9 }
  0x90   :  { %v155_v10 = vpop.f32.mrf.mxu0  ;;  %v165_v11 = vpop.f32.mrf.mxu1 }
  0x91   :  { %v156_v13 = vadd.f32 %v364_v12, %v155_v10  ;;  %v166_v14 = vadd.f32 %v364_v12, %v165_v11 }
  0x93   :  { %v195_v21 = vmax.f32 %v156_v13, 0.0  ;;  %v199_v22 = vmax.f32 %v166_v14, 0.0 }
  0x97   :  { %v175_v15 = vpop.f32.mrf.mxu2  ;;  %v185_v16 = vpop.f32.mrf.mxu3 }
  0x98   :  { %v157_v17 = vpop.f32.mrf.mxu0  ;;  %v167_v18 = vpop.f32.mrf.mxu1  ;;  %v176_v27 = vadd.f32 %v364_v12, %v175_v15  ;;  %v186_v28 = vadd.f32 %v364_v12, %v185_v16 }
  0x99   :  { %v158_v19 = vadd.f32 %v364_v12, %v157_v17  ;;  %v168_v20 = vadd.f32 %v364_v12, %v167_v18 }
  0x9a   :  { %v203_v35 = vmax.f32 %v176_v27, 0.0  ;;  %v207_v36 = vmax.f32 %v186_v28, 0.0 }
  0x9b   :  { %v196_v23 = vmax.f32 %v158_v19, 0.0  ;;  %v200_v24 = vmax.f32 %v168_v20, 0.0 }
  0x9d   :  { %v310_v25 = vpack.c.bf16 %v196_v23, %v195_v21  ;;  %v320_v26 = vpack.c.bf16 %v200_v24, %v199_v22 }
  0x9f   :  { %311 = vst [vmem:[%s506_s3] sm:$0xff] %v310_v25   ;;  %v177_v29 = vpop.f32.mrf.mxu2  ;;  %v187_v30 = vpop.f32.mrf.mxu3 }
  0xa0   :  { %348 = vst [vmem:[%s506_s3 + $0x10] sm:$0xff] %v320_v26   ;;  %v178_v31 = vadd.f32 %v364_v12, %v177_v29  ;;  %v188_v32 = vadd.f32 %v364_v12, %v187_v30  ;;  %v160_v33 = vpop.f32.mrf.mxu0  ;;  %v170_v34 = vpop.f32.mrf.mxu1 }
  0xa1   :  { %v161_v41 = vadd.f32 %v364_v12, %v160_v33  ;;  %v171_v42 = vadd.f32 %v364_v12, %v170_v34 }
  0xa2   :  { %v204_v37 = vmax.f32 %v178_v31, 0.0  ;;  %v208_v38 = vmax.f32 %v188_v32, 0.0 }
  0xa3   :  { %v197_v49 = vmax.f32 %v161_v41, 0.0  ;;  %v201_v50 = vmax.f32 %v171_v42, 0.0 }
  0xa4   :  { %v330_v39 = vpack.c.bf16 %v204_v37, %v203_v35  ;;  %v340_v40 = vpack.c.bf16 %v208_v38, %v207_v36 }
  0xa6   :  { %350 = vst [vmem:[%s506_s3 + $0x20] sm:$0xff] %v330_v39  }
  0xa7   :  { %352 = vst [vmem:[%s506_s3 + $0x30] sm:$0xff] %v340_v40   ;;  %v180_v43 = vpop.f32.mrf.mxu2  ;;  %v190_v44 = vpop.f32.mrf.mxu3 }
  0xa8   :  { %v162_v45 = vpop.f32.mrf.mxu0  ;;  %v172_v46 = vpop.f32.mrf.mxu1  ;;  %v181_v55 = vadd.f32 %v364_v12, %v180_v43  ;;  %v191_v56 = vadd.f32 %v364_v12, %v190_v44 }
  0xa9   :  { %v163_v47 = vadd.f32 %v364_v12, %v162_v45  ;;  %v173_v48 = vadd.f32 %v364_v12, %v172_v46 }
  0xaa   :  { %v205_v61 = vmax.f32 %v181_v55, 0.0  ;;  %v209_v62 = vmax.f32 %v191_v56, 0.0 }
  0xab   :  { %v198_v51 = vmax.f32 %v163_v47, 0.0  ;;  %v202_v52 = vmax.f32 %v173_v48, 0.0 }
  0xad   :  { %v315_v53 = vpack.c.bf16 %v198_v51, %v197_v49  ;;  %v325_v54 = vpack.c.bf16 %v202_v52, %v201_v50 }
  0xaf   :  { %347 = vst [vmem:[%s506_s3 + $0x8] sm:$0xff] %v315_v53   ;;  %v182_v57 = vpop.f32.mrf.mxu2  ;;  %v192_v58 = vpop.f32.mrf.mxu3 }
  0xb0   :  { %349 = vst [vmem:[%s506_s3 + $0x18] sm:$0xff] %v325_v54   ;;  %v183_v59 = vadd.f32 %v364_v12, %v182_v57  ;;  %v193_v60 = vadd.f32 %v364_v12, %v192_v58 }
  0xb2   :  { %v206_v63 = vmax.f32 %v183_v59, 0.0  ;;  %v210_v0 = vmax.f32 %v193_v60, 0.0 }
  0xb4   :  { %v335_v1 = vpack.c.bf16 %v206_v63, %v205_v61  ;;  %v345_v2 = vpack.c.bf16 %v210_v0, %v209_v62 }
  0xb6   :  { %351 = vst [vmem:[%s506_s3 + $0x28] sm:$0xff] %v335_v1  }
  0xb7   :  { %353 = vst [vmem:[%s506_s3 + $0x38] sm:$0xff] %v345_v2  }
  0xb8   :  { %247 = vsyncpa [#allocation3], 1 }
  0xb9   :  { %248 = vsyncpa [#allocation5], 1 }

// kernel: deeplabv3plus_forward.16
= control target key start
LH: loop header
LB: loop body
LE: loop exit
PB: predicated region body
PF: predicated region fallthrough
CT: control target
= control target key end

     0   :  { %8 = vsyncpa [#allocation3], 0  ;;  %s2145_s0 = inlined_call_operand.vmem [shape: f32[2,10,10,128], index: 0, kind: input, shape index: {}]   ;;  %s2146_s1 = inlined_call_operand.hbm [shape: bf16[9,128,128], index: 1, kind: input, shape index: {}]   ;;  %s2147_s2 = inlined_call_operand.hbm [shape: f32[1,128], index: 2, kind: input, shape index: {}]   ;;  %s2148_s3 = inlined_call_operand.vmem [shape: bf16[2,64,128], index: 3, kind: output, shape index: {}]  }
   0x1   :  { %9 = vsyncpa [#allocation5], 0  ;;  %s1922_s12 = smov 0  }
   0x2 LB: > { %s125_s15 = sshll.u32 %s2146_s1, 4  ;;  %s1931_s16 = sadd.s32 4294967295, %s1896_s12   ;;  %s1896_s12 = sphi %s1922_s12, %s15_s12   ;;  %s126_s15 = int_to_ptr.hbm [resolvable:$true] %s125_s15 }
   0x3   : > { %p1329_p0 = scmp.ge.s32.totalorder %s1896_s12, 1  ;;  %p114_p1 = scmp.lt.s32.totalorder %s1896_s12, 3 }
   0x4   : > { %p1805_p2 = scmp.eq.s32.totalorder %s1931_s16, 0  ;;  %s1898_s18 = smov [#allocation2]  }
   0x5   : > { %p1936_p3 = pnand %p1329_p0, %p114_p1  ;;  %s127_s19 = sshll.u32 %s1898_s18, 4  ;;  %s128_s19 = int_to_ptr.vmem [resolvable:$true] %s127_s19 }
   0x6   : > { %s140_s22 = sshll.u32 %s2147_s2, 4  ;;  %s1899_s23 = smov [#allocation4]   ;;  %s141_s22 = int_to_ptr.hbm [resolvable:$true] %s140_s22 }
   0x7   : > { %p1798_p4 = pneg %p1936_p3  ;;  %s142_s24 = sshll.u32 %s1899_s23, 4  ;;  %s143_s24 = int_to_ptr.vmem [resolvable:$true] %s142_s24 }
   0x8   : > { %s1900_s25 = smov 64   ;;  %s1901_s26 = smov 4  }
   0x9   : > { %p1799_p5 = pnand %p1805_p2, %p1798_p4  ;;  %163 = sbr.rel (%p1936_p3) target bundleno = 342 (0x156), region = 32 }
   0xb   : > { %1801 = dma.hbm_to_vmem [thread:$0]  (!%p1799_p5), %s126_s15, 9216, %s128_s19, [#allocation3], %s1900_s25, %s1900_s25, %s1901_s26  }
   0xc   : > { %1804 = dma.hbm_to_vmem [thread:$0]  (!%p1799_p5), %s141_s22, 16, %s143_s24, [#allocation5]  }
   0xe   : > { %1887 = dma.done.wait (%p1805_p2), [#allocation3], 9216  }
   0xf   : > { %1889 = vsyncadd (%p1805_p2), [#allocation3], 4294958080 }
  0x10   : > { %1891 = dma.done.wait (%p1805_p2), [#allocation5], 16  }
  0x11   : > { %1893 = vsyncadd (%p1805_p2), [#allocation5], 4294967280  ;;  %v1693_v0 = vld [vmem:[#allocation2 + $0x78] sm:$0xff]  ;;  %v1692_v2 = vld [vmem:[#allocation2 + $0x70] sm:$0xff]  ;;  %p193_p6 = scmp.lt.s32.totalorder %s1931_s16, 1 }
  0x12   : > { %v1701_v1 = vld [vmem:[#allocation2 + $0xb8] sm:$0xff]  ;;  %1773 = vmatpush.bf16.msra.mxu1 %v1693_v0  ;;  %308 = vmatpush.bf16.msra.mxu0 %v1693_v0  ;;  %v1700_v3 = vld [vmem:[#allocation2 + $0xb0] sm:$0xff]  ;;  %v1691_v6 = vld [vmem:[#allocation2 + $0x68] sm:$0xff] }
  0x13   : > { %491 = vmatpush.bf16.msra.mxu2 %v1701_v1  ;;  %v1709_v4 = vld [vmem:[#allocation2 + $0xf8] sm:$0xff]  ;;  %v1708_v5 = vld [vmem:[#allocation2 + $0xf0] sm:$0xff]  ;;  %v1699_v7 = vld [vmem:[#allocation2 + $0xa8] sm:$0xff]  ;;  %s2151_s16 = smov (!%p193_p6, %s1931_s16), 1 }
  0x14   : > { %606 = vmatpush.bf16.msra.mxu3 %v1709_v4  ;;  %v1707_v8 = vld [vmem:[#allocation2 + $0xe8] sm:$0xff]  ;;  %v1690_v9 = vld [vmem:[#allocation2 + $0x60] sm:$0xff]  ;;  %v1689_v12 = vld [vmem:[#allocation2 + $0x58] sm:$0xff]  ;;  %s1789_s27 = smul.u32 160, %s2151_s16  ;;  %s1677_s4 = sshll.u32 %s2151_s16, 5 }
  0x15   : > { %v1698_v10 = vld [vmem:[#allocation2 + $0xa0] sm:$0xff]  ;;  %v1697_v13 = vld [vmem:[#allocation2 + $0x98] sm:$0xff]  ;;  %v1688_v15 = vld [vmem:[#allocation2 + $0x50] sm:$0xff]  ;;  %s2121_s7 = scalar_lea.vmem %s2148_s3, %s1677_s4 }
  0x16   : > { %1774 = vmatpush.bf16.msra.mxu1 %v1692_v2  ;;  %309 = vmatpush.bf16.msra.mxu0 %v1692_v2  ;;  %v1706_v11 = vld [vmem:[#allocation2 + $0xe0] sm:$0xff]  ;;  %v1705_v14 = vld [vmem:[#allocation2 + $0xd8] sm:$0xff]  ;;  %v1696_v16 = vld [vmem:[#allocation2 + $0x90] sm:$0xff]  ;;  %s1965_s30 = scalar_lea.vmem %s2145_s0, %s1789_s27 }
  0x17   : > { %492 = vmatpush.bf16.msra.mxu2 %v1700_v3  ;;  %v1704_v17 = vld [vmem:[#allocation2 + $0xd0] sm:$0xff]  ;;  %v1687_v18 = vld [vmem:[#allocation2 + $0x48] sm:$0xff]  ;;  %v1686_v20 = vld [vmem:[#allocation2 + $0x40] sm:$0xff] }
  0x18   : > { %607 = vmatpush.bf16.msra.mxu3 %v1708_v5  ;;  %v1695_v19 = vld [vmem:[#allocation2 + $0x88] sm:$0xff]  ;;  %v1971_v22 = vld [vmem:[%s1965_s30 + $0x51] sm:$0xff]  ;;  %v1694_v27 = vld [vmem:[#allocation2 + $0x80] sm:$0xff] }
  0x19   : > { %v1968_v21 = vld [vmem:[%s1965_s30 + $0x41] sm:$0xff]  ;;  %v1685_v24 = vld [vmem:[#allocation2 + $0x38] sm:$0xff]  ;;  %v1988_v36 = vld [vmem:[%s1965_s30 + $0x10] sm:$0xff] }
  0x1a   : > { %1775 = vmatpush.bf16.msra.mxu1 %v1691_v6  ;;  %310 = vmatpush.bf16.msra.mxu0 %v1691_v6  ;;  %v1703_v23 = vld [vmem:[#allocation2 + $0xc8] sm:$0xff]  ;;  %v1975_v26 = vld [vmem:[%s1965_s30 + $0x11] sm:$0xff]  ;;  %v1983_v32 = vpack.c.bf16 %v1971_v22, %v1968_v21  ;;  %v1702_v35 = vld [vmem:[#allocation2 + $0xc0] sm:$0xff] }
  0x1b   : > { %493 = vmatpush.bf16.msra.mxu2 %v1699_v7  ;;  %v231_v25 = vld [vmem:[%s1965_s30 + $0x1] sm:$0xff]  ;;  %v1979_v29 = vld [vmem:[%s1965_s30 + $0x12] sm:$0xff] }
  0x1c   : > { %608 = vmatpush.bf16.msra.mxu3 %v1707_v8  ;;  %v414_v28 = vld [vmem:[%s1965_s30 + $0x2] sm:$0xff]  ;;  %v1717_v30 = vld [vmem:[#allocation2 + $0x138] sm:$0xff]  ;;  %v239_v33 = vpack.c.bf16 %v1975_v26, %v231_v25  ;;  %v1684_v38 = vld [vmem:[#allocation2 + $0x30] sm:$0xff] }
  0x1d   : > { %v1733_v31 = vld [vmem:[#allocation2 + $0x1b8] sm:$0xff]  ;;  %v422_v34 = vpack.c.bf16 %v1979_v29, %v414_v28  ;;  %v1991_v37 = vld [vmem:[%s1965_s30 + $0x20] sm:$0xff]  ;;  %v1716_v40 = vld [vmem:[#allocation2 + $0x130] sm:$0xff] }
  0x1e   : > { %1776 = vmatpush.bf16.msra.mxu1 %v1690_v9  ;;  %311 = vmatpush.bf16.msra.mxu0 %v1690_v9  ;;  %v1741_v39 = vld [vmem:[#allocation2 + $0x1f8] sm:$0xff]  ;;  %v1732_v41 = vld [vmem:[#allocation2 + $0x1b0] sm:$0xff]  ;;  %v537_v42 = vpack.c.bf16 %v1991_v37, %v1988_v36  ;;  %v1683_v43 = vld [vmem:[#allocation2 + $0x28] sm:$0xff] }
  0x1f   : > { %494 = vmatpush.bf16.msra.mxu2 %v1698_v10  ;;  %v1740_v44 = vld [vmem:[#allocation2 + $0x1f0] sm:$0xff]  ;;  %v1715_v45 = vld [vmem:[#allocation2 + $0x128] sm:$0xff]  ;;  %v1682_v47 = vld [vmem:[#allocation2 + $0x20] sm:$0xff] }
  0x20   : > { %609 = vmatpush.bf16.msra.mxu3 %v1706_v11  ;;  %v1731_v46 = vld [vmem:[#allocation2 + $0x1a8] sm:$0xff]  ;;  %v1714_v49 = vld [vmem:[#allocation2 + $0x120] sm:$0xff]  ;;  %v2000_v52 = vld [vmem:[%s1965_s30 + $0x71] sm:$0xff] }
  0x21   : > { %v1739_v48 = vld [vmem:[#allocation2 + $0x1e8] sm:$0xff]  ;;  %v1730_v50 = vld [vmem:[#allocation2 + $0x1a0] sm:$0xff]  ;;  %v2004_v54 = vld [vmem:[%s1965_s30 + $0x31] sm:$0xff] }
  0x22   : > { %1777 = vmatpush.bf16.msra.mxu1 %v1689_v12  ;;  %312 = vmatpush.bf16.msra.mxu0 %v1689_v12  ;;  %v1997_v51 = vld [vmem:[%s1965_s30 + $0x61] sm:$0xff]  ;;  %v1681_v55 = vld [vmem:[#allocation2 + $0x18] sm:$0xff]  ;;  %v2024_v62 = vld [vmem:[%s1965_s30 + $0x30] sm:$0xff] }
  0x23   : > { %495 = vmatpush.bf16.msra.mxu2 %v1697_v13  ;;  %v233_v53 = vld [vmem:[%s1965_s30 + $0x21] sm:$0xff]  ;;  %v2010_v57 = vld [vmem:[%s1965_s30 + $0x32] sm:$0xff]  ;;  %v2014_v59 = vpack.c.bf16 %v2000_v52, %v1997_v51 }
  0x24   : > { %610 = vmatpush.bf16.msra.mxu3 %v1705_v14  ;;  %v2007_v56 = vld [vmem:[%s1965_s30 + $0x22] sm:$0xff]  ;;  %v1713_v58 = vld [vmem:[#allocation2 + $0x118] sm:$0xff]  ;;  %v2017_v60 = vpack.c.bf16 %v2004_v54, %v233_v53  ;;  %v1680_v0 = vld [vmem:[#allocation2 + $0x10] sm:$0xff] }
  0x25   : > { %v2021_v61 = vpack.c.bf16 %v2010_v57, %v2007_v56  ;;  %v2027_v63 = vld [vmem:[%s1965_s30 + $0x40] sm:$0xff]  ;;  %v1712_v1 = vld [vmem:[#allocation2 + $0x110] sm:$0xff]  ;;  %v1729_v3 = vld [vmem:[#allocation2 + $0x198] sm:$0xff] }
  0x26   : > { %1778 = vmatpush.bf16.msra.mxu1 %v1688_v15  ;;  %313 = vmatpush.bf16.msra.mxu0 %v1688_v15  ;;  %v538_v2 = vpack.c.bf16 %v2027_v63, %v2024_v62  ;;  %v1738_v4 = vld [vmem:[#allocation2 + $0x1e0] sm:$0xff]  ;;  %v1679_v5 = vld [vmem:[#allocation2 + $0x8] sm:$0xff]  ;;  %v1728_v7 = vld [vmem:[#allocation2 + $0x190] sm:$0xff] }
  0x27   : > { %496 = vmatpush.bf16.msra.mxu2 %v1696_v16  ;;  %v1711_v6 = vld [vmem:[#allocation2 + $0x108] sm:$0xff]  ;;  %v1737_v8 = vld [vmem:[#allocation2 + $0x1d8] sm:$0xff]  ;;  %v1678_v9 = vld [vmem:[#allocation2] sm:$0xff] }
  0x28   : > { %611 = vmatpush.bf16.msra.mxu3 %v1704_v17  ;;  %v1725_v10 = vld [vmem:[#allocation2 + $0x178] sm:$0xff]  ;;  %v1710_v11 = vld [vmem:[#allocation2 + $0x100] sm:$0xff]  ;;  %v1724_v16 = vld [vmem:[#allocation2 + $0x170] sm:$0xff] }
  0x29   : > { %v1749_v12 = vld [vmem:[#allocation2 + $0x238] sm:$0xff]  ;;  %v203_v13 = vld [vmem:[%s1965_s30] sm:$0xff]  ;;  %v1723_v25 = vld [vmem:[#allocation2 + $0x168] sm:$0xff] }
  0x2a   : > { %1779 = vmatpush.bf16.msra.mxu1 %v1687_v18  ;;  %314 = vmatpush.bf16.msra.mxu0 %v1687_v18  ;;  %v2036_v14 = vld [vmem:[%s1965_s30 + $0x42] sm:$0xff]  ;;  %v2039_v15 = vld [vmem:[%s1965_s30 + $0x52] sm:$0xff]  ;;  %v211_v17 = vpack.c.bf16 %v1988_v36, %v203_v13  ;;  %v651_v18 = vpack.c.bf16 %v233_v53, %v1975_v26 }
  0x2b   : > { %497 = vmatpush.bf16.msra.mxu2 %v1695_v19  ;;  %v2045_v19 = vpack.c.bf16 %v2039_v15, %v2036_v14  ;;  %v1736_v26 = vld [vmem:[#allocation2 + $0x1d0] sm:$0xff]  ;;  %v1721_v36 = vld [vmem:[#allocation2 + $0x158] sm:$0xff] }
  0x2c   : > { %612 = vmatpush.bf16.msra.mxu3 %v1703_v23  ;;  %v2049_v23 = vld [vmem:[%s1965_s30 + $0x60] sm:$0xff] }
  0x2e   : > { %1780 = vmatpush.bf16.msra.mxu1 %v1686_v20  ;;  %315 = vmatpush.bf16.msra.mxu0 %v1686_v20  ;;  %v1439_v20 = vld [vmem:[%s1965_s30 + $0x50] sm:$0xff] }
  0x2f   : > { %498 = vmatpush.bf16.msra.mxu2 %v1694_v27  ;;  %v1727_v27 = vld [vmem:[#allocation2 + $0x188] sm:$0xff]  ;;  %v539_v28 = vpack.c.bf16 %v2049_v23, %v1439_v20  ;;  %v213_v53 = vpack.c.bf16 %v1439_v20, %v2027_v63 }
  0x30   : > { %613 = vmatpush.bf16.msra.mxu3 %v1702_v35  ;;  %v1746_v35 = vld [vmem:[#allocation2 + $0x220] sm:$0xff] }
  0x31   : > { %326 = vmatmul.bf16.vlgmr.msra.gmra.mxu1 %v1983_v32  ;;  %316 = vmatmul.bf16.vlgmr.msra.gmra.mxu0 %v239_v33  ;;  %v1722_v33 = vld [vmem:[#allocation2 + $0x160] sm:$0xff] }
  0x32   : > { %385 = vmatpush.bf16.msrb.mxu1 %v1685_v24  ;;  %720 = vmatpush.bf16.msrb.mxu0 %v1717_v30  ;;  %v1748_v24 = vld [vmem:[#allocation2 + $0x230] sm:$0xff]  ;;  %v1747_v30 = vld [vmem:[#allocation2 + $0x228] sm:$0xff] }
  0x33   : > { %949 = vmatpush.bf16.msrb.mxu2 %v1733_v31  ;;  %614 = vmatmul.bf16.vlgmr.msra.gmra.mxu3 %v537_v42  ;;  %v1726_v31 = vld [vmem:[#allocation2 + $0x180] sm:$0xff]  ;;  %v652_v42 = vpack.c.bf16 %v1968_v21, %v2004_v54  ;;  %v1744_v21 = vld [vmem:[#allocation2 + $0x210] sm:$0xff]  ;;  %v653_v54 = vpack.c.bf16 %v1997_v51, %v1971_v22  ;;  %v765_v22 = vpack.c.bf16 %v2007_v56, %v1979_v29 }
  0x34   : > { %499 = vmatmul.bf16.vlgmr.msra.gmra.mxu2 %v422_v34  ;;  %1063 = vmatpush.bf16.msrb.mxu3 %v1741_v39  ;;  %v1735_v34 = vld [vmem:[#allocation2 + $0x1c8] sm:$0xff]  ;;  %v2057_v39 = vld [vmem:[%s1965_s30 + $0x72] sm:$0xff] }
  0x35   : > { %v1562_v51 = vld [vmem:[%s1965_s30 + $0x90] sm:$0xff] }
  0x36   : > { %386 = vmatpush.bf16.msrb.mxu1 %v1684_v38  ;;  %721 = vmatpush.bf16.msrb.mxu0 %v1716_v40  ;;  %v2054_v38 = vld [vmem:[%s1965_s30 + $0x62] sm:$0xff]  ;;  %v1720_v40 = vld [vmem:[#allocation2 + $0x150] sm:$0xff] }
  0x37   : > { %950 = vmatpush.bf16.msrb.mxu2 %v1732_v41  ;;  %v212_v41 = vpack.c.bf16 %v2024_v62, %v1991_v37  ;;  %v1718_v37 = vld [vmem:[#allocation2 + $0x140] sm:$0xff]  ;;  %v1642_v29 = vld [vmem:[%s1965_s30 + $0x92] sm:$0xff]  ;;  %v767_v56 = vpack.c.bf16 %v2054_v38, %v2039_v15 }
  0x38   : > { %1064 = vmatpush.bf16.msrb.mxu3 %v1740_v44  ;;  %v1441_v44 = vld [vmem:[%s1965_s30 + $0x70] sm:$0xff] }
  0x39   : > { %v214_v62 = vpack.c.bf16 %v1441_v44, %v2049_v23 }
  0x3a   : > { %387 = vmatpush.bf16.msrb.mxu1 %v1683_v43  ;;  %722 = vmatpush.bf16.msrb.mxu0 %v1715_v45  ;;  %v425_v43 = vpack.c.bf16 %v2057_v39, %v2054_v38  ;;  %v1442_v45 = vld [vmem:[%s1965_s30 + $0x80] sm:$0xff] }
  0x3b   : > { %951 = vmatpush.bf16.msrb.mxu2 %v1731_v46  ;;  %v540_v46 = vpack.c.bf16 %v1442_v45, %v1441_v44 }
  0x3c   : > { %1065 = vmatpush.bf16.msrb.mxu3 %v1739_v48  ;;  %v1734_v48 = vld [vmem:[#allocation2 + $0x1c0] sm:$0xff] }
  0x3e   : > { %388 = vmatpush.bf16.msrb.mxu1 %v1682_v47  ;;  %723 = vmatpush.bf16.msrb.mxu0 %v1714_v49  ;;  %v1719_v47 = vld [vmem:[#allocation2 + $0x148] sm:$0xff]  ;;  %v1745_v49 = vld [vmem:[#allocation2 + $0x218] sm:$0xff] }
  0x3f   : > { %952 = vmatpush.bf16.msrb.mxu2 %v1730_v50  ;;  %v1743_v50 = vld [vmem:[#allocation2 + $0x208] sm:$0xff] }
  0x40   : > { %1066 = vmatpush.bf16.msrb.mxu3 %v1738_v4 }
  0x41   : > { %331 = vmatmul.bf16.gmra.mxu1 %v2014_v59  ;;  %321 = vmatmul.bf16.gmra.mxu0 %v2017_v60 }
  0x42   : > { %389 = vmatpush.bf16.msrb.mxu1 %v1681_v55  ;;  %724 = vmatpush.bf16.msrb.mxu0 %v1713_v58  ;;  %v1742_v55 = vld [vmem:[#allocation2 + $0x200] sm:$0xff] }
  0x43   : > { %953 = vmatpush.bf16.msrb.mxu2 %v1729_v3  ;;  %619 = vmatmul.bf16.gmra.mxu3 %v538_v2  ;;  %v1482_v58 = vld [vmem:[%s1965_s30 + $0x81] sm:$0xff] }
  0x44   : > { %504 = vmatmul.bf16.gmra.mxu2 %v2021_v61  ;;  %1067 = vmatpush.bf16.msrb.mxu3 %v1737_v8  ;;  %v654_v63 = vpack.c.bf16 %v1482_v58, %v2000_v52  ;;  %v766_v52 = vpack.c.bf16 %v2036_v14, %v2010_v57 }
  0x46   : > { %390 = vmatpush.bf16.msrb.mxu1 %v1680_v0  ;;  %725 = vmatpush.bf16.msrb.mxu0 %v1712_v1  ;;  %v1602_v0 = vld [vmem:[%s1965_s30 + $0x91] sm:$0xff]  ;;  %v1641_v1 = vld [vmem:[%s1965_s30 + $0x82] sm:$0xff] }
  0x47   : > { %954 = vmatpush.bf16.msrb.mxu2 %v1728_v7 }
  0x48   : > { %1068 = vmatpush.bf16.msrb.mxu3 %v1736_v26 }
  0x4a   : > { %391 = vmatpush.bf16.msrb.mxu1 %v1679_v5  ;;  %726 = vmatpush.bf16.msrb.mxu0 %v1711_v6  ;;  %v768_v6 = vpack.c.bf16 %v1641_v1, %v2057_v39 }
  0x4b   : > { %955 = vmatpush.bf16.msrb.mxu2 %v1727_v27 }
  0x4c   : > { %1069 = vmatpush.bf16.msrb.mxu3 %v1735_v34 }
  0x4e   : > { %392 = vmatpush.bf16.msrb.mxu1 %v1678_v9  ;;  %727 = vmatpush.bf16.msrb.mxu0 %v1710_v11 }
  0x4f   : > { %956 = vmatpush.bf16.msrb.mxu2 %v1726_v31 }
  0x50   : > { %1070 = vmatpush.bf16.msrb.mxu3 %v1734_v48 }
  0x51   : > { %393 = vmatmul.bf16.vlgmr.msrb.gmra.mxu1 %v211_v17  ;;  %728 = vmatmul.bf16.vlgmr.msrb.gmra.mxu0 %v651_v18 }
  0x52   : > { %834 = vmatpush.bf16.msra.mxu1 %v1725_v10  ;;  %1177 = vmatpush.bf16.msra.mxu0 %v1749_v12 }
  0x53   : > { %624 = vmatmul.bf16.gmra.mxu3 %v539_v28  ;;  %1781 = vmatpush.bf16.msra.mxu2 %v1749_v12 }
  0x54   : > { %509 = vmatmul.bf16.gmra.mxu2 %v2045_v19 }
  0x56   : > { %835 = vmatpush.bf16.msra.mxu1 %v1724_v16  ;;  %1178 = vmatpush.bf16.msra.mxu0 %v1748_v24 }
  0x57   : > { %1782 = vmatpush.bf16.msra.mxu2 %v1748_v24 }
  0x5a   : > { %836 = vmatpush.bf16.msra.mxu1 %v1723_v25  ;;  %1179 = vmatpush.bf16.msra.mxu0 %v1747_v30 }
  0x5b   : > { %1783 = vmatpush.bf16.msra.mxu2 %v1747_v30 }
  0x5e   : > { %837 = vmatpush.bf16.msra.mxu1 %v1722_v33  ;;  %1180 = vmatpush.bf16.msra.mxu0 %v1746_v35 }
  0x5f   : > { %1784 = vmatpush.bf16.msra.mxu2 %v1746_v35 }
  0x61   : > { %398 = vmatmul.bf16.gmra.mxu1 %v212_v41  ;;  %733 = vmatmul.bf16.gmra.mxu0 %v652_v42 }
  0x62   : > { %838 = vmatpush.bf16.msra.mxu1 %v1721_v36  ;;  %1181 = vmatpush.bf16.msra.mxu0 %v1745_v49 }
  0x63   : > { %629 = vmatmul.bf16.gmra.mxu3 %v540_v46  ;;  %1785 = vmatpush.bf16.msra.mxu2 %v1745_v49 }
  0x64   : > { %514 = vmatmul.bf16.gmra.mxu2 %v425_v43 }
  0x66   : > { %839 = vmatpush.bf16.msra.mxu1 %v1720_v40  ;;  %1182 = vmatpush.bf16.msra.mxu0 %v1744_v21 }
  0x67   : > { %1786 = vmatpush.bf16.msra.mxu2 %v1744_v21 }
  0x6a   : > { %840 = vmatpush.bf16.msra.mxu1 %v1719_v47  ;;  %1183 = vmatpush.bf16.msra.mxu0 %v1743_v50 }
  0x6b   : > { %1787 = vmatpush.bf16.msra.mxu2 %v1743_v50 }
  0x6e   : > { %841 = vmatpush.bf16.msra.mxu1 %v1718_v37  ;;  %1184 = vmatpush.bf16.msra.mxu0 %v1742_v55 }
  0x6f   : > { %1788 = vmatpush.bf16.msra.mxu2 %v1742_v55 }
  0x71   : > { %403 = vmatmul.bf16.gmra.mxu1 %v213_v53  ;;  %738 = vmatmul.bf16.gmra.mxu0 %v653_v54 }
  0x73   : > { %1071 = vmatmul.bf16.vlgmr.msrb.gmra.mxu3 %v2017_v60  ;;  %v883_v60 = vpack.c.bf16 %v1562_v51, %v1442_v45 }
  0x74   : > { %957 = vmatmul.bf16.vlgmr.msrb.gmra.mxu2 %v212_v41 }
  0x81   : > { %408 = vmatmul.bf16.gmra.mxu1 %v214_v62  ;;  %743 = vmatmul.bf16.gmra.mxu0 %v654_v63 }
  0x83   : > { %1076 = vmatmul.bf16.gmra.mxu3 %v1983_v32  ;;  %v997_v32 = vpack.c.bf16 %v1602_v0, %v1482_v58 }
  0x84   : > { %962 = vmatmul.bf16.gmra.mxu2 %v213_v53 }
  0x91   : > { %842 = vmatmul.bf16.vlgmr.msra.gmra.mxu1 %v765_v22  ;;  %1185 = vmatmul.bf16.vlgmr.msra.gmra.mxu0 %v2021_v61 }
  0x93   : > { %1081 = vmatmul.bf16.gmra.mxu3 %v2014_v59  ;;  %v1111_v59 = vpack.c.bf16 %v1642_v29, %v1641_v1 }
  0x94   : > { %967 = vmatmul.bf16.gmra.mxu2 %v214_v62 }
  0xa1   : > { %847 = vmatmul.bf16.gmra.mxu1 %v766_v52  ;;  %1190 = vmatmul.bf16.gmra.mxu0 %v2045_v19 }
  0xa3   : > { %1086 = vmatmul.bf16.gmra.mxu3 %v997_v32 }
  0xa4   : > { %972 = vmatmul.bf16.gmra.mxu2 %v883_v60 }
  0xae   : > { %v327_v61 = vpop.f32.mrf.mxu1  ;;  %v317_v2 = vpop.f32.mrf.mxu0 }
  0xb1   : > { %852 = vmatmul.bf16.gmra.mxu1 %v767_v56  ;;  %1195 = vmatmul.bf16.gmra.mxu0 %v425_v43 }
  0xb4   : > { %1200 = vmatmul.bf16.vlgmr.msra.gmra.mxu2 %v1111_v59 }
  0xb6   : > { %v329_v3 = vpop.f32.mrf.mxu1  ;;  %v319_v4 = vpop.f32.mrf.mxu0 }
  0xb7   : > { %v500_v57 = vpop.f32.mrf.mxu2  ;;  %v615_v5 = vpop.f32.mrf.mxu3 }
  0xbe   : > { %v332_v8 = vpop.f32.mrf.mxu1  ;;  %v322_v9 = vpop.f32.mrf.mxu0 }
  0xbf   : > { %v502_v7 = vpop.f32.mrf.mxu2  ;;  %v2089_v10 = vpop.f32.mrf.mxu3 }
  0xc1   : > { %857 = vmatmul.bf16.gmra.mxu1 %v768_v6 }
  0xc6   : > { %v334_v12 = vpop.f32.mrf.mxu1  ;;  %v324_v13 = vpop.f32.mrf.mxu0 }
  0xc7   : > { %v505_v11 = vpop.f32.mrf.mxu2  ;;  %v620_v14 = vpop.f32.mrf.mxu3 }
  0xce   : > { %v394_v16 = vpop.f32.mrf.mxu1  ;;  %v729_v17 = vpop.f32.mrf.mxu0 }
  0xcf   : > { %v507_v15 = vpop.f32.mrf.mxu2  ;;  %v395_v18 = vadd.f32 %v394_v16, %v317_v2  ;;  %v2091_v20 = vpop.f32.mrf.mxu3 }
  0xd1   : > { %v520_v19 = vadd.f32 %v500_v57, %v395_v18 }
  0xd3   : > { %v635_v23 = vadd.f32 %v615_v5, %v520_v19 }
  0xd5   : > { %v749_v24 = vadd.f32 %v729_v17, %v635_v23 }
  0xd6   : > { %v396_v27 = vpop.f32.mrf.mxu1  ;;  %v731_v28 = vpop.f32.mrf.mxu0 }
  0xd7   : > { %v510_v25 = vpop.f32.mrf.mxu2  ;;  %v397_v26 = vadd.f32 %v396_v27, %v319_v4  ;;  %v625_v31 = vpop.f32.mrf.mxu3 }
  0xd9   : > { %v521_v30 = vadd.f32 %v502_v7, %v397_v26 }
  0xde   : > { %v399_v34 = vpop.f32.mrf.mxu1  ;;  %v734_v35 = vpop.f32.mrf.mxu0 }
  0xdf   : > { %v512_v33 = vpop.f32.mrf.mxu2  ;;  %v400_v36 = vadd.f32 %v399_v34, %v322_v9  ;;  %v2093_v42 = vpop.f32.mrf.mxu3 }
  0xe1   : > { %v522_v38 = vadd.f32 %v505_v11, %v400_v36 }
  0xe3   : > { %v637_v39 = vadd.f32 %v620_v14, %v522_v38 }
  0xe5   : > { %v751_v40 = vadd.f32 %v734_v35, %v637_v39 }
  0xe6   : > { %v401_v43 = vpop.f32.mrf.mxu1  ;;  %v2095_v44 = vpop.f32.mrf.mxu0 }
  0xe7   : > { %v515_v41 = vpop.f32.mrf.mxu2  ;;  %v402_v45 = vadd.f32 %v401_v43, %v324_v13  ;;  %v630_v21 = vpop.f32.mrf.mxu3  ;;  %v636_v13 = vadd.f32 %v2089_v10, %v521_v30 }
  0xe9   : > { %v523_v46 = vadd.f32 %v507_v15, %v402_v45  ;;  %v750_v14 = vadd.f32 %v731_v28, %v636_v13 }
  0xeb   : > { %v638_v30 = vadd.f32 %v2091_v20, %v523_v46 }
  0xed   : > { %v752_v45 = vadd.f32 %v2095_v44, %v638_v30 }
  0xee   : > { %v404_v48 = vpop.f32.mrf.mxu1  ;;  %v739_v49 = vpop.f32.mrf.mxu0 }
  0xef   : > { %v517_v47 = vpop.f32.mrf.mxu2  ;;  %v405_v37 = vadd.f32 %v404_v48, %v327_v61  ;;  %v2103_v51 = vpop.f32.mrf.mxu3 }
  0xf1   : > { %v524_v50 = vadd.f32 %v510_v25, %v405_v37  ;;  %v2112_v25 = vld [vmem:[#allocation4] ss:$0 sm:$0xff] }
  0xf3   : > { %v639_v53 = vadd.f32 %v625_v31, %v524_v50 }
  0xf5   : > { %v2097_v54 = vadd.f32 %v739_v49, %v639_v53 }
  0xf6   : > { %v406_v58 = vpop.f32.mrf.mxu1  ;;  %v2099_v62 = vpop.f32.mrf.mxu0 }
  0xf7   : > { %v958_v55 = vpop.f32.mrf.mxu2  ;;  %v407_v63 = vadd.f32 %v406_v58, %v329_v3  ;;  %v1072_v56 = vpop.f32.mrf.mxu3 }
  0xf9   : > { %v2101_v22 = vadd.f32 %v512_v33, %v407_v63 }
  0xfe   : > { %v409_v60 = vpop.f32.mrf.mxu1  ;;  %v744_v0 = vpop.f32.mrf.mxu0 }
  0xff   : > { %v960_v52 = vpop.f32.mrf.mxu2  ;;  %v410_v32 = vadd.f32 %v409_v60, %v332_v8  ;;  %v1074_v3 = vpop.f32.mrf.mxu3  ;;  %v640_v60 = vadd.f32 %v2093_v42, %v2101_v22 }
 0x101   : > { %v526_v1 = vadd.f32 %v515_v41, %v410_v32 }
 0x103   : > { %v641_v29 = vadd.f32 %v630_v21, %v526_v1 }
 0x105   : > { %v2105_v61 = vadd.f32 %v744_v0, %v641_v29 }
 0x106   : > { %v411_v59 = vpop.f32.mrf.mxu1  ;;  %v2107_v57 = vpop.f32.mrf.mxu0 }
 0x107   : > { %v963_v2 = vpop.f32.mrf.mxu2  ;;  %v412_v4 = vadd.f32 %v411_v59, %v334_v12  ;;  %v1077_v19 = vpop.f32.mrf.mxu3 }
 0x109   : > { %v2109_v5 = vadd.f32 %v517_v47, %v412_v4 }
 0x10e   : > { %v843_v6 = vpop.f32.mrf.mxu1  ;;  %v1186_v7 = vpop.f32.mrf.mxu0 }
 0x10f   : > { %v863_v9 = vadd.f32 %v843_v6, %v749_v24  ;;  %v965_v11 = vpop.f32.mrf.mxu2  ;;  %v1079_v39 = vpop.f32.mrf.mxu3 }
 0x111   : > { %v978_v8 = vadd.f32 %v958_v55, %v863_v9 }
 0x113   : > { %v1092_v15 = vadd.f32 %v1072_v56, %v978_v8  ;;  %v754_v56 = vadd.f32 %v2099_v62, %v640_v60 }
 0x115   : > { %v1206_v23 = vadd.f32 %v1186_v7, %v1092_v15  ;;  %v642_v15 = vadd.f32 %v2103_v51, %v2109_v5 }
 0x116   : > { %v845_v16 = vpop.f32.mrf.mxu1  ;;  %v1188_v17 = vpop.f32.mrf.mxu0 }
 0x117   : > { %v864_v18 = vadd.f32 %v845_v16, %v750_v14  ;;  %v968_v27 = vpop.f32.mrf.mxu2  ;;  %v1218_v31 = vadd.f32 %v2112_v25, %v1206_v23  ;;  %v1082_v21 = vpop.f32.mrf.mxu3 }
 0x119   : > { %v979_v12 = vadd.f32 %v960_v52, %v864_v18  ;;  %v1226_v35 = vmax.f32 %v1218_v31, 0.0 }
 0x11b   : > { %v1093_v26 = vadd.f32 %v1074_v3, %v979_v12  ;;  %v756_v12 = vadd.f32 %v2107_v57, %v642_v15 }
 0x11d   : > { %v1207_v24 = vadd.f32 %v1188_v17, %v1093_v26 }
 0x11e   : > { %v848_v33 = vpop.f32.mrf.mxu1  ;;  %v1191_v34 = vpop.f32.mrf.mxu0 }
 0x11f   : > { %v1219_v10 = vadd.f32 %v2112_v25, %v1207_v24  ;;  %v865_v28 = vadd.f32 %v848_v33, %v751_v40  ;;  %v970_v43 = vpop.f32.mrf.mxu2  ;;  %v1084_v59 = vpop.f32.mrf.mxu3 }
 0x121   : > { %v1227_v36 = vmax.f32 %v1219_v10, 0.0  ;;  %v980_v38 = vadd.f32 %v963_v2, %v865_v28 }
 0x123   : > { %v1753_v41 = vpack.c.bf16 %v1227_v36, %v1226_v35  ;;  %v1094_v47 = vadd.f32 %v1077_v19, %v980_v38 }
 0x125   : > { %1754 = vst [vmem:[%s2121_s7] sm:$0xff] %v1753_v41   ;;  %v1208_v20 = vadd.f32 %v1191_v34, %v1094_v47 }
 0x126   : > { %v850_v48 = vpop.f32.mrf.mxu1  ;;  %v1193_v40 = vpop.f32.mrf.mxu0 }
 0x127   : > { %v866_v49 = vadd.f32 %v850_v48, %v752_v45  ;;  %v1220_v50 = vadd.f32 %v2112_v25, %v1208_v20  ;;  %v973_v55 = vpop.f32.mrf.mxu2  ;;  %v1087_v62 = vpop.f32.mrf.mxu3 }
 0x129   : > { %v981_v46 = vadd.f32 %v965_v11, %v866_v49  ;;  %v1228_v0 = vmax.f32 %v1220_v50, 0.0 }
 0x12b   : > { %v1095_v37 = vadd.f32 %v1079_v39, %v981_v46 }
 0x12d   : > { %v1209_v53 = vadd.f32 %v1193_v40, %v1095_v37 }
 0x12e   : > { %v853_v58 = vpop.f32.mrf.mxu1  ;;  %v1196_v44 = vpop.f32.mrf.mxu0 }
 0x12f   : > { %v1221_v63 = vadd.f32 %v2112_v25, %v1209_v53  ;;  %v867_v52 = vadd.f32 %v853_v58, %v2097_v54  ;;  %v975_v6 = vpop.f32.mrf.mxu2  ;;  %v1089_v34 = vpop.f32.mrf.mxu3 }
 0x131   : > { %v1229_v32 = vmax.f32 %v1221_v63, 0.0  ;;  %v982_v1 = vadd.f32 %v968_v27, %v867_v52 }
 0x133   : > { %v1758_v29 = vpack.c.bf16 %v1229_v32, %v1228_v0  ;;  %v1096_v2 = vadd.f32 %v1082_v21, %v982_v1 }
 0x135   : > { %1770 = vst [vmem:[%s2121_s7 + $0x8] sm:$0xff] %v1758_v29   ;;  %v1210_v7 = vadd.f32 %v1196_v44, %v1096_v2 }
 0x136   : > { %v855_v4 = vpop.f32.mrf.mxu1  ;;  %v1198_v54 = vpop.f32.mrf.mxu0 }
 0x137   : > { %v868_v3 = vadd.f32 %v855_v4, %v754_v56  ;;  %v1222_v13 = vadd.f32 %v2112_v25, %v1210_v7  ;;  %v1201_v19 = vpop.f32.mrf.mxu2 }
 0x139   : > { %v983_v9 = vadd.f32 %v970_v43, %v868_v3  ;;  %v1230_v16 = vmax.f32 %v1222_v13, 0.0 }
 0x13b   : > { %v1097_v11 = vadd.f32 %v1084_v59, %v983_v9 }
 0x13d   : > { %v1211_v42 = vadd.f32 %v1198_v54, %v1097_v11 }
 0x13e   : > { %v858_v22 = vpop.f32.mrf.mxu1 }
 0x13f   : > { %v1223_v8 = vadd.f32 %v2112_v25, %v1211_v42  ;;  %v869_v14 = vadd.f32 %v858_v22, %v2105_v61  ;;  %v1203_v10 = vpop.f32.mrf.mxu2 }
 0x141   : > { %v1231_v17 = vmax.f32 %v1223_v8, 0.0  ;;  %v984_v18 = vadd.f32 %v973_v55, %v869_v14 }
 0x143   : > { %v1763_v23 = vpack.c.bf16 %v1231_v17, %v1230_v16  ;;  %v1098_v27 = vadd.f32 %v1087_v62, %v984_v18 }
 0x145   : > { %1771 = vst [vmem:[%s2121_s7 + $0x10] sm:$0xff] %v1763_v23   ;;  %v1212_v24 = vadd.f32 %v1201_v19, %v1098_v27 }
 0x146   : > { %v860_v26 = vpop.f32.mrf.mxu1 }
 0x147   : > { %v870_v31 = vadd.f32 %v860_v26, %v756_v12  ;;  %v1224_v28 = vadd.f32 %v2112_v25, %v1212_v24 }
 0x149   : > { %v985_v33 = vadd.f32 %v975_v6, %v870_v31  ;;  %v1232_v30 = vmax.f32 %v1224_v28, 0.0 }
 0x14b   : > { %v1099_v61 = vadd.f32 %v1089_v34, %v985_v33 }
 0x14d   : > { %v1213_v51 = vadd.f32 %v1203_v10, %v1099_v61 }
 0x14f   : > { %v1225_v5 = vadd.f32 %v2112_v25, %v1213_v51 }
 0x151   : > { %v1233_v35 = vmax.f32 %v1225_v5, 0.0 }
 0x153   : > { %v1768_v36 = vpack.c.bf16 %v1233_v35, %v1232_v30 }
 0x155   : > { %1772 = vst [vmem:[%s2121_s7 + $0x18] sm:$0xff] %v1768_v36  }
 0x156 PF: > { %s15_s12 = sadd.s32 1, %s1896_s12  }
 0x157   : > { %p12_p7 = scmp.ge.s32.totalorder %s15_s12, 4  }
 0x159   :  { %14 = sbr.rel (!%p12_p7) target bundleno = 2 (0x2), region = 81 }
 0x15e   :  { %1271 = vsyncpa [#allocation3], 1 }
 0x15f   :  { %1273 = vsyncpa [#allocation3 + $0x1], 1 }
 0x160   :  { %1274 = vsyncpa [#allocation5], 1 }

// kernel: deeplabv3plus_forward.11
= control target key start
LH: loop header
LB: loop body
LE: loop exit
PB: predicated region body
PF: predicated region fallthrough
CT: control target
= control target key end

     0   :  { %8 = vsyncpa [#allocation3], 0  ;;  %s1589_s0 = inlined_call_operand.vmem [shape: f32[2,44,44,32], index: 0, kind: input, shape index: {}]   ;;  %s1590_s1 = inlined_call_operand.hbm [shape: bf16[9,32,128], index: 1, kind: input, shape index: {}]   ;;  %s1591_s2 = inlined_call_operand.hbm [shape: f32[1,128], index: 2, kind: input, shape index: {}]   ;;  %s1592_s3 = inlined_call_operand.vmem [shape: bf16[2,64,128], index: 3, kind: output, shape index: {}]  }
   0x1   :  { %9 = vsyncpa [#allocation5], 0  ;;  %s1381_s12 = smov 0  }
   0x2 LB: > { %s125_s15 = sshll.u32 %s1590_s1, 4  ;;  %s1006_s16 = sadd.s32 4294967295, %s1355_s12   ;;  %s1355_s12 = sphi %s1381_s12, %s15_s12   ;;  %s126_s15 = int_to_ptr.hbm [resolvable:$true] %s125_s15 }
   0x3   : > { %p1008_p0 = scmp.ge.s32.totalorder %s1355_s12, 1  ;;  %p114_p1 = scmp.lt.s32.totalorder %s1355_s12, 3 }
   0x4   : > { %p1264_p2 = scmp.eq.s32.totalorder %s1006_s16, 0  ;;  %s1357_s18 = smov [#allocation2]  }
   0x5   : > { %p1392_p3 = pnand %p1008_p0, %p114_p1  ;;  %s127_s19 = sshll.u32 %s1357_s18, 4  ;;  %s128_s19 = int_to_ptr.vmem [resolvable:$true] %s127_s19 }
   0x6   : > { %s140_s22 = sshll.u32 %s1591_s2, 4  ;;  %s1358_s23 = smov [#allocation4]   ;;  %s141_s22 = int_to_ptr.hbm [resolvable:$true] %s140_s22 }
   0x7   : > { %p1257_p4 = pneg %p1392_p3  ;;  %s142_s24 = sshll.u32 %s1358_s23, 4  ;;  %s143_s24 = int_to_ptr.vmem [resolvable:$true] %s142_s24 }
   0x8   : > { %s1359_s25 = smov 64   ;;  %s1360_s26 = smov 4  }
   0x9   : > { %p1258_p5 = pnand %p1264_p2, %p1257_p4  ;;  %163 = sbr.rel (%p1392_p3) target bundleno = 308 (0x134), region = 32 }
   0xb   : > { %1260 = dma.hbm_to_vmem [thread:$0]  (!%p1258_p5), %s126_s15, 2304, %s128_s19, [#allocation3], %s1359_s25, %s1359_s25, %s1360_s26  }
   0xc   : > { %1263 = dma.hbm_to_vmem [thread:$0]  (!%p1258_p5), %s141_s22, 16, %s143_s24, [#allocation5]  }
   0xe   : > { %1346 = dma.done.wait (%p1264_p2), [#allocation3], 2304  }
   0xf   : > { %1348 = vsyncadd (%p1264_p2), [#allocation3], 4294964992 }
  0x10   : > { %1350 = dma.done.wait (%p1264_p2), [#allocation5], 16  }
  0x11   : > { %1352 = vsyncadd (%p1264_p2), [#allocation5], 4294967280  ;;  %p193_p6 = scmp.lt.s32.totalorder %s1006_s16, 1  ;;  %v1204_v0 = vld [vmem:[#allocation2 + $0x18] sm:$0xff]  ;;  %v1203_v1 = vld [vmem:[#allocation2 + $0x10] sm:$0xff]  ;;  %vm250_vm0 = vcmask 261120  }
  0x12   : > { %1242 = vmatpush.bf16.msra.mxu1 %v1204_v0  ;;  %1243 = vmatpush.bf16.msra.mxu2 %v1204_v0  ;;  %v1206_v10 = vld [vmem:[#allocation2 + $0x28] sm:$0xff]  ;;  %v1208_v11 = vld [vmem:[#allocation2 + $0x38] sm:$0xff]  ;;  %v1205_v18 = vld [vmem:[#allocation2 + $0x20] sm:$0xff] }
  0x13   : > { %s1595_s16 = smov (!%p193_p6, %s1006_s16), 1  ;;  %1244 = vmatpush.bf16.msra.mxu3 %v1204_v0  ;;  %269 = vmatpush.bf16.msra.mxu0 %v1204_v0  ;;  %v1202_v16 = vld [vmem:[#allocation2 + $0x8] sm:$0xff]  ;;  %v1207_v19 = vld [vmem:[#allocation2 + $0x30] sm:$0xff]  ;;  %v1216_v21 = vld [vmem:[#allocation2 + $0x78] sm:$0xff] }
  0x14   : > { %s1248_s27 = smul.u32 2112, %s1595_s16  ;;  %v1210_v17 = vld [vmem:[#allocation2 + $0x48] sm:$0xff]  ;;  %v1201_v22 = vld [vmem:[#allocation2] sm:$0xff]  ;;  %v1212_v24 = vld [vmem:[#allocation2 + $0x58] sm:$0xff]  ;;  %s1200_s4 = sshll.u32 %s1595_s16, 5 }
  0x15   : > { %v1214_v20 = vld [vmem:[#allocation2 + $0x68] sm:$0xff]  ;;  %v1209_v23 = vld [vmem:[#allocation2 + $0x40] sm:$0xff]  ;;  %v1215_v39 = vld [vmem:[#allocation2 + $0x70] sm:$0xff]  ;;  %s1561_s7 = scalar_lea.vmem %s1592_s3, %s1200_s4 }
  0x16   : > { %s1414_s30 = scalar_lea.vmem %s1589_s0, %s1248_s27  ;;  %1245 = vmatpush.bf16.msra.mxu1 %v1203_v1  ;;  %1246 = vmatpush.bf16.msra.mxu2 %v1203_v1  ;;  %v1218_v25 = vld [vmem:[#allocation2 + $0x88] sm:$0xff]  ;;  %v1213_v38 = vld [vmem:[#allocation2 + $0x60] sm:$0xff]  ;;  %v1211_v40 = vld [vmem:[#allocation2 + $0x50] sm:$0xff] }
  0x17   : > { %v1028_v2 = vld [vmem:[%s1414_s30 + $0x192] sm:$0xff]  ;;  %v1029_v3 = vld [vmem:[%s1414_s30 + $0x1c2] sm:$0xff]  ;;  %1247 = vmatpush.bf16.msra.mxu3 %v1203_v1  ;;  %270 = vmatpush.bf16.msra.mxu0 %v1203_v1 }
  0x18   : > { %v1030_v4 = vld [vmem:[%s1414_s30 + $0x1f2] sm:$0xff]  ;;  %v1031_v5 = vld [vmem:[%s1414_s30 + $0x222] sm:$0xff]  ;;  %v230_v12 = vpack.c.bf16 %v1029_v3, %v1028_v2 }
  0x19   : > { %v1032_v6 = vld [vmem:[%s1414_s30 + $0x252] sm:$0xff]  ;;  %v1033_v7 = vld [vmem:[%s1414_s30 + $0x282] sm:$0xff]  ;;  %v231_v13 = vpack.c.bf16 %v1031_v5, %v1030_v4 }
  0x1a   : > { %v1026_v8 = vld [vmem:[%s1414_s30 + $0x132] sm:$0xff]  ;;  %v1027_v9 = vld [vmem:[%s1414_s30 + $0x162] sm:$0xff]  ;;  %v232_v14 = vpack.c.bf16 %v1033_v7, %v1032_v6  ;;  %392 = vmatpush.bf16.msrb.mxu2 %v1206_v10  ;;  %1043 = vmatmul.msk.bf16.vlgmr.msra.gmra.mxu1 %vm250_vm0, %v230_v12 }
  0x1b   : > { %v229_v15 = vpack.c.bf16 %v1027_v9, %v1026_v8  ;;  %471 = vmatpush.bf16.msrb.mxu3 %v1208_v11  ;;  %1044 = vmatmul.msk.bf16.vlgmr.msra.gmra.mxu2 %vm250_vm0, %v231_v13  ;;  %v1018_v26 = vld [vmem:[%s1414_s30 + $0x126] sm:$0xff]  ;;  %v1019_v27 = vld [vmem:[%s1414_s30 + $0x156] sm:$0xff]  ;;  %v1058_v28 = vld [vmem:[%s1414_s30 + $0x13e] sm:$0xff] }
  0x1c   : > { %1045 = vmatmul.msk.bf16.vlgmr.msra.gmra.mxu3 %vm250_vm0, %v232_v14  ;;  %322 = vmatpush.bf16.msrb.mxu1 %v1202_v16  ;;  %v1059_v29 = vld [vmem:[%s1414_s30 + $0x16e] sm:$0xff]  ;;  %v1078_v30 = vld [vmem:[%s1414_s30 + $0x366] sm:$0xff]  ;;  %v1079_v31 = vld [vmem:[%s1414_s30 + $0x396] sm:$0xff]  ;;  %v213_v34 = vpack.c.bf16 %v1019_v27, %v1018_v26 }
  0x1d   : > { %1042 = vmatmul.msk.bf16.vlgmr.msra.gmra.mxu0 %vm250_vm0, %v229_v15  ;;  %v1098_v32 = vld [vmem:[%s1414_s30 + $0x372] sm:$0xff]  ;;  %v1099_v33 = vld [vmem:[%s1414_s30 + $0x3a2] sm:$0xff]  ;;  %v353_v35 = vpack.c.bf16 %v1059_v29, %v1058_v28  ;;  %v432_v36 = vpack.c.bf16 %v1079_v31, %v1078_v30 }
  0x1e   : > { %549 = vmatpush.bf16.msrb.mxu0 %v1210_v17  ;;  %393 = vmatpush.bf16.msrb.mxu2 %v1205_v18  ;;  %v510_v37 = vpack.c.bf16 %v1099_v33, %v1098_v32  ;;  %v1217_v41 = vld [vmem:[#allocation2 + $0x80] sm:$0xff]  ;;  %v1021_v43 = vld [vmem:[%s1414_s30 + $0x1b6] sm:$0xff]  ;;  %v1061_v45 = vld [vmem:[%s1414_s30 + $0x1ce] sm:$0xff] }
  0x1f   : > { %472 = vmatpush.bf16.msrb.mxu3 %v1207_v19  ;;  %v1020_v42 = vld [vmem:[%s1414_s30 + $0x186] sm:$0xff]  ;;  %v1060_v44 = vld [vmem:[%s1414_s30 + $0x19e] sm:$0xff]  ;;  %v1081_v47 = vld [vmem:[%s1414_s30 + $0x3f6] sm:$0xff] }
  0x20   : > { %323 = vmatpush.bf16.msrb.mxu1 %v1201_v22  ;;  %v1080_v46 = vld [vmem:[%s1414_s30 + $0x3c6] sm:$0xff]  ;;  %v1100_v48 = vld [vmem:[%s1414_s30 + $0x3d2] sm:$0xff]  ;;  %v214_v50 = vpack.c.bf16 %v1021_v43, %v1020_v42  ;;  %v354_v51 = vpack.c.bf16 %v1061_v45, %v1060_v44  ;;  %v1062_v56 = vld [vmem:[%s1414_s30 + $0x1fe] sm:$0xff] }
  0x21   : > { %v1101_v49 = vld [vmem:[%s1414_s30 + $0x402] sm:$0xff]  ;;  %v433_v52 = vpack.c.bf16 %v1081_v47, %v1080_v46  ;;  %v1023_v55 = vld [vmem:[%s1414_s30 + $0x216] sm:$0xff]  ;;  %v1063_v57 = vld [vmem:[%s1414_s30 + $0x22e] sm:$0xff] }
  0x22   : > { %706 = vmatpush.bf16.msra.mxu2 %v1214_v20  ;;  %550 = vmatpush.bf16.msrb.mxu0 %v1209_v23  ;;  %v511_v53 = vpack.c.bf16 %v1101_v49, %v1100_v48  ;;  %v1022_v54 = vld [vmem:[%s1414_s30 + $0x1e6] sm:$0xff]  ;;  %v1083_v59 = vld [vmem:[%s1414_s30 + $0x456] sm:$0xff]  ;;  %v355_v63 = vpack.c.bf16 %v1063_v57, %v1062_v56  ;;  %v1064_v4 = vld [vmem:[%s1414_s30 + $0x25e] sm:$0xff] }
  0x23   : > { %784 = vmatpush.bf16.msra.mxu3 %v1216_v21  ;;  %v1082_v58 = vld [vmem:[%s1414_s30 + $0x426] sm:$0xff]  ;;  %v1102_v60 = vld [vmem:[%s1414_s30 + $0x432] sm:$0xff]  ;;  %v215_v62 = vpack.c.bf16 %v1023_v55, %v1022_v54  ;;  %v1118_v14 = vld [vmem:[%s1414_s30 + $0x37e] sm:$0xff] }
  0x24   : > { %627 = vmatpush.bf16.msra.mxu1 %v1212_v24  ;;  %v1103_v61 = vld [vmem:[%s1414_s30 + $0x462] sm:$0xff]  ;;  %v434_v0 = vpack.c.bf16 %v1083_v59, %v1082_v58  ;;  %v1025_v3 = vld [vmem:[%s1414_s30 + $0x276] sm:$0xff]  ;;  %v1065_v5 = vld [vmem:[%s1414_s30 + $0x28e] sm:$0xff] }
  0x25   : > { %v512_v1 = vpack.c.bf16 %v1103_v61, %v1102_v60  ;;  %v1024_v2 = vld [vmem:[%s1414_s30 + $0x246] sm:$0xff]  ;;  %v1085_v7 = vld [vmem:[%s1414_s30 + $0x4b6] sm:$0xff]  ;;  %v356_v11 = vpack.c.bf16 %v1065_v5, %v1064_v4  ;;  %v1119_v15 = vld [vmem:[%s1414_s30 + $0x3ae] sm:$0xff] }
  0x26   : > { %862 = vmatpush.bf16.msra.mxu0 %v1218_v25  ;;  %707 = vmatpush.bf16.msra.mxu2 %v1213_v38  ;;  %v1084_v6 = vld [vmem:[%s1414_s30 + $0x486] sm:$0xff]  ;;  %v1104_v8 = vld [vmem:[%s1414_s30 + $0x492] sm:$0xff]  ;;  %v216_v10 = vpack.c.bf16 %v1025_v3, %v1024_v2  ;;  %v1178_v20 = vld [vmem:[%s1414_s30 + $0x5be] sm:$0xff]  ;;  %v588_v22 = vpack.c.bf16 %v1119_v15, %v1118_v14 }
  0x27   : > { %785 = vmatpush.bf16.msra.mxu3 %v1215_v39  ;;  %v1105_v9 = vld [vmem:[%s1414_s30 + $0x4c2] sm:$0xff]  ;;  %v435_v12 = vpack.c.bf16 %v1085_v7, %v1084_v6  ;;  %v1139_v17 = vld [vmem:[%s1414_s30 + $0x5d6] sm:$0xff]  ;;  %v1179_v21 = vld [vmem:[%s1414_s30 + $0x5ee] sm:$0xff] }
  0x28   : > { %628 = vmatpush.bf16.msra.mxu1 %v1211_v40  ;;  %v513_v13 = vpack.c.bf16 %v1105_v9, %v1104_v8  ;;  %v1138_v16 = vld [vmem:[%s1414_s30 + $0x5a6] sm:$0xff]  ;;  %v1158_v18 = vld [vmem:[%s1414_s30 + $0x5b2] sm:$0xff]  ;;  %v823_v25 = vpack.c.bf16 %v1179_v21, %v1178_v20  ;;  %v1120_v26 = vld [vmem:[%s1414_s30 + $0x3de] sm:$0xff] }
  0x29   : > { %v1159_v19 = vld [vmem:[%s1414_s30 + $0x5e2] sm:$0xff]  ;;  %v667_v23 = vpack.c.bf16 %v1139_v17, %v1138_v16  ;;  %v1121_v27 = vld [vmem:[%s1414_s30 + $0x40e] sm:$0xff]  ;;  %v1141_v29 = vld [vmem:[%s1414_s30 + $0x636] sm:$0xff] }
  0x2a   : > { %1054 = vmatmul.msk.bf16.vlgmr.msrb.gmra.mxu1 %vm250_vm0, %v213_v34  ;;  %863 = vmatpush.bf16.msra.mxu0 %v1217_v41  ;;  %v745_v24 = vpack.c.bf16 %v1159_v19, %v1158_v18  ;;  %v1140_v28 = vld [vmem:[%s1414_s30 + $0x606] sm:$0xff]  ;;  %v1160_v30 = vld [vmem:[%s1414_s30 + $0x612] sm:$0xff]  ;;  %v1180_v32 = vld [vmem:[%s1414_s30 + $0x61e] sm:$0xff]  ;;  %v589_v34 = vpack.c.bf16 %v1121_v27, %v1120_v26 }
  0x2b   : > { %1074 = vmatmul.msk.bf16.vlgmr.msrb.gmra.mxu2 %vm250_vm0, %v353_v35  ;;  %v1161_v31 = vld [vmem:[%s1414_s30 + $0x642] sm:$0xff]  ;;  %v1181_v33 = vld [vmem:[%s1414_s30 + $0x64e] sm:$0xff]  ;;  %v668_v35 = vpack.c.bf16 %v1141_v29, %v1140_v28  ;;  %v1143_v41 = vld [vmem:[%s1414_s30 + $0x696] sm:$0xff] }
  0x2c   : > { %1094 = vmatmul.msk.bf16.vlgmr.msrb.gmra.mxu3 %vm250_vm0, %v432_v36  ;;  %v746_v36 = vpack.c.bf16 %v1161_v31, %v1160_v30  ;;  %v1122_v38 = vld [vmem:[%s1414_s30 + $0x43e] sm:$0xff]  ;;  %v1123_v39 = vld [vmem:[%s1414_s30 + $0x46e] sm:$0xff]  ;;  %v1142_v40 = vld [vmem:[%s1414_s30 + $0x666] sm:$0xff] }
  0x2d   : > { %1114 = vmatmul.msk.bf16.vlgmr.msrb.gmra.mxu0 %vm250_vm0, %v510_v37  ;;  %v824_v37 = vpack.c.bf16 %v1181_v33, %v1180_v32  ;;  %v1162_v42 = vld [vmem:[%s1414_s30 + $0x672] sm:$0xff]  ;;  %v1163_v43 = vld [vmem:[%s1414_s30 + $0x6a2] sm:$0xff]  ;;  %v590_v46 = vpack.c.bf16 %v1123_v39, %v1122_v38  ;;  %v669_v47 = vpack.c.bf16 %v1143_v41, %v1142_v40 }
  0x2e   : > { %v1182_v44 = vld [vmem:[%s1414_s30 + $0x67e] sm:$0xff]  ;;  %v1183_v45 = vld [vmem:[%s1414_s30 + $0x6ae] sm:$0xff]  ;;  %v747_v48 = vpack.c.bf16 %v1163_v43, %v1162_v42 }
  0x2f   : > { %v825_v49 = vpack.c.bf16 %v1183_v45, %v1182_v44  ;;  %v1164_v54 = vld [vmem:[%s1414_s30 + $0x6d2] sm:$0xff]  ;;  %v1165_v55 = vld [vmem:[%s1414_s30 + $0x702] sm:$0xff] }
  0x30   : > { %v1184_v56 = vld [vmem:[%s1414_s30 + $0x6de] sm:$0xff]  ;;  %v1185_v57 = vld [vmem:[%s1414_s30 + $0x70e] sm:$0xff]  ;;  %v748_v61 = vpack.c.bf16 %v1165_v55, %v1164_v54 }
  0x3a   : > { %1055 = vmatmul.msk.bf16.gmra.mxu1 %vm250_vm0, %v214_v50  ;;  %v1124_v50 = vld [vmem:[%s1414_s30 + $0x49e] sm:$0xff] }
  0x3b   : > { %1075 = vmatmul.msk.bf16.gmra.mxu2 %vm250_vm0, %v354_v51  ;;  %v1125_v51 = vld [vmem:[%s1414_s30 + $0x4ce] sm:$0xff] }
  0x3c   : > { %1095 = vmatmul.msk.bf16.gmra.mxu3 %vm250_vm0, %v433_v52  ;;  %v1144_v52 = vld [vmem:[%s1414_s30 + $0x6c6] sm:$0xff]  ;;  %v591_v58 = vpack.c.bf16 %v1125_v51, %v1124_v50 }
  0x3d   : > { %1115 = vmatmul.msk.bf16.gmra.mxu0 %vm250_vm0, %v511_v53  ;;  %v1145_v53 = vld [vmem:[%s1414_s30 + $0x6f6] sm:$0xff] }
  0x3e   : > { %v670_v59 = vpack.c.bf16 %v1145_v53, %v1144_v52 }
  0x4a   : > { %1056 = vmatmul.msk.bf16.gmra.mxu1 %vm250_vm0, %v215_v62  ;;  %v826_v62 = vpack.c.bf16 %v1185_v57, %v1184_v56 }
  0x4b   : > { %1076 = vmatmul.msk.bf16.gmra.mxu2 %vm250_vm0, %v355_v63 }
  0x4c   : > { %1096 = vmatmul.msk.bf16.gmra.mxu3 %vm250_vm0, %v434_v0 }
  0x4d   : > { %1116 = vmatmul.msk.bf16.gmra.mxu0 %vm250_vm0, %v512_v1 }
  0x5a   : > { %1057 = vmatmul.msk.bf16.gmra.mxu1 %vm250_vm0, %v216_v10 }
  0x5b   : > { %1077 = vmatmul.msk.bf16.gmra.mxu2 %vm250_vm0, %v356_v11 }
  0x5c   : > { %1097 = vmatmul.msk.bf16.gmra.mxu3 %vm250_vm0, %v435_v12 }
  0x5d   : > { %1117 = vmatmul.msk.bf16.gmra.mxu0 %vm250_vm0, %v513_v13 }
  0x6a   : > { %1134 = vmatmul.msk.bf16.vlgmr.msra.gmra.mxu1 %vm250_vm0, %v588_v22 }
  0x6b   : > { %1154 = vmatmul.msk.bf16.vlgmr.msra.gmra.mxu2 %vm250_vm0, %v667_v23 }
  0x6c   : > { %1174 = vmatmul.msk.bf16.vlgmr.msra.gmra.mxu3 %vm250_vm0, %v745_v24 }
  0x6d   : > { %1194 = vmatmul.msk.bf16.vlgmr.msra.gmra.mxu0 %vm250_vm0, %v823_v25 }
  0x7a   : > { %1135 = vmatmul.msk.bf16.gmra.mxu1 %vm250_vm0, %v589_v34 }
  0x7b   : > { %1155 = vmatmul.msk.bf16.gmra.mxu2 %vm250_vm0, %v668_v35 }
  0x7c   : > { %1175 = vmatmul.msk.bf16.gmra.mxu3 %vm250_vm0, %v746_v36 }
  0x7d   : > { %1195 = vmatmul.msk.bf16.gmra.mxu0 %vm250_vm0, %v824_v37 }
  0x8a   : > { %1136 = vmatmul.msk.bf16.gmra.mxu1 %vm250_vm0, %v590_v46 }
  0x8b   : > { %1156 = vmatmul.msk.bf16.gmra.mxu2 %vm250_vm0, %v669_v47 }
  0x8c   : > { %1176 = vmatmul.msk.bf16.gmra.mxu3 %vm250_vm0, %v747_v48 }
  0x8d   : > { %1196 = vmatmul.msk.bf16.gmra.mxu0 %vm250_vm0, %v825_v49 }
  0x97   : > { %v277_v60 = vpop.f32.mrf.mxu1 }
  0x9a   : > { %v272_v63 = vpop.f32.mrf.mxu0  ;;  %1137 = vmatmul.msk.bf16.gmra.mxu1 %vm250_vm0, %v591_v58 }
  0x9b   : > { %1157 = vmatmul.msk.bf16.gmra.mxu2 %vm250_vm0, %v670_v59 }
  0x9c   : > { %1177 = vmatmul.msk.bf16.gmra.mxu3 %vm250_vm0, %v748_v61 }
  0x9d   : > { %1197 = vmatmul.msk.bf16.gmra.mxu0 %vm250_vm0, %v826_v62 }
  0x9e   : > { %v282_v0 = vpop.f32.mrf.mxu2 }
  0x9f   : > { %v287_v1 = vpop.f32.mrf.mxu3  ;;  %v1524_v2 = vpop.f32.mrf.mxu1 }
  0xa2   : > { %v274_v3 = vpop.f32.mrf.mxu0 }
  0xa6   : > { %v1526_v4 = vpop.f32.mrf.mxu2 }
  0xa7   : > { %v1528_v5 = vpop.f32.mrf.mxu3  ;;  %v325_v6 = vpop.f32.mrf.mxu1 }
  0xa8   : > { %v326_v7 = vadd.f32 %v325_v6, %v272_v63 }
  0xaa   : > { %v552_v8 = vpop.f32.mrf.mxu0 }
  0xae   : > { %v395_v9 = vpop.f32.mrf.mxu2 }
  0xaf   : > { %v415_v10 = vadd.f32 %v395_v9, %v326_v7  ;;  %v474_v11 = vpop.f32.mrf.mxu3  ;;  %v327_v12 = vpop.f32.mrf.mxu1 }
  0xb0   : > { %v328_v55 = vadd.f32 %v327_v12, %v274_v3 }
  0xb1   : > { %v494_v13 = vadd.f32 %v474_v11, %v415_v10  ;;  %v1552_v10 = vld [vmem:[#allocation4] ss:$0 sm:$0xff] }
  0xb2   : > { %v554_v14 = vpop.f32.mrf.mxu0 }
  0xb3   : > { %v572_v15 = vadd.f32 %v552_v8, %v494_v13 }
  0xb6   : > { %v397_v16 = vpop.f32.mrf.mxu2 }
  0xb7   : > { %v476_v17 = vpop.f32.mrf.mxu3  ;;  %v330_v18 = vpop.f32.mrf.mxu1  ;;  %v416_v57 = vadd.f32 %v397_v16, %v328_v55 }
  0xb8   : > { %v331_v19 = vadd.f32 %v330_v18, %v277_v60 }
  0xb9   : > { %v495_v60 = vadd.f32 %v476_v17, %v416_v57 }
  0xba   : > { %v557_v20 = vpop.f32.mrf.mxu0 }
  0xbb   : > { %v573_v6 = vadd.f32 %v554_v14, %v495_v60 }
  0xbe   : > { %v400_v21 = vpop.f32.mrf.mxu2 }
  0xbf   : > { %v417_v22 = vadd.f32 %v400_v21, %v331_v19  ;;  %v479_v23 = vpop.f32.mrf.mxu3  ;;  %v332_v24 = vpop.f32.mrf.mxu1 }
  0xc0   : > { %v333_v12 = vadd.f32 %v332_v24, %v1524_v2 }
  0xc1   : > { %v496_v25 = vadd.f32 %v479_v23, %v417_v22 }
  0xc2   : > { %v1530_v26 = vpop.f32.mrf.mxu0 }
  0xc3   : > { %v574_v27 = vadd.f32 %v557_v20, %v496_v25 }
  0xc6   : > { %v402_v28 = vpop.f32.mrf.mxu2 }
  0xc7   : > { %v481_v29 = vpop.f32.mrf.mxu3  ;;  %v335_v30 = vpop.f32.mrf.mxu1  ;;  %v418_v17 = vadd.f32 %v402_v28, %v333_v12 }
  0xc8   : > { %v336_v31 = vadd.f32 %v335_v30, %v282_v0 }
  0xc9   : > { %v497_v22 = vadd.f32 %v481_v29, %v418_v17 }
  0xca   : > { %v562_v32 = vpop.f32.mrf.mxu0 }
  0xce   : > { %v405_v33 = vpop.f32.mrf.mxu2 }
  0xcf   : > { %v419_v34 = vadd.f32 %v405_v33, %v336_v31  ;;  %v484_v35 = vpop.f32.mrf.mxu3  ;;  %v1532_v36 = vpop.f32.mrf.mxu1  ;;  %v575_v33 = vadd.f32 %v1530_v26, %v497_v22 }
  0xd1   : > { %v498_v37 = vadd.f32 %v484_v35, %v419_v34 }
  0xd2   : > { %v1534_v38 = vpop.f32.mrf.mxu0 }
  0xd3   : > { %v1536_v39 = vadd.f32 %v562_v32, %v498_v37 }
  0xd6   : > { %v1538_v40 = vpop.f32.mrf.mxu2 }
  0xd7   : > { %v1540_v41 = vpop.f32.mrf.mxu3  ;;  %v340_v42 = vpop.f32.mrf.mxu1 }
  0xd8   : > { %v341_v43 = vadd.f32 %v340_v42, %v287_v1 }
  0xda   : > { %v567_v44 = vpop.f32.mrf.mxu0 }
  0xde   : > { %v410_v45 = vpop.f32.mrf.mxu2 }
  0xdf   : > { %v421_v46 = vadd.f32 %v410_v45, %v341_v43  ;;  %v489_v47 = vpop.f32.mrf.mxu3  ;;  %v1542_v48 = vpop.f32.mrf.mxu1  ;;  %v338_v43 = vadd.f32 %v1532_v36, %v1526_v4 }
  0xe1   : > { %v500_v49 = vadd.f32 %v489_v47, %v421_v46  ;;  %v420_v45 = vadd.f32 %v1538_v40, %v338_v43 }
  0xe2   : > { %v1544_v50 = vpop.f32.mrf.mxu0 }
  0xe3   : > { %v1546_v51 = vadd.f32 %v567_v44, %v500_v49 }
  0xe6   : > { %v1548_v52 = vpop.f32.mrf.mxu2 }
  0xe7   : > { %v1550_v53 = vpop.f32.mrf.mxu3  ;;  %v630_v54 = vpop.f32.mrf.mxu1 }
  0xe8   : > { %v650_v58 = vadd.f32 %v630_v54, %v572_v15 }
  0xea   : > { %v865_v56 = vpop.f32.mrf.mxu0 }
  0xee   : > { %v709_v59 = vpop.f32.mrf.mxu2 }
  0xef   : > { %v729_v61 = vadd.f32 %v709_v59, %v650_v58  ;;  %v787_v62 = vpop.f32.mrf.mxu3  ;;  %v632_v63 = vpop.f32.mrf.mxu1 }
  0xf0   : > { %v651_v7 = vadd.f32 %v632_v63, %v573_v6 }
  0xf1   : > { %v807_v1 = vadd.f32 %v787_v62, %v729_v61 }
  0xf2   : > { %v867_v0 = vpop.f32.mrf.mxu0 }
  0xf3   : > { %v885_v9 = vadd.f32 %v865_v56, %v807_v1  ;;  %v499_v56 = vadd.f32 %v1540_v41, %v420_v45  ;;  %v343_v41 = vadd.f32 %v1542_v48, %v1528_v5 }
  0xf5   : > { %v897_v18 = vadd.f32 %v1552_v10, %v885_v9  ;;  %v577_v40 = vadd.f32 %v1534_v38, %v499_v56  ;;  %v422_v9 = vadd.f32 %v1548_v52, %v343_v41 }
  0xf6   : > { %v711_v8 = vpop.f32.mrf.mxu2 }
  0xf7   : > { %v730_v11 = vadd.f32 %v711_v8, %v651_v7  ;;  %v789_v13 = vpop.f32.mrf.mxu3  ;;  %v635_v3 = vpop.f32.mrf.mxu1  ;;  %v905_v23 = vmax.f32 %v897_v18, 0.0 }
  0xf8   : > { %v652_v14 = vadd.f32 %v635_v3, %v574_v27 }
  0xf9   : > { %v808_v15 = vadd.f32 %v789_v13, %v730_v11 }
  0xfa   : > { %v870_v16 = vpop.f32.mrf.mxu0 }
  0xfb   : > { %v886_v19 = vadd.f32 %v867_v0, %v808_v15  ;;  %v501_v15 = vadd.f32 %v1550_v53, %v422_v9 }
  0xfd   : > { %v898_v20 = vadd.f32 %v1552_v10, %v886_v19 }
  0xfe   : > { %v714_v21 = vpop.f32.mrf.mxu2 }
  0xff   : > { %v906_v25 = vmax.f32 %v898_v20, 0.0  ;;  %v731_v30 = vadd.f32 %v714_v21, %v652_v14  ;;  %v792_v31 = vpop.f32.mrf.mxu3  ;;  %v637_v2 = vpop.f32.mrf.mxu1  ;;  %v579_v14 = vadd.f32 %v1544_v50, %v501_v15 }
 0x100   : > { %v653_v27 = vadd.f32 %v637_v2, %v575_v33 }
 0x101   : > { %v1222_v24 = vpack.c.bf16 %v906_v25, %v905_v23  ;;  %v809_v32 = vadd.f32 %v792_v31, %v731_v30 }
 0x102   : > { %v872_v28 = vpop.f32.mrf.mxu0 }
 0x103   : > { %1223 = vst [vmem:[%s1561_s7] sm:$0xff] %v1222_v24   ;;  %v887_v29 = vadd.f32 %v870_v16, %v809_v32 }
 0x105   : > { %v899_v46 = vadd.f32 %v1552_v10, %v887_v29 }
 0x106   : > { %v716_v34 = vpop.f32.mrf.mxu2 }
 0x107   : > { %v732_v35 = vadd.f32 %v716_v34, %v653_v27  ;;  %v794_v37 = vpop.f32.mrf.mxu3  ;;  %v640_v42 = vpop.f32.mrf.mxu1  ;;  %v907_v57 = vmax.f32 %v899_v46, 0.0 }
 0x108   : > { %v654_v26 = vadd.f32 %v640_v42, %v1536_v39 }
 0x109   : > { %v810_v44 = vadd.f32 %v794_v37, %v732_v35 }
 0x10a   : > { %v875_v49 = vpop.f32.mrf.mxu0 }
 0x10b   : > { %v888_v47 = vadd.f32 %v872_v28, %v810_v44 }
 0x10d   : > { %v900_v54 = vadd.f32 %v1552_v10, %v888_v47 }
 0x10e   : > { %v719_v55 = vpop.f32.mrf.mxu2 }
 0x10f   : > { %v908_v58 = vmax.f32 %v900_v54, 0.0  ;;  %v733_v59 = vadd.f32 %v719_v55, %v654_v26  ;;  %v797_v60 = vpop.f32.mrf.mxu3  ;;  %v642_v4 = vpop.f32.mrf.mxu1 }
 0x110   : > { %v655_v62 = vadd.f32 %v642_v4, %v577_v40 }
 0x111   : > { %v1227_v36 = vpack.c.bf16 %v908_v58, %v907_v57  ;;  %v811_v61 = vadd.f32 %v797_v60, %v733_v59 }
 0x112   : > { %v877_v63 = vpop.f32.mrf.mxu0 }
 0x113   : > { %1239 = vst [vmem:[%s1561_s7 + $0x8] sm:$0xff] %v1227_v36   ;;  %v889_v1 = vadd.f32 %v875_v49, %v811_v61 }
 0x115   : > { %v901_v11 = vadd.f32 %v1552_v10, %v889_v1 }
 0x116   : > { %v721_v0 = vpop.f32.mrf.mxu2 }
 0x117   : > { %v734_v6 = vadd.f32 %v721_v0, %v655_v62  ;;  %v799_v7 = vpop.f32.mrf.mxu3  ;;  %v645_v39 = vpop.f32.mrf.mxu1  ;;  %v909_v16 = vmax.f32 %v901_v11, 0.0 }
 0x118   : > { %v656_v38 = vadd.f32 %v645_v39, %v1546_v51 }
 0x119   : > { %v812_v8 = vadd.f32 %v799_v7, %v734_v6 }
 0x11a   : > { %v880_v20 = vpop.f32.mrf.mxu0 }
 0x11b   : > { %v890_v13 = vadd.f32 %v877_v63, %v812_v8 }
 0x11d   : > { %v902_v3 = vadd.f32 %v1552_v10, %v890_v13 }
 0x11e   : > { %v724_v12 = vpop.f32.mrf.mxu2 }
 0x11f   : > { %v910_v17 = vmax.f32 %v902_v3, 0.0  ;;  %v735_v18 = vadd.f32 %v724_v12, %v656_v38  ;;  %v802_v19 = vpop.f32.mrf.mxu3  ;;  %v647_v48 = vpop.f32.mrf.mxu1 }
 0x120   : > { %v657_v21 = vadd.f32 %v647_v48, %v579_v14 }
 0x121   : > { %v1232_v5 = vpack.c.bf16 %v910_v17, %v909_v16  ;;  %v813_v52 = vadd.f32 %v802_v19, %v735_v18 }
 0x122   : > { %v882_v31 = vpop.f32.mrf.mxu0 }
 0x123   : > { %1240 = vst [vmem:[%s1561_s7 + $0x10] sm:$0xff] %v1232_v5   ;;  %v891_v23 = vadd.f32 %v880_v20, %v813_v52 }
 0x125   : > { %v903_v53 = vadd.f32 %v1552_v10, %v891_v23 }
 0x126   : > { %v726_v22 = vpop.f32.mrf.mxu2 }
 0x127   : > { %v736_v25 = vadd.f32 %v726_v22, %v657_v21  ;;  %v804_v51 = vpop.f32.mrf.mxu3  ;;  %v911_v28 = vmax.f32 %v903_v53, 0.0 }
 0x129   : > { %v814_v30 = vadd.f32 %v804_v51, %v736_v25 }
 0x12b   : > { %v892_v2 = vadd.f32 %v882_v31, %v814_v30 }
 0x12d   : > { %v904_v24 = vadd.f32 %v1552_v10, %v892_v2 }
 0x12f   : > { %v912_v32 = vmax.f32 %v904_v24, 0.0 }
 0x131   : > { %v1237_v33 = vpack.c.bf16 %v912_v32, %v911_v28 }
 0x133   : > { %1241 = vst [vmem:[%s1561_s7 + $0x18] sm:$0xff] %v1237_v33  }
 0x134 PF: > { %s15_s12 = sadd.s32 1, %s1355_s12  }
 0x135   : > { %p12_p7 = scmp.ge.s32.totalorder %s15_s12, 4  }
 0x137   :  { %14 = sbr.rel (!%p12_p7) target bundleno = 2 (0x2), region = 82 }
 0x13c   :  { %950 = vsyncpa [#allocation3], 1 }
 0x13d   :  { %952 = vsyncpa [#allocation3 + $0x1], 1 }
 0x13e   :  { %953 = vsyncpa [#allocation5], 1 }

// kernel: deeplabv3plus_forward.12
= control target key start
LH: loop header
LB: loop body
LE: loop exit
PB: predicated region body
PF: predicated region fallthrough
CT: control target
= control target key end

     0   :  { %8 = vsyncpa [#allocation3], 0  ;;  %s1564_s0 = inlined_call_operand.vmem [shape: f32[2,44,44,32], index: 0, kind: input, shape index: {}]   ;;  %s1565_s1 = inlined_call_operand.hbm [shape: bf16[9,32,128], index: 1, kind: input, shape index: {}]   ;;  %s1566_s2 = inlined_call_operand.hbm [shape: f32[1,128], index: 2, kind: input, shape index: {}]   ;;  %s1567_s3 = inlined_call_operand.vmem [shape: bf16[2,64,128], index: 3, kind: output, shape index: {}]  }
   0x1   :  { %9 = vsyncpa [#allocation5], 0  ;;  %s1356_s12 = smov 0  }
   0x2 LB: > { %s125_s15 = sshll.u32 %s1565_s1, 4  ;;  %s1005_s16 = sadd.s32 4294967295, %s1330_s12   ;;  %s1330_s12 = sphi %s1356_s12, %s15_s12   ;;  %s126_s15 = int_to_ptr.hbm [resolvable:$true] %s125_s15 }
   0x3   : > { %p1007_p0 = scmp.ge.s32.totalorder %s1330_s12, 1  ;;  %p114_p1 = scmp.lt.s32.totalorder %s1330_s12, 3 }
   0x4   : > { %p1239_p2 = scmp.eq.s32.totalorder %s1005_s16, 0  ;;  %s1332_s18 = smov [#allocation2]  }
   0x5   : > { %p1367_p3 = pnand %p1007_p0, %p114_p1  ;;  %s127_s19 = sshll.u32 %s1332_s18, 4  ;;  %s128_s19 = int_to_ptr.vmem [resolvable:$true] %s127_s19 }
   0x6   : > { %s140_s22 = sshll.u32 %s1566_s2, 4  ;;  %s1333_s23 = smov [#allocation4]   ;;  %s141_s22 = int_to_ptr.hbm [resolvable:$true] %s140_s22 }
   0x7   : > { %p1232_p4 = pneg %p1367_p3  ;;  %s142_s24 = sshll.u32 %s1333_s23, 4  ;;  %s143_s24 = int_to_ptr.vmem [resolvable:$true] %s142_s24 }
   0x8   : > { %s1334_s25 = smov 64   ;;  %s1335_s26 = smov 4  }
   0x9   : > { %p1233_p5 = pnand %p1239_p2, %p1232_p4  ;;  %163 = sbr.rel (%p1367_p3) target bundleno = 308 (0x134), region = 32 }
   0xb   : > { %1235 = dma.hbm_to_vmem [thread:$0]  (!%p1233_p5), %s126_s15, 2304, %s128_s19, [#allocation3], %s1334_s25, %s1334_s25, %s1335_s26  }
   0xc   : > { %1238 = dma.hbm_to_vmem [thread:$0]  (!%p1233_p5), %s141_s22, 16, %s143_s24, [#allocation5]  }
   0xe   : > { %1321 = dma.done.wait (%p1239_p2), [#allocation3], 2304  }
   0xf   : > { %1323 = vsyncadd (%p1239_p2), [#allocation3], 4294964992 }
  0x10   : > { %1325 = dma.done.wait (%p1239_p2), [#allocation5], 16  }
  0x11   : > { %1327 = vsyncadd (%p1239_p2), [#allocation5], 4294967280  ;;  %p193_p6 = scmp.lt.s32.totalorder %s1005_s16, 1  ;;  %v1179_v0 = vld [vmem:[#allocation2 + $0x18] sm:$0xff]  ;;  %v1178_v1 = vld [vmem:[#allocation2 + $0x10] sm:$0xff]  ;;  %vm249_vm0 = vcmask 261120  }
  0x12   : > { %1217 = vmatpush.bf16.msra.mxu1 %v1179_v0  ;;  %1218 = vmatpush.bf16.msra.mxu2 %v1179_v0  ;;  %v1181_v10 = vld [vmem:[#allocation2 + $0x28] sm:$0xff]  ;;  %v1183_v11 = vld [vmem:[#allocation2 + $0x38] sm:$0xff]  ;;  %v1180_v18 = vld [vmem:[#allocation2 + $0x20] sm:$0xff] }
  0x13   : > { %s1570_s16 = smov (!%p193_p6, %s1005_s16), 1  ;;  %1219 = vmatpush.bf16.msra.mxu3 %v1179_v0  ;;  %268 = vmatpush.bf16.msra.mxu0 %v1179_v0  ;;  %v1177_v16 = vld [vmem:[#allocation2 + $0x8] sm:$0xff]  ;;  %v1182_v19 = vld [vmem:[#allocation2 + $0x30] sm:$0xff]  ;;  %v1191_v21 = vld [vmem:[#allocation2 + $0x78] sm:$0xff] }
  0x14   : > { %s1223_s27 = smul.u32 2112, %s1570_s16  ;;  %v1185_v17 = vld [vmem:[#allocation2 + $0x48] sm:$0xff]  ;;  %v1176_v22 = vld [vmem:[#allocation2] sm:$0xff]  ;;  %v1187_v24 = vld [vmem:[#allocation2 + $0x58] sm:$0xff]  ;;  %s1175_s4 = sshll.u32 %s1570_s16, 5 }
  0x15   : > { %v1189_v20 = vld [vmem:[#allocation2 + $0x68] sm:$0xff]  ;;  %v1184_v23 = vld [vmem:[#allocation2 + $0x40] sm:$0xff]  ;;  %v1190_v39 = vld [vmem:[#allocation2 + $0x70] sm:$0xff]  ;;  %s1536_s7 = scalar_lea.vmem %s1567_s3, %s1175_s4 }
  0x16   : > { %s1389_s30 = scalar_lea.vmem %s1564_s0, %s1223_s27  ;;  %1220 = vmatpush.bf16.msra.mxu1 %v1178_v1  ;;  %1221 = vmatpush.bf16.msra.mxu2 %v1178_v1  ;;  %v1193_v25 = vld [vmem:[#allocation2 + $0x88] sm:$0xff]  ;;  %v1188_v38 = vld [vmem:[#allocation2 + $0x60] sm:$0xff]  ;;  %v1186_v40 = vld [vmem:[#allocation2 + $0x50] sm:$0xff] }
  0x17   : > { %v222_v2 = vld [vmem:[%s1389_s30 + $0x72] sm:$0xff]  ;;  %v223_v3 = vld [vmem:[%s1389_s30 + $0xa2] sm:$0xff]  ;;  %1222 = vmatpush.bf16.msra.mxu3 %v1178_v1  ;;  %269 = vmatpush.bf16.msra.mxu0 %v1178_v1 }
  0x18   : > { %v224_v4 = vld [vmem:[%s1389_s30 + $0xd2] sm:$0xff]  ;;  %v225_v5 = vld [vmem:[%s1389_s30 + $0x102] sm:$0xff]  ;;  %v229_v12 = vpack.c.bf16 %v223_v3, %v222_v2 }
  0x19   : > { %v226_v6 = vld [vmem:[%s1389_s30 + $0x132] sm:$0xff]  ;;  %v227_v7 = vld [vmem:[%s1389_s30 + $0x162] sm:$0xff]  ;;  %v230_v13 = vpack.c.bf16 %v225_v5, %v224_v4 }
  0x1a   : > { %v220_v8 = vld [vmem:[%s1389_s30 + $0x12] sm:$0xff]  ;;  %v221_v9 = vld [vmem:[%s1389_s30 + $0x42] sm:$0xff]  ;;  %v231_v14 = vpack.c.bf16 %v227_v7, %v226_v6  ;;  %391 = vmatpush.bf16.msrb.mxu2 %v1181_v10  ;;  %1026 = vmatmul.msk.bf16.vlgmr.msra.gmra.mxu1 %vm249_vm0, %v229_v12 }
  0x1b   : > { %v228_v15 = vpack.c.bf16 %v221_v9, %v220_v8  ;;  %470 = vmatpush.bf16.msrb.mxu3 %v1183_v11  ;;  %1027 = vmatmul.msk.bf16.vlgmr.msra.gmra.mxu2 %vm249_vm0, %v230_v13  ;;  %v204_v26 = vld [vmem:[%s1389_s30] sm:$0xff]  ;;  %v205_v27 = vld [vmem:[%s1389_s30 + $0x30] sm:$0xff] }
  0x1c   : > { %1028 = vmatmul.msk.bf16.vlgmr.msra.gmra.mxu3 %vm249_vm0, %v231_v14  ;;  %321 = vmatpush.bf16.msrb.mxu1 %v1177_v16  ;;  %v344_v28 = vld [vmem:[%s1389_s30 + $0x24] sm:$0xff]  ;;  %v345_v29 = vld [vmem:[%s1389_s30 + $0x54] sm:$0xff]  ;;  %v212_v34 = vpack.c.bf16 %v205_v27, %v204_v26 }
  0x1d   : > { %1025 = vmatmul.msk.bf16.vlgmr.msra.gmra.mxu0 %vm249_vm0, %v228_v15  ;;  %v1053_v30 = vld [vmem:[%s1389_s30 + $0x360] sm:$0xff]  ;;  %v1054_v31 = vld [vmem:[%s1389_s30 + $0x390] sm:$0xff]  ;;  %v352_v35 = vpack.c.bf16 %v345_v29, %v344_v28 }
  0x1e   : > { %548 = vmatpush.bf16.msrb.mxu0 %v1185_v17  ;;  %392 = vmatpush.bf16.msrb.mxu2 %v1180_v18  ;;  %v1073_v32 = vld [vmem:[%s1389_s30 + $0x372] sm:$0xff]  ;;  %v1074_v33 = vld [vmem:[%s1389_s30 + $0x3a2] sm:$0xff]  ;;  %v431_v36 = vpack.c.bf16 %v1054_v31, %v1053_v30 }
  0x1f   : > { %471 = vmatpush.bf16.msrb.mxu3 %v1182_v19  ;;  %v509_v37 = vpack.c.bf16 %v1074_v33, %v1073_v32  ;;  %v1192_v41 = vld [vmem:[#allocation2 + $0x80] sm:$0xff]  ;;  %v207_v43 = vld [vmem:[%s1389_s30 + $0x90] sm:$0xff] }
  0x20   : > { %322 = vmatpush.bf16.msrb.mxu1 %v1176_v22  ;;  %v206_v42 = vld [vmem:[%s1389_s30 + $0x60] sm:$0xff]  ;;  %v347_v45 = vld [vmem:[%s1389_s30 + $0xb4] sm:$0xff] }
  0x21   : > { %v346_v44 = vld [vmem:[%s1389_s30 + $0x84] sm:$0xff]  ;;  %v1056_v47 = vld [vmem:[%s1389_s30 + $0x3f0] sm:$0xff]  ;;  %v213_v50 = vpack.c.bf16 %v207_v43, %v206_v42 }
  0x22   : > { %705 = vmatpush.bf16.msra.mxu2 %v1189_v20  ;;  %549 = vmatpush.bf16.msrb.mxu0 %v1184_v23  ;;  %v1055_v46 = vld [vmem:[%s1389_s30 + $0x3c0] sm:$0xff]  ;;  %v1075_v48 = vld [vmem:[%s1389_s30 + $0x3d2] sm:$0xff]  ;;  %v353_v51 = vpack.c.bf16 %v347_v45, %v346_v44 }
  0x23   : > { %783 = vmatpush.bf16.msra.mxu3 %v1191_v21  ;;  %v1076_v49 = vld [vmem:[%s1389_s30 + $0x402] sm:$0xff]  ;;  %v432_v52 = vpack.c.bf16 %v1056_v47, %v1055_v46  ;;  %v209_v55 = vld [vmem:[%s1389_s30 + $0xf0] sm:$0xff] }
  0x24   : > { %626 = vmatpush.bf16.msra.mxu1 %v1187_v24  ;;  %v510_v53 = vpack.c.bf16 %v1076_v49, %v1075_v48  ;;  %v208_v54 = vld [vmem:[%s1389_s30 + $0xc0] sm:$0xff]  ;;  %v349_v57 = vld [vmem:[%s1389_s30 + $0x114] sm:$0xff] }
  0x25   : > { %v348_v56 = vld [vmem:[%s1389_s30 + $0xe4] sm:$0xff]  ;;  %v1058_v59 = vld [vmem:[%s1389_s30 + $0x450] sm:$0xff]  ;;  %v214_v62 = vpack.c.bf16 %v209_v55, %v208_v54 }
  0x26   : > { %861 = vmatpush.bf16.msra.mxu0 %v1193_v25  ;;  %706 = vmatpush.bf16.msra.mxu2 %v1188_v38  ;;  %v1057_v58 = vld [vmem:[%s1389_s30 + $0x420] sm:$0xff]  ;;  %v1077_v60 = vld [vmem:[%s1389_s30 + $0x432] sm:$0xff]  ;;  %v354_v63 = vpack.c.bf16 %v349_v57, %v348_v56 }
  0x27   : > { %784 = vmatpush.bf16.msra.mxu3 %v1190_v39  ;;  %v1078_v61 = vld [vmem:[%s1389_s30 + $0x462] sm:$0xff]  ;;  %v433_v0 = vpack.c.bf16 %v1058_v59, %v1057_v58  ;;  %v211_v3 = vld [vmem:[%s1389_s30 + $0x150] sm:$0xff] }
  0x28   : > { %627 = vmatpush.bf16.msra.mxu1 %v1186_v40  ;;  %v511_v1 = vpack.c.bf16 %v1078_v61, %v1077_v60  ;;  %v210_v2 = vld [vmem:[%s1389_s30 + $0x120] sm:$0xff]  ;;  %v351_v5 = vld [vmem:[%s1389_s30 + $0x174] sm:$0xff] }
  0x29   : > { %v350_v4 = vld [vmem:[%s1389_s30 + $0x144] sm:$0xff]  ;;  %v1060_v7 = vld [vmem:[%s1389_s30 + $0x4b0] sm:$0xff]  ;;  %v215_v10 = vpack.c.bf16 %v211_v3, %v210_v2 }
  0x2a   : > { %1037 = vmatmul.msk.bf16.vlgmr.msrb.gmra.mxu1 %vm249_vm0, %v212_v34  ;;  %862 = vmatpush.bf16.msra.mxu0 %v1192_v41  ;;  %v1059_v6 = vld [vmem:[%s1389_s30 + $0x480] sm:$0xff]  ;;  %v1079_v8 = vld [vmem:[%s1389_s30 + $0x492] sm:$0xff]  ;;  %v355_v11 = vpack.c.bf16 %v351_v5, %v350_v4 }
  0x2b   : > { %1049 = vmatmul.msk.bf16.vlgmr.msrb.gmra.mxu2 %vm249_vm0, %v352_v35  ;;  %v1080_v9 = vld [vmem:[%s1389_s30 + $0x4c2] sm:$0xff]  ;;  %v434_v12 = vpack.c.bf16 %v1060_v7, %v1059_v6  ;;  %v1094_v15 = vld [vmem:[%s1389_s30 + $0x3b4] sm:$0xff] }
  0x2c   : > { %1069 = vmatmul.msk.bf16.vlgmr.msrb.gmra.mxu3 %vm249_vm0, %v431_v36  ;;  %v512_v13 = vpack.c.bf16 %v1080_v9, %v1079_v8  ;;  %v1093_v14 = vld [vmem:[%s1389_s30 + $0x384] sm:$0xff]  ;;  %v1114_v17 = vld [vmem:[%s1389_s30 + $0x6f0] sm:$0xff] }
  0x2d   : > { %1089 = vmatmul.msk.bf16.vlgmr.msrb.gmra.mxu0 %vm249_vm0, %v509_v37  ;;  %v1113_v16 = vld [vmem:[%s1389_s30 + $0x6c0] sm:$0xff]  ;;  %v1133_v18 = vld [vmem:[%s1389_s30 + $0x6d2] sm:$0xff]  ;;  %v587_v22 = vpack.c.bf16 %v1094_v15, %v1093_v14 }
  0x2e   : > { %v1134_v19 = vld [vmem:[%s1389_s30 + $0x702] sm:$0xff]  ;;  %v1154_v21 = vld [vmem:[%s1389_s30 + $0x714] sm:$0xff]  ;;  %v666_v23 = vpack.c.bf16 %v1114_v17, %v1113_v16 }
  0x2f   : > { %v1153_v20 = vld [vmem:[%s1389_s30 + $0x6e4] sm:$0xff]  ;;  %v744_v24 = vpack.c.bf16 %v1134_v19, %v1133_v18  ;;  %v1096_v27 = vld [vmem:[%s1389_s30 + $0x414] sm:$0xff] }
  0x30   : > { %v822_v25 = vpack.c.bf16 %v1154_v21, %v1153_v20  ;;  %v1095_v26 = vld [vmem:[%s1389_s30 + $0x3e4] sm:$0xff]  ;;  %v1116_v29 = vld [vmem:[%s1389_s30 + $0x750] sm:$0xff] }
  0x31   : > { %v1115_v28 = vld [vmem:[%s1389_s30 + $0x720] sm:$0xff]  ;;  %v1135_v30 = vld [vmem:[%s1389_s30 + $0x732] sm:$0xff]  ;;  %v588_v34 = vpack.c.bf16 %v1096_v27, %v1095_v26 }
  0x32   : > { %v1136_v31 = vld [vmem:[%s1389_s30 + $0x762] sm:$0xff]  ;;  %v1156_v33 = vld [vmem:[%s1389_s30 + $0x774] sm:$0xff]  ;;  %v667_v35 = vpack.c.bf16 %v1116_v29, %v1115_v28 }
  0x33   : > { %v1155_v32 = vld [vmem:[%s1389_s30 + $0x744] sm:$0xff]  ;;  %v745_v36 = vpack.c.bf16 %v1136_v31, %v1135_v30  ;;  %v1098_v39 = vld [vmem:[%s1389_s30 + $0x474] sm:$0xff] }
  0x34   : > { %v823_v37 = vpack.c.bf16 %v1156_v33, %v1155_v32  ;;  %v1097_v38 = vld [vmem:[%s1389_s30 + $0x444] sm:$0xff]  ;;  %v1118_v41 = vld [vmem:[%s1389_s30 + $0x7b0] sm:$0xff] }
  0x35   : > { %v1117_v40 = vld [vmem:[%s1389_s30 + $0x780] sm:$0xff]  ;;  %v1137_v42 = vld [vmem:[%s1389_s30 + $0x792] sm:$0xff]  ;;  %v589_v46 = vpack.c.bf16 %v1098_v39, %v1097_v38 }
  0x36   : > { %v1138_v43 = vld [vmem:[%s1389_s30 + $0x7c2] sm:$0xff]  ;;  %v1158_v45 = vld [vmem:[%s1389_s30 + $0x7d4] sm:$0xff]  ;;  %v668_v47 = vpack.c.bf16 %v1118_v41, %v1117_v40 }
  0x37   : > { %v1157_v44 = vld [vmem:[%s1389_s30 + $0x7a4] sm:$0xff]  ;;  %v746_v48 = vpack.c.bf16 %v1138_v43, %v1137_v42  ;;  %v1139_v54 = vld [vmem:[%s1389_s30 + $0x7f2] sm:$0xff] }
  0x38   : > { %v824_v49 = vpack.c.bf16 %v1158_v45, %v1157_v44  ;;  %v1140_v55 = vld [vmem:[%s1389_s30 + $0x822] sm:$0xff]  ;;  %v1160_v57 = vld [vmem:[%s1389_s30 + $0x834] sm:$0xff] }
  0x39   : > { %v1159_v56 = vld [vmem:[%s1389_s30 + $0x804] sm:$0xff]  ;;  %v747_v61 = vpack.c.bf16 %v1140_v55, %v1139_v54 }
  0x3a   : > { %1038 = vmatmul.msk.bf16.gmra.mxu1 %vm249_vm0, %v213_v50  ;;  %v1099_v50 = vld [vmem:[%s1389_s30 + $0x4a4] sm:$0xff] }
  0x3b   : > { %1050 = vmatmul.msk.bf16.gmra.mxu2 %vm249_vm0, %v353_v51  ;;  %v1100_v51 = vld [vmem:[%s1389_s30 + $0x4d4] sm:$0xff] }
  0x3c   : > { %1070 = vmatmul.msk.bf16.gmra.mxu3 %vm249_vm0, %v432_v52  ;;  %v1119_v52 = vld [vmem:[%s1389_s30 + $0x7e0] sm:$0xff]  ;;  %v590_v58 = vpack.c.bf16 %v1100_v51, %v1099_v50 }
  0x3d   : > { %1090 = vmatmul.msk.bf16.gmra.mxu0 %vm249_vm0, %v510_v53  ;;  %v1120_v53 = vld [vmem:[%s1389_s30 + $0x810] sm:$0xff] }
  0x3e   : > { %v669_v59 = vpack.c.bf16 %v1120_v53, %v1119_v52 }
  0x4a   : > { %1039 = vmatmul.msk.bf16.gmra.mxu1 %vm249_vm0, %v214_v62  ;;  %v825_v62 = vpack.c.bf16 %v1160_v57, %v1159_v56 }
  0x4b   : > { %1051 = vmatmul.msk.bf16.gmra.mxu2 %vm249_vm0, %v354_v63 }
  0x4c   : > { %1071 = vmatmul.msk.bf16.gmra.mxu3 %vm249_vm0, %v433_v0 }
  0x4d   : > { %1091 = vmatmul.msk.bf16.gmra.mxu0 %vm249_vm0, %v511_v1 }
  0x5a   : > { %1040 = vmatmul.msk.bf16.gmra.mxu1 %vm249_vm0, %v215_v10 }
  0x5b   : > { %1052 = vmatmul.msk.bf16.gmra.mxu2 %vm249_vm0, %v355_v11 }
  0x5c   : > { %1072 = vmatmul.msk.bf16.gmra.mxu3 %vm249_vm0, %v434_v12 }
  0x5d   : > { %1092 = vmatmul.msk.bf16.gmra.mxu0 %vm249_vm0, %v512_v13 }
  0x6a   : > { %1109 = vmatmul.msk.bf16.vlgmr.msra.gmra.mxu1 %vm249_vm0, %v587_v22 }
  0x6b   : > { %1129 = vmatmul.msk.bf16.vlgmr.msra.gmra.mxu2 %vm249_vm0, %v666_v23 }
  0x6c   : > { %1149 = vmatmul.msk.bf16.vlgmr.msra.gmra.mxu3 %vm249_vm0, %v744_v24 }
  0x6d   : > { %1169 = vmatmul.msk.bf16.vlgmr.msra.gmra.mxu0 %vm249_vm0, %v822_v25 }
  0x7a   : > { %1110 = vmatmul.msk.bf16.gmra.mxu1 %vm249_vm0, %v588_v34 }
  0x7b   : > { %1130 = vmatmul.msk.bf16.gmra.mxu2 %vm249_vm0, %v667_v35 }
  0x7c   : > { %1150 = vmatmul.msk.bf16.gmra.mxu3 %vm249_vm0, %v745_v36 }
  0x7d   : > { %1170 = vmatmul.msk.bf16.gmra.mxu0 %vm249_vm0, %v823_v37 }
  0x8a   : > { %1111 = vmatmul.msk.bf16.gmra.mxu1 %vm249_vm0, %v589_v46 }
  0x8b   : > { %1131 = vmatmul.msk.bf16.gmra.mxu2 %vm249_vm0, %v668_v47 }
  0x8c   : > { %1151 = vmatmul.msk.bf16.gmra.mxu3 %vm249_vm0, %v746_v48 }
  0x8d   : > { %1171 = vmatmul.msk.bf16.gmra.mxu0 %vm249_vm0, %v824_v49 }
  0x97   : > { %v276_v60 = vpop.f32.mrf.mxu1 }
  0x9a   : > { %v271_v63 = vpop.f32.mrf.mxu0  ;;  %1112 = vmatmul.msk.bf16.gmra.mxu1 %vm249_vm0, %v590_v58 }
  0x9b   : > { %1132 = vmatmul.msk.bf16.gmra.mxu2 %vm249_vm0, %v669_v59 }
  0x9c   : > { %1152 = vmatmul.msk.bf16.gmra.mxu3 %vm249_vm0, %v747_v61 }
  0x9d   : > { %1172 = vmatmul.msk.bf16.gmra.mxu0 %vm249_vm0, %v825_v62 }
  0x9e   : > { %v281_v0 = vpop.f32.mrf.mxu2 }
  0x9f   : > { %v286_v1 = vpop.f32.mrf.mxu3  ;;  %v1499_v2 = vpop.f32.mrf.mxu1 }
  0xa2   : > { %v273_v3 = vpop.f32.mrf.mxu0 }
  0xa6   : > { %v1501_v4 = vpop.f32.mrf.mxu2 }
  0xa7   : > { %v1503_v5 = vpop.f32.mrf.mxu3  ;;  %v324_v6 = vpop.f32.mrf.mxu1 }
  0xa8   : > { %v325_v7 = vadd.f32 %v324_v6, %v271_v63 }
  0xaa   : > { %v551_v8 = vpop.f32.mrf.mxu0 }
  0xae   : > { %v394_v9 = vpop.f32.mrf.mxu2 }
  0xaf   : > { %v414_v10 = vadd.f32 %v394_v9, %v325_v7  ;;  %v473_v11 = vpop.f32.mrf.mxu3  ;;  %v326_v12 = vpop.f32.mrf.mxu1 }
  0xb0   : > { %v327_v55 = vadd.f32 %v326_v12, %v273_v3 }
  0xb1   : > { %v493_v13 = vadd.f32 %v473_v11, %v414_v10  ;;  %v1527_v10 = vld [vmem:[#allocation4] ss:$0 sm:$0xff] }
  0xb2   : > { %v553_v14 = vpop.f32.mrf.mxu0 }
  0xb3   : > { %v571_v15 = vadd.f32 %v551_v8, %v493_v13 }
  0xb6   : > { %v396_v16 = vpop.f32.mrf.mxu2 }
  0xb7   : > { %v475_v17 = vpop.f32.mrf.mxu3  ;;  %v329_v18 = vpop.f32.mrf.mxu1  ;;  %v415_v57 = vadd.f32 %v396_v16, %v327_v55 }
  0xb8   : > { %v330_v19 = vadd.f32 %v329_v18, %v276_v60 }
  0xb9   : > { %v494_v60 = vadd.f32 %v475_v17, %v415_v57 }
  0xba   : > { %v556_v20 = vpop.f32.mrf.mxu0 }
  0xbb   : > { %v572_v6 = vadd.f32 %v553_v14, %v494_v60 }
  0xbe   : > { %v399_v21 = vpop.f32.mrf.mxu2 }
  0xbf   : > { %v416_v22 = vadd.f32 %v399_v21, %v330_v19  ;;  %v478_v23 = vpop.f32.mrf.mxu3  ;;  %v331_v24 = vpop.f32.mrf.mxu1 }
  0xc0   : > { %v332_v12 = vadd.f32 %v331_v24, %v1499_v2 }
  0xc1   : > { %v495_v25 = vadd.f32 %v478_v23, %v416_v22 }
  0xc2   : > { %v1505_v26 = vpop.f32.mrf.mxu0 }
  0xc3   : > { %v573_v27 = vadd.f32 %v556_v20, %v495_v25 }
  0xc6   : > { %v401_v28 = vpop.f32.mrf.mxu2 }
  0xc7   : > { %v480_v29 = vpop.f32.mrf.mxu3  ;;  %v334_v30 = vpop.f32.mrf.mxu1  ;;  %v417_v17 = vadd.f32 %v401_v28, %v332_v12 }
  0xc8   : > { %v335_v31 = vadd.f32 %v334_v30, %v281_v0 }
  0xc9   : > { %v496_v22 = vadd.f32 %v480_v29, %v417_v17 }
  0xca   : > { %v561_v32 = vpop.f32.mrf.mxu0 }
  0xce   : > { %v404_v33 = vpop.f32.mrf.mxu2 }
  0xcf   : > { %v418_v34 = vadd.f32 %v404_v33, %v335_v31  ;;  %v483_v35 = vpop.f32.mrf.mxu3  ;;  %v1507_v36 = vpop.f32.mrf.mxu1  ;;  %v574_v33 = vadd.f32 %v1505_v26, %v496_v22 }
  0xd1   : > { %v497_v37 = vadd.f32 %v483_v35, %v418_v34 }
  0xd2   : > { %v1509_v38 = vpop.f32.mrf.mxu0 }
  0xd3   : > { %v1511_v39 = vadd.f32 %v561_v32, %v497_v37 }
  0xd6   : > { %v1513_v40 = vpop.f32.mrf.mxu2 }
  0xd7   : > { %v1515_v41 = vpop.f32.mrf.mxu3  ;;  %v339_v42 = vpop.f32.mrf.mxu1 }
  0xd8   : > { %v340_v43 = vadd.f32 %v339_v42, %v286_v1 }
  0xda   : > { %v566_v44 = vpop.f32.mrf.mxu0 }
  0xde   : > { %v409_v45 = vpop.f32.mrf.mxu2 }
  0xdf   : > { %v420_v46 = vadd.f32 %v409_v45, %v340_v43  ;;  %v488_v47 = vpop.f32.mrf.mxu3  ;;  %v1517_v48 = vpop.f32.mrf.mxu1  ;;  %v337_v43 = vadd.f32 %v1507_v36, %v1501_v4 }
  0xe1   : > { %v499_v49 = vadd.f32 %v488_v47, %v420_v46  ;;  %v419_v45 = vadd.f32 %v1513_v40, %v337_v43 }
  0xe2   : > { %v1519_v50 = vpop.f32.mrf.mxu0 }
  0xe3   : > { %v1521_v51 = vadd.f32 %v566_v44, %v499_v49 }
  0xe6   : > { %v1523_v52 = vpop.f32.mrf.mxu2 }
  0xe7   : > { %v1525_v53 = vpop.f32.mrf.mxu3  ;;  %v629_v54 = vpop.f32.mrf.mxu1 }
  0xe8   : > { %v649_v58 = vadd.f32 %v629_v54, %v571_v15 }
  0xea   : > { %v864_v56 = vpop.f32.mrf.mxu0 }
  0xee   : > { %v708_v59 = vpop.f32.mrf.mxu2 }
  0xef   : > { %v728_v61 = vadd.f32 %v708_v59, %v649_v58  ;;  %v786_v62 = vpop.f32.mrf.mxu3  ;;  %v631_v63 = vpop.f32.mrf.mxu1 }
  0xf0   : > { %v650_v7 = vadd.f32 %v631_v63, %v572_v6 }
  0xf1   : > { %v806_v1 = vadd.f32 %v786_v62, %v728_v61 }
  0xf2   : > { %v866_v0 = vpop.f32.mrf.mxu0 }
  0xf3   : > { %v884_v9 = vadd.f32 %v864_v56, %v806_v1  ;;  %v498_v56 = vadd.f32 %v1515_v41, %v419_v45  ;;  %v342_v41 = vadd.f32 %v1517_v48, %v1503_v5 }
  0xf5   : > { %v896_v18 = vadd.f32 %v1527_v10, %v884_v9  ;;  %v576_v40 = vadd.f32 %v1509_v38, %v498_v56  ;;  %v421_v9 = vadd.f32 %v1523_v52, %v342_v41 }
  0xf6   : > { %v710_v8 = vpop.f32.mrf.mxu2 }
  0xf7   : > { %v729_v11 = vadd.f32 %v710_v8, %v650_v7  ;;  %v788_v13 = vpop.f32.mrf.mxu3  ;;  %v634_v3 = vpop.f32.mrf.mxu1  ;;  %v904_v23 = vmax.f32 %v896_v18, 0.0 }
  0xf8   : > { %v651_v14 = vadd.f32 %v634_v3, %v573_v27 }
  0xf9   : > { %v807_v15 = vadd.f32 %v788_v13, %v729_v11 }
  0xfa   : > { %v869_v16 = vpop.f32.mrf.mxu0 }
  0xfb   : > { %v885_v19 = vadd.f32 %v866_v0, %v807_v15  ;;  %v500_v15 = vadd.f32 %v1525_v53, %v421_v9 }
  0xfd   : > { %v897_v20 = vadd.f32 %v1527_v10, %v885_v19 }
  0xfe   : > { %v713_v21 = vpop.f32.mrf.mxu2 }
  0xff   : > { %v905_v25 = vmax.f32 %v897_v20, 0.0  ;;  %v730_v30 = vadd.f32 %v713_v21, %v651_v14  ;;  %v791_v31 = vpop.f32.mrf.mxu3  ;;  %v636_v2 = vpop.f32.mrf.mxu1  ;;  %v578_v14 = vadd.f32 %v1519_v50, %v500_v15 }
 0x100   : > { %v652_v27 = vadd.f32 %v636_v2, %v574_v33 }
 0x101   : > { %v1197_v24 = vpack.c.bf16 %v905_v25, %v904_v23  ;;  %v808_v32 = vadd.f32 %v791_v31, %v730_v30 }
 0x102   : > { %v871_v28 = vpop.f32.mrf.mxu0 }
 0x103   : > { %1198 = vst [vmem:[%s1536_s7] sm:$0xff] %v1197_v24   ;;  %v886_v29 = vadd.f32 %v869_v16, %v808_v32 }
 0x105   : > { %v898_v46 = vadd.f32 %v1527_v10, %v886_v29 }
 0x106   : > { %v715_v34 = vpop.f32.mrf.mxu2 }
 0x107   : > { %v731_v35 = vadd.f32 %v715_v34, %v652_v27  ;;  %v793_v37 = vpop.f32.mrf.mxu3  ;;  %v639_v42 = vpop.f32.mrf.mxu1  ;;  %v906_v57 = vmax.f32 %v898_v46, 0.0 }
 0x108   : > { %v653_v26 = vadd.f32 %v639_v42, %v1511_v39 }
 0x109   : > { %v809_v44 = vadd.f32 %v793_v37, %v731_v35 }
 0x10a   : > { %v874_v49 = vpop.f32.mrf.mxu0 }
 0x10b   : > { %v887_v47 = vadd.f32 %v871_v28, %v809_v44 }
 0x10d   : > { %v899_v54 = vadd.f32 %v1527_v10, %v887_v47 }
 0x10e   : > { %v718_v55 = vpop.f32.mrf.mxu2 }
 0x10f   : > { %v907_v58 = vmax.f32 %v899_v54, 0.0  ;;  %v732_v59 = vadd.f32 %v718_v55, %v653_v26  ;;  %v796_v60 = vpop.f32.mrf.mxu3  ;;  %v641_v4 = vpop.f32.mrf.mxu1 }
 0x110   : > { %v654_v62 = vadd.f32 %v641_v4, %v576_v40 }
 0x111   : > { %v1202_v36 = vpack.c.bf16 %v907_v58, %v906_v57  ;;  %v810_v61 = vadd.f32 %v796_v60, %v732_v59 }
 0x112   : > { %v876_v63 = vpop.f32.mrf.mxu0 }
 0x113   : > { %1214 = vst [vmem:[%s1536_s7 + $0x8] sm:$0xff] %v1202_v36   ;;  %v888_v1 = vadd.f32 %v874_v49, %v810_v61 }
 0x115   : > { %v900_v11 = vadd.f32 %v1527_v10, %v888_v1 }
 0x116   : > { %v720_v0 = vpop.f32.mrf.mxu2 }
 0x117   : > { %v733_v6 = vadd.f32 %v720_v0, %v654_v62  ;;  %v798_v7 = vpop.f32.mrf.mxu3  ;;  %v644_v39 = vpop.f32.mrf.mxu1  ;;  %v908_v16 = vmax.f32 %v900_v11, 0.0 }
 0x118   : > { %v655_v38 = vadd.f32 %v644_v39, %v1521_v51 }
 0x119   : > { %v811_v8 = vadd.f32 %v798_v7, %v733_v6 }
 0x11a   : > { %v879_v20 = vpop.f32.mrf.mxu0 }
 0x11b   : > { %v889_v13 = vadd.f32 %v876_v63, %v811_v8 }
 0x11d   : > { %v901_v3 = vadd.f32 %v1527_v10, %v889_v13 }
 0x11e   : > { %v723_v12 = vpop.f32.mrf.mxu2 }
 0x11f   : > { %v909_v17 = vmax.f32 %v901_v3, 0.0  ;;  %v734_v18 = vadd.f32 %v723_v12, %v655_v38  ;;  %v801_v19 = vpop.f32.mrf.mxu3  ;;  %v646_v48 = vpop.f32.mrf.mxu1 }
 0x120   : > { %v656_v21 = vadd.f32 %v646_v48, %v578_v14 }
 0x121   : > { %v1207_v5 = vpack.c.bf16 %v909_v17, %v908_v16  ;;  %v812_v52 = vadd.f32 %v801_v19, %v734_v18 }
 0x122   : > { %v881_v31 = vpop.f32.mrf.mxu0 }
 0x123   : > { %1215 = vst [vmem:[%s1536_s7 + $0x10] sm:$0xff] %v1207_v5   ;;  %v890_v23 = vadd.f32 %v879_v20, %v812_v52 }
 0x125   : > { %v902_v53 = vadd.f32 %v1527_v10, %v890_v23 }
 0x126   : > { %v725_v22 = vpop.f32.mrf.mxu2 }
 0x127   : > { %v735_v25 = vadd.f32 %v725_v22, %v656_v21  ;;  %v803_v51 = vpop.f32.mrf.mxu3  ;;  %v910_v28 = vmax.f32 %v902_v53, 0.0 }
 0x129   : > { %v813_v30 = vadd.f32 %v803_v51, %v735_v25 }
 0x12b   : > { %v891_v2 = vadd.f32 %v881_v31, %v813_v30 }
 0x12d   : > { %v903_v24 = vadd.f32 %v1527_v10, %v891_v2 }
 0x12f   : > { %v911_v32 = vmax.f32 %v903_v24, 0.0 }
 0x131   : > { %v1212_v33 = vpack.c.bf16 %v911_v32, %v910_v28 }
 0x133   : > { %1216 = vst [vmem:[%s1536_s7 + $0x18] sm:$0xff] %v1212_v33  }
 0x134 PF: > { %s15_s12 = sadd.s32 1, %s1330_s12  }
 0x135   : > { %p12_p7 = scmp.ge.s32.totalorder %s15_s12, 4  }
 0x137   :  { %14 = sbr.rel (!%p12_p7) target bundleno = 2 (0x2), region = 81 }
 0x13c   :  { %949 = vsyncpa [#allocation3], 1 }
 0x13d   :  { %951 = vsyncpa [#allocation3 + $0x1], 1 }
 0x13e   :  { %952 = vsyncpa [#allocation5], 1 }

// kernel: deeplabv3plus_forward.10
= control target key start
LH: loop header
LB: loop body
LE: loop exit
PB: predicated region body
PF: predicated region fallthrough
CT: control target
= control target key end

     0   :  { %8 = vsyncpa [#allocation3], 0  ;;  %s1577_s0 = inlined_call_operand.vmem [shape: f32[2,44,44,32], index: 0, kind: input, shape index: {}]   ;;  %s1578_s1 = inlined_call_operand.hbm [shape: bf16[9,32,128], index: 1, kind: input, shape index: {}]   ;;  %s1579_s2 = inlined_call_operand.hbm [shape: f32[1,128], index: 2, kind: input, shape index: {}]   ;;  %s1580_s3 = inlined_call_operand.vmem [shape: bf16[2,64,128], index: 3, kind: output, shape index: {}]  }
   0x1   :  { %9 = vsyncpa [#allocation5], 0  ;;  %s1381_s12 = smov 0  }
   0x2 LB: > { %s125_s15 = sshll.u32 %s1578_s1, 4  ;;  %s1006_s16 = sadd.s32 4294967295, %s1355_s12   ;;  %s1355_s12 = sphi %s1381_s12, %s15_s12   ;;  %s126_s15 = int_to_ptr.hbm [resolvable:$true] %s125_s15 }
   0x3   : > { %p1008_p0 = scmp.ge.s32.totalorder %s1355_s12, 1  ;;  %p114_p1 = scmp.lt.s32.totalorder %s1355_s12, 3 }
   0x4   : > { %p1264_p2 = scmp.eq.s32.totalorder %s1006_s16, 0  ;;  %s1357_s18 = smov [#allocation2]  }
   0x5   : > { %p1392_p3 = pnand %p1008_p0, %p114_p1  ;;  %s127_s19 = sshll.u32 %s1357_s18, 4  ;;  %s128_s19 = int_to_ptr.vmem [resolvable:$true] %s127_s19 }
   0x6   : > { %s140_s22 = sshll.u32 %s1579_s2, 4  ;;  %s1358_s23 = smov [#allocation4]   ;;  %s141_s22 = int_to_ptr.hbm [resolvable:$true] %s140_s22 }
   0x7   : > { %p1257_p4 = pneg %p1392_p3  ;;  %s142_s24 = sshll.u32 %s1358_s23, 4  ;;  %s143_s24 = int_to_ptr.vmem [resolvable:$true] %s142_s24 }
   0x8   : > { %s1359_s25 = smov 64   ;;  %s1360_s26 = smov 4  }
   0x9   : > { %p1258_p5 = pnand %p1264_p2, %p1257_p4  ;;  %163 = sbr.rel (%p1392_p3) target bundleno = 308 (0x134), region = 32 }
   0xb   : > { %1260 = dma.hbm_to_vmem [thread:$0]  (!%p1258_p5), %s126_s15, 2304, %s128_s19, [#allocation3], %s1359_s25, %s1359_s25, %s1360_s26  }
   0xc   : > { %1263 = dma.hbm_to_vmem [thread:$0]  (!%p1258_p5), %s141_s22, 16, %s143_s24, [#allocation5]  }
   0xe   : > { %1346 = dma.done.wait (%p1264_p2), [#allocation3], 2304  }
   0xf   : > { %1348 = vsyncadd (%p1264_p2), [#allocation3], 4294964992 }
  0x10   : > { %1350 = dma.done.wait (%p1264_p2), [#allocation5], 16  }
  0x11   : > { %1352 = vsyncadd (%p1264_p2), [#allocation5], 4294967280  ;;  %p193_p6 = scmp.lt.s32.totalorder %s1006_s16, 1  ;;  %v1204_v0 = vld [vmem:[#allocation2 + $0x18] sm:$0xff]  ;;  %v1203_v1 = vld [vmem:[#allocation2 + $0x10] sm:$0xff]  ;;  %vm250_vm0 = vcmask 261120  }
  0x12   : > { %1242 = vmatpush.bf16.msra.mxu1 %v1204_v0  ;;  %1243 = vmatpush.bf16.msra.mxu2 %v1204_v0  ;;  %v1206_v10 = vld [vmem:[#allocation2 + $0x28] sm:$0xff]  ;;  %v1208_v11 = vld [vmem:[#allocation2 + $0x38] sm:$0xff]  ;;  %v1205_v18 = vld [vmem:[#allocation2 + $0x20] sm:$0xff] }
  0x13   : > { %s1583_s16 = smov (!%p193_p6, %s1006_s16), 1  ;;  %1244 = vmatpush.bf16.msra.mxu3 %v1204_v0  ;;  %269 = vmatpush.bf16.msra.mxu0 %v1204_v0  ;;  %v1202_v16 = vld [vmem:[#allocation2 + $0x8] sm:$0xff]  ;;  %v1207_v19 = vld [vmem:[#allocation2 + $0x30] sm:$0xff]  ;;  %v1216_v21 = vld [vmem:[#allocation2 + $0x78] sm:$0xff] }
  0x14   : > { %s1248_s27 = smul.u32 2112, %s1583_s16  ;;  %v1210_v17 = vld [vmem:[#allocation2 + $0x48] sm:$0xff]  ;;  %v1201_v22 = vld [vmem:[#allocation2] sm:$0xff]  ;;  %v1212_v24 = vld [vmem:[#allocation2 + $0x58] sm:$0xff]  ;;  %s1200_s4 = sshll.u32 %s1583_s16, 5 }
  0x15   : > { %v1214_v20 = vld [vmem:[#allocation2 + $0x68] sm:$0xff]  ;;  %v1209_v23 = vld [vmem:[#allocation2 + $0x40] sm:$0xff]  ;;  %v1215_v36 = vld [vmem:[#allocation2 + $0x70] sm:$0xff]  ;;  %s1549_s7 = scalar_lea.vmem %s1580_s3, %s1200_s4 }
  0x16   : > { %s1414_s30 = scalar_lea.vmem %s1577_s0, %s1248_s27  ;;  %1245 = vmatpush.bf16.msra.mxu1 %v1203_v1  ;;  %1246 = vmatpush.bf16.msra.mxu2 %v1203_v1  ;;  %v1218_v25 = vld [vmem:[#allocation2 + $0x88] sm:$0xff]  ;;  %v1213_v35 = vld [vmem:[#allocation2 + $0x60] sm:$0xff]  ;;  %v1211_v37 = vld [vmem:[#allocation2 + $0x50] sm:$0xff] }
  0x17   : > { %v1028_v2 = vld [vmem:[%s1414_s30 + $0x2b2] sm:$0xff]  ;;  %v1029_v3 = vld [vmem:[%s1414_s30 + $0x2e2] sm:$0xff]  ;;  %1247 = vmatpush.bf16.msra.mxu3 %v1203_v1  ;;  %270 = vmatpush.bf16.msra.mxu0 %v1203_v1 }
  0x18   : > { %v1030_v4 = vld [vmem:[%s1414_s30 + $0x312] sm:$0xff]  ;;  %v1031_v5 = vld [vmem:[%s1414_s30 + $0x342] sm:$0xff]  ;;  %v230_v12 = vpack.c.bf16 %v1029_v3, %v1028_v2 }
  0x19   : > { %v1032_v6 = vld [vmem:[%s1414_s30 + $0x372] sm:$0xff]  ;;  %v1033_v7 = vld [vmem:[%s1414_s30 + $0x3a2] sm:$0xff]  ;;  %v231_v13 = vpack.c.bf16 %v1031_v5, %v1030_v4 }
  0x1a   : > { %v1026_v8 = vld [vmem:[%s1414_s30 + $0x252] sm:$0xff]  ;;  %v1027_v9 = vld [vmem:[%s1414_s30 + $0x282] sm:$0xff]  ;;  %v232_v14 = vpack.c.bf16 %v1033_v7, %v1032_v6  ;;  %392 = vmatpush.bf16.msrb.mxu2 %v1206_v10  ;;  %1043 = vmatmul.msk.bf16.vlgmr.msra.gmra.mxu1 %vm250_vm0, %v230_v12 }
  0x1b   : > { %v229_v15 = vpack.c.bf16 %v1027_v9, %v1026_v8  ;;  %471 = vmatpush.bf16.msrb.mxu3 %v1208_v11  ;;  %1044 = vmatmul.msk.bf16.vlgmr.msra.gmra.mxu2 %vm250_vm0, %v231_v13  ;;  %v1018_v26 = vld [vmem:[%s1414_s30 + $0x24c] sm:$0xff]  ;;  %v1019_v27 = vld [vmem:[%s1414_s30 + $0x27c] sm:$0xff] }
  0x1c   : > { %1045 = vmatmul.msk.bf16.vlgmr.msra.gmra.mxu3 %vm250_vm0, %v232_v14  ;;  %322 = vmatpush.bf16.msrb.mxu1 %v1202_v16  ;;  %v1058_v28 = vld [vmem:[%s1414_s30 + $0x258] sm:$0xff]  ;;  %v1059_v29 = vld [vmem:[%s1414_s30 + $0x288] sm:$0xff]  ;;  %v213_v32 = vpack.c.bf16 %v1019_v27, %v1018_v26  ;;  %v1217_v38 = vld [vmem:[#allocation2 + $0x80] sm:$0xff] }
  0x1d   : > { %1042 = vmatmul.msk.bf16.vlgmr.msra.gmra.mxu0 %vm250_vm0, %v229_v15  ;;  %v1078_v30 = vld [vmem:[%s1414_s30 + $0x36c] sm:$0xff]  ;;  %v1079_v31 = vld [vmem:[%s1414_s30 + $0x39c] sm:$0xff]  ;;  %v353_v33 = vpack.c.bf16 %v1059_v29, %v1058_v28 }
  0x1e   : > { %549 = vmatpush.bf16.msrb.mxu0 %v1210_v17  ;;  %393 = vmatpush.bf16.msrb.mxu2 %v1205_v18  ;;  %v432_v34 = vpack.c.bf16 %v1079_v31, %v1078_v30  ;;  %v1020_v39 = vld [vmem:[%s1414_s30 + $0x2ac] sm:$0xff]  ;;  %v1021_v40 = vld [vmem:[%s1414_s30 + $0x2dc] sm:$0xff] }
  0x1f   : > { %472 = vmatpush.bf16.msrb.mxu3 %v1207_v19  ;;  %v1060_v41 = vld [vmem:[%s1414_s30 + $0x2b8] sm:$0xff]  ;;  %v1061_v42 = vld [vmem:[%s1414_s30 + $0x2e8] sm:$0xff]  ;;  %v214_v47 = vpack.c.bf16 %v1021_v40, %v1020_v39 }
  0x20   : > { %323 = vmatpush.bf16.msrb.mxu1 %v1201_v22  ;;  %v1080_v43 = vld [vmem:[%s1414_s30 + $0x3cc] sm:$0xff]  ;;  %v1081_v44 = vld [vmem:[%s1414_s30 + $0x3fc] sm:$0xff]  ;;  %v354_v48 = vpack.c.bf16 %v1061_v42, %v1060_v41 }
  0x21   : > { %v1100_v45 = vld [vmem:[%s1414_s30 + $0x3d2] sm:$0xff]  ;;  %v1101_v46 = vld [vmem:[%s1414_s30 + $0x402] sm:$0xff]  ;;  %v433_v49 = vpack.c.bf16 %v1081_v44, %v1080_v43 }
  0x22   : > { %706 = vmatpush.bf16.msra.mxu2 %v1214_v20  ;;  %550 = vmatpush.bf16.msrb.mxu0 %v1209_v23  ;;  %v511_v50 = vpack.c.bf16 %v1101_v46, %v1100_v45  ;;  %v1022_v51 = vld [vmem:[%s1414_s30 + $0x30c] sm:$0xff]  ;;  %v1023_v52 = vld [vmem:[%s1414_s30 + $0x33c] sm:$0xff] }
  0x23   : > { %784 = vmatpush.bf16.msra.mxu3 %v1216_v21  ;;  %v1062_v53 = vld [vmem:[%s1414_s30 + $0x318] sm:$0xff]  ;;  %v1063_v54 = vld [vmem:[%s1414_s30 + $0x348] sm:$0xff]  ;;  %v215_v59 = vpack.c.bf16 %v1023_v52, %v1022_v51 }
  0x24   : > { %627 = vmatpush.bf16.msra.mxu1 %v1212_v24  ;;  %v1082_v55 = vld [vmem:[%s1414_s30 + $0x42c] sm:$0xff]  ;;  %v1083_v56 = vld [vmem:[%s1414_s30 + $0x45c] sm:$0xff]  ;;  %v355_v60 = vpack.c.bf16 %v1063_v54, %v1062_v53 }
  0x25   : > { %v1102_v57 = vld [vmem:[%s1414_s30 + $0x432] sm:$0xff]  ;;  %v1103_v58 = vld [vmem:[%s1414_s30 + $0x462] sm:$0xff]  ;;  %v434_v61 = vpack.c.bf16 %v1083_v56, %v1082_v55 }
  0x26   : > { %862 = vmatpush.bf16.msra.mxu0 %v1218_v25  ;;  %707 = vmatpush.bf16.msra.mxu2 %v1213_v35  ;;  %v512_v62 = vpack.c.bf16 %v1103_v58, %v1102_v57  ;;  %v1064_v63 = vld [vmem:[%s1414_s30 + $0x378] sm:$0xff]  ;;  %v1065_v0 = vld [vmem:[%s1414_s30 + $0x3a8] sm:$0xff] }
  0x27   : > { %785 = vmatpush.bf16.msra.mxu3 %v1215_v36  ;;  %v1084_v1 = vld [vmem:[%s1414_s30 + $0x48c] sm:$0xff]  ;;  %v1085_v2 = vld [vmem:[%s1414_s30 + $0x4bc] sm:$0xff]  ;;  %v356_v5 = vpack.c.bf16 %v1065_v0, %v1064_v63 }
  0x28   : > { %628 = vmatpush.bf16.msra.mxu1 %v1211_v37  ;;  %v1104_v3 = vld [vmem:[%s1414_s30 + $0x492] sm:$0xff]  ;;  %v1105_v4 = vld [vmem:[%s1414_s30 + $0x4c2] sm:$0xff]  ;;  %v435_v6 = vpack.c.bf16 %v1085_v2, %v1084_v1 }
  0x29   : > { %v513_v7 = vpack.c.bf16 %v1105_v4, %v1104_v3  ;;  %v1178_v8 = vld [vmem:[%s1414_s30 + $0x498] sm:$0xff]  ;;  %v1179_v9 = vld [vmem:[%s1414_s30 + $0x4c8] sm:$0xff] }
  0x2a   : > { %1054 = vmatmul.msk.bf16.vlgmr.msrb.gmra.mxu1 %vm250_vm0, %v213_v32  ;;  %863 = vmatpush.bf16.msra.mxu0 %v1217_v38  ;;  %v823_v10 = vpack.c.bf16 %v1179_v9, %v1178_v8  ;;  %v1120_v11 = vld [vmem:[%s1414_s30 + $0x3d8] sm:$0xff]  ;;  %v1121_v12 = vld [vmem:[%s1414_s30 + $0x408] sm:$0xff] }
  0x2b   : > { %1074 = vmatmul.msk.bf16.vlgmr.msrb.gmra.mxu2 %vm250_vm0, %v353_v33  ;;  %v1140_v13 = vld [vmem:[%s1414_s30 + $0x4ec] sm:$0xff]  ;;  %v1161_v16 = vld [vmem:[%s1414_s30 + $0x522] sm:$0xff]  ;;  %v1180_v17 = vld [vmem:[%s1414_s30 + $0x4f8] sm:$0xff]  ;;  %v589_v19 = vpack.c.bf16 %v1121_v12, %v1120_v11 }
  0x2c   : > { %1094 = vmatmul.msk.bf16.vlgmr.msrb.gmra.mxu3 %vm250_vm0, %v432_v34  ;;  %v1160_v15 = vld [vmem:[%s1414_s30 + $0x4f2] sm:$0xff]  ;;  %v1181_v18 = vld [vmem:[%s1414_s30 + $0x528] sm:$0xff]  ;;  %v1143_v26 = vld [vmem:[%s1414_s30 + $0x57c] sm:$0xff] }
  0x2d   : > { %1114 = vmatmul.msk.bf16.vlgmr.msrb.gmra.mxu0 %vm250_vm0, %v232_v14  ;;  %v1141_v14 = vld [vmem:[%s1414_s30 + $0x51c] sm:$0xff]  ;;  %v746_v21 = vpack.c.bf16 %v1161_v16, %v1160_v15  ;;  %v824_v22 = vpack.c.bf16 %v1181_v18, %v1180_v17  ;;  %v1123_v24 = vld [vmem:[%s1414_s30 + $0x468] sm:$0xff]  ;;  %v1162_v27 = vld [vmem:[%s1414_s30 + $0x552] sm:$0xff] }
  0x2e   : > { %v668_v20 = vpack.c.bf16 %v1141_v14, %v1140_v13  ;;  %v1122_v23 = vld [vmem:[%s1414_s30 + $0x438] sm:$0xff]  ;;  %v1142_v25 = vld [vmem:[%s1414_s30 + $0x54c] sm:$0xff]  ;;  %v1163_v28 = vld [vmem:[%s1414_s30 + $0x582] sm:$0xff] }
  0x2f   : > { %v1182_v29 = vld [vmem:[%s1414_s30 + $0x558] sm:$0xff]  ;;  %v1183_v30 = vld [vmem:[%s1414_s30 + $0x588] sm:$0xff]  ;;  %v590_v31 = vpack.c.bf16 %v1123_v24, %v1122_v23  ;;  %v669_v32 = vpack.c.bf16 %v1143_v26, %v1142_v25  ;;  %v747_v33 = vpack.c.bf16 %v1163_v28, %v1162_v27 }
  0x30   : > { %v1144_v35 = vld [vmem:[%s1414_s30 + $0x5ac] sm:$0xff]  ;;  %v1145_v36 = vld [vmem:[%s1414_s30 + $0x5dc] sm:$0xff] }
  0x31   : > { %v1164_v37 = vld [vmem:[%s1414_s30 + $0x5b2] sm:$0xff]  ;;  %v1165_v38 = vld [vmem:[%s1414_s30 + $0x5e2] sm:$0xff]  ;;  %v670_v41 = vpack.c.bf16 %v1145_v36, %v1144_v35 }
  0x32   : > { %v1184_v39 = vld [vmem:[%s1414_s30 + $0x5b8] sm:$0xff]  ;;  %v1185_v40 = vld [vmem:[%s1414_s30 + $0x5e8] sm:$0xff]  ;;  %v748_v43 = vpack.c.bf16 %v1165_v38, %v1164_v37 }
  0x33   : > { %v826_v44 = vpack.c.bf16 %v1185_v40, %v1184_v39 }
  0x3a   : > { %1055 = vmatmul.msk.bf16.gmra.mxu1 %vm250_vm0, %v214_v47 }
  0x3b   : > { %1075 = vmatmul.msk.bf16.gmra.mxu2 %vm250_vm0, %v354_v48 }
  0x3c   : > { %1095 = vmatmul.msk.bf16.gmra.mxu3 %vm250_vm0, %v433_v49 }
  0x3d   : > { %1115 = vmatmul.msk.bf16.gmra.mxu0 %vm250_vm0, %v511_v50 }
  0x4a   : > { %1056 = vmatmul.msk.bf16.gmra.mxu1 %vm250_vm0, %v215_v59 }
  0x4b   : > { %1076 = vmatmul.msk.bf16.gmra.mxu2 %vm250_vm0, %v355_v60 }
  0x4c   : > { %1096 = vmatmul.msk.bf16.gmra.mxu3 %vm250_vm0, %v434_v61 }
  0x4d   : > { %1116 = vmatmul.msk.bf16.gmra.mxu0 %vm250_vm0, %v512_v62 }
  0x5a   : > { %1057 = vmatmul.msk.bf16.gmra.mxu1 %vm250_vm0, %v432_v34  ;;  %v825_v34 = vpack.c.bf16 %v1183_v30, %v1182_v29 }
  0x5b   : > { %1077 = vmatmul.msk.bf16.gmra.mxu2 %vm250_vm0, %v356_v5 }
  0x5c   : > { %1097 = vmatmul.msk.bf16.gmra.mxu3 %vm250_vm0, %v435_v6 }
  0x5d   : > { %1117 = vmatmul.msk.bf16.gmra.mxu0 %vm250_vm0, %v513_v7 }
  0x6a   : > { %1134 = vmatmul.msk.bf16.vlgmr.msra.gmra.mxu1 %vm250_vm0, %v356_v5 }
  0x6b   : > { %1154 = vmatmul.msk.bf16.vlgmr.msra.gmra.mxu2 %vm250_vm0, %v435_v6 }
  0x6c   : > { %1174 = vmatmul.msk.bf16.vlgmr.msra.gmra.mxu3 %vm250_vm0, %v513_v7 }
  0x6d   : > { %1194 = vmatmul.msk.bf16.vlgmr.msra.gmra.mxu0 %vm250_vm0, %v823_v10 }
  0x7a   : > { %1135 = vmatmul.msk.bf16.gmra.mxu1 %vm250_vm0, %v589_v19 }
  0x7b   : > { %1155 = vmatmul.msk.bf16.gmra.mxu2 %vm250_vm0, %v668_v20 }
  0x7c   : > { %1175 = vmatmul.msk.bf16.gmra.mxu3 %vm250_vm0, %v746_v21 }
  0x7d   : > { %1195 = vmatmul.msk.bf16.gmra.mxu0 %vm250_vm0, %v824_v22 }
  0x8a   : > { %1136 = vmatmul.msk.bf16.gmra.mxu1 %vm250_vm0, %v590_v31 }
  0x8b   : > { %1156 = vmatmul.msk.bf16.gmra.mxu2 %vm250_vm0, %v669_v32 }
  0x8c   : > { %1176 = vmatmul.msk.bf16.gmra.mxu3 %vm250_vm0, %v747_v33 }
  0x8d   : > { %1196 = vmatmul.msk.bf16.gmra.mxu0 %vm250_vm0, %v825_v34 }
  0x97   : > { %v277_v42 = vpop.f32.mrf.mxu1 }
  0x9a   : > { %v272_v45 = vpop.f32.mrf.mxu0  ;;  %1137 = vmatmul.msk.bf16.gmra.mxu1 %vm250_vm0, %v823_v10 }
  0x9b   : > { %1157 = vmatmul.msk.bf16.gmra.mxu2 %vm250_vm0, %v670_v41 }
  0x9c   : > { %1177 = vmatmul.msk.bf16.gmra.mxu3 %vm250_vm0, %v748_v43 }
  0x9d   : > { %1197 = vmatmul.msk.bf16.gmra.mxu0 %vm250_vm0, %v826_v44 }
  0x9e   : > { %v282_v46 = vpop.f32.mrf.mxu2 }
  0x9f   : > { %v287_v47 = vpop.f32.mrf.mxu3  ;;  %v1512_v48 = vpop.f32.mrf.mxu1 }
  0xa2   : > { %v274_v49 = vpop.f32.mrf.mxu0 }
  0xa6   : > { %v1514_v50 = vpop.f32.mrf.mxu2 }
  0xa7   : > { %v1516_v51 = vpop.f32.mrf.mxu3  ;;  %v325_v52 = vpop.f32.mrf.mxu1 }
  0xa8   : > { %v326_v53 = vadd.f32 %v325_v52, %v272_v45 }
  0xaa   : > { %v552_v54 = vpop.f32.mrf.mxu0 }
  0xae   : > { %v395_v55 = vpop.f32.mrf.mxu2 }
  0xaf   : > { %v415_v56 = vadd.f32 %v395_v55, %v326_v53  ;;  %v474_v57 = vpop.f32.mrf.mxu3  ;;  %v327_v58 = vpop.f32.mrf.mxu1 }
  0xb0   : > { %v328_v37 = vadd.f32 %v327_v58, %v274_v49 }
  0xb1   : > { %v494_v59 = vadd.f32 %v474_v57, %v415_v56  ;;  %v1540_v56 = vld [vmem:[#allocation4] ss:$0 sm:$0xff] }
  0xb2   : > { %v554_v60 = vpop.f32.mrf.mxu0 }
  0xb3   : > { %v572_v61 = vadd.f32 %v552_v54, %v494_v59 }
  0xb6   : > { %v397_v62 = vpop.f32.mrf.mxu2 }
  0xb7   : > { %v476_v63 = vpop.f32.mrf.mxu3  ;;  %v330_v0 = vpop.f32.mrf.mxu1  ;;  %v416_v39 = vadd.f32 %v397_v62, %v328_v37 }
  0xb8   : > { %v331_v1 = vadd.f32 %v330_v0, %v277_v42 }
  0xb9   : > { %v495_v42 = vadd.f32 %v476_v63, %v416_v39 }
  0xba   : > { %v557_v2 = vpop.f32.mrf.mxu0 }
  0xbb   : > { %v573_v52 = vadd.f32 %v554_v60, %v495_v42 }
  0xbe   : > { %v400_v3 = vpop.f32.mrf.mxu2 }
  0xbf   : > { %v417_v4 = vadd.f32 %v400_v3, %v331_v1  ;;  %v479_v5 = vpop.f32.mrf.mxu3  ;;  %v332_v6 = vpop.f32.mrf.mxu1 }
  0xc0   : > { %v333_v58 = vadd.f32 %v332_v6, %v1512_v48 }
  0xc1   : > { %v496_v7 = vadd.f32 %v479_v5, %v417_v4 }
  0xc2   : > { %v1518_v8 = vpop.f32.mrf.mxu0 }
  0xc3   : > { %v574_v9 = vadd.f32 %v557_v2, %v496_v7 }
  0xc6   : > { %v402_v10 = vpop.f32.mrf.mxu2 }
  0xc7   : > { %v481_v11 = vpop.f32.mrf.mxu3  ;;  %v335_v12 = vpop.f32.mrf.mxu1  ;;  %v418_v63 = vadd.f32 %v402_v10, %v333_v58 }
  0xc8   : > { %v336_v13 = vadd.f32 %v335_v12, %v282_v46 }
  0xc9   : > { %v497_v4 = vadd.f32 %v481_v11, %v418_v63 }
  0xca   : > { %v562_v14 = vpop.f32.mrf.mxu0 }
  0xce   : > { %v405_v15 = vpop.f32.mrf.mxu2 }
  0xcf   : > { %v419_v16 = vadd.f32 %v405_v15, %v336_v13  ;;  %v484_v17 = vpop.f32.mrf.mxu3  ;;  %v1520_v18 = vpop.f32.mrf.mxu1  ;;  %v575_v15 = vadd.f32 %v1518_v8, %v497_v4 }
  0xd1   : > { %v498_v19 = vadd.f32 %v484_v17, %v419_v16 }
  0xd2   : > { %v1522_v20 = vpop.f32.mrf.mxu0 }
  0xd3   : > { %v1524_v21 = vadd.f32 %v562_v14, %v498_v19 }
  0xd6   : > { %v1526_v22 = vpop.f32.mrf.mxu2 }
  0xd7   : > { %v1528_v23 = vpop.f32.mrf.mxu3  ;;  %v340_v24 = vpop.f32.mrf.mxu1 }
  0xd8   : > { %v341_v25 = vadd.f32 %v340_v24, %v287_v47 }
  0xda   : > { %v567_v26 = vpop.f32.mrf.mxu0 }
  0xde   : > { %v410_v27 = vpop.f32.mrf.mxu2 }
  0xdf   : > { %v421_v28 = vadd.f32 %v410_v27, %v341_v25  ;;  %v489_v29 = vpop.f32.mrf.mxu3  ;;  %v1530_v30 = vpop.f32.mrf.mxu1  ;;  %v338_v25 = vadd.f32 %v1520_v18, %v1514_v50 }
  0xe1   : > { %v500_v31 = vadd.f32 %v489_v29, %v421_v28  ;;  %v420_v27 = vadd.f32 %v1526_v22, %v338_v25 }
  0xe2   : > { %v1532_v32 = vpop.f32.mrf.mxu0 }
  0xe3   : > { %v1534_v33 = vadd.f32 %v567_v26, %v500_v31 }
  0xe6   : > { %v1536_v34 = vpop.f32.mrf.mxu2 }
  0xe7   : > { %v1538_v35 = vpop.f32.mrf.mxu3  ;;  %v630_v36 = vpop.f32.mrf.mxu1 }
  0xe8   : > { %v650_v40 = vadd.f32 %v630_v36, %v572_v61 }
  0xea   : > { %v865_v38 = vpop.f32.mrf.mxu0 }
  0xee   : > { %v709_v41 = vpop.f32.mrf.mxu2 }
  0xef   : > { %v729_v43 = vadd.f32 %v709_v41, %v650_v40  ;;  %v787_v44 = vpop.f32.mrf.mxu3  ;;  %v632_v45 = vpop.f32.mrf.mxu1 }
  0xf0   : > { %v651_v53 = vadd.f32 %v632_v45, %v573_v52 }
  0xf1   : > { %v807_v47 = vadd.f32 %v787_v44, %v729_v43 }
  0xf2   : > { %v867_v46 = vpop.f32.mrf.mxu0 }
  0xf3   : > { %v885_v55 = vadd.f32 %v865_v38, %v807_v47  ;;  %v499_v38 = vadd.f32 %v1528_v23, %v420_v27  ;;  %v343_v23 = vadd.f32 %v1530_v30, %v1516_v51 }
  0xf5   : > { %v897_v0 = vadd.f32 %v1540_v56, %v885_v55  ;;  %v577_v22 = vadd.f32 %v1522_v20, %v499_v38  ;;  %v422_v55 = vadd.f32 %v1536_v34, %v343_v23 }
  0xf6   : > { %v711_v54 = vpop.f32.mrf.mxu2 }
  0xf7   : > { %v730_v57 = vadd.f32 %v711_v54, %v651_v53  ;;  %v789_v59 = vpop.f32.mrf.mxu3  ;;  %v635_v49 = vpop.f32.mrf.mxu1  ;;  %v905_v5 = vmax.f32 %v897_v0, 0.0 }
  0xf8   : > { %v652_v60 = vadd.f32 %v635_v49, %v574_v9 }
  0xf9   : > { %v808_v61 = vadd.f32 %v789_v59, %v730_v57 }
  0xfa   : > { %v870_v62 = vpop.f32.mrf.mxu0 }
  0xfb   : > { %v886_v1 = vadd.f32 %v867_v46, %v808_v61  ;;  %v501_v61 = vadd.f32 %v1538_v35, %v422_v55 }
  0xfd   : > { %v898_v2 = vadd.f32 %v1540_v56, %v886_v1 }
  0xfe   : > { %v714_v3 = vpop.f32.mrf.mxu2 }
  0xff   : > { %v906_v7 = vmax.f32 %v898_v2, 0.0  ;;  %v731_v12 = vadd.f32 %v714_v3, %v652_v60  ;;  %v792_v13 = vpop.f32.mrf.mxu3  ;;  %v637_v48 = vpop.f32.mrf.mxu1  ;;  %v579_v60 = vadd.f32 %v1532_v32, %v501_v61 }
 0x100   : > { %v653_v9 = vadd.f32 %v637_v48, %v575_v15 }
 0x101   : > { %v1222_v6 = vpack.c.bf16 %v906_v7, %v905_v5  ;;  %v809_v14 = vadd.f32 %v792_v13, %v731_v12 }
 0x102   : > { %v872_v10 = vpop.f32.mrf.mxu0 }
 0x103   : > { %1223 = vst [vmem:[%s1549_s7] sm:$0xff] %v1222_v6   ;;  %v887_v11 = vadd.f32 %v870_v62, %v809_v14 }
 0x105   : > { %v899_v28 = vadd.f32 %v1540_v56, %v887_v11 }
 0x106   : > { %v716_v16 = vpop.f32.mrf.mxu2 }
 0x107   : > { %v732_v17 = vadd.f32 %v716_v16, %v653_v9  ;;  %v794_v19 = vpop.f32.mrf.mxu3  ;;  %v640_v24 = vpop.f32.mrf.mxu1  ;;  %v907_v39 = vmax.f32 %v899_v28, 0.0 }
 0x108   : > { %v654_v8 = vadd.f32 %v640_v24, %v1524_v21 }
 0x109   : > { %v810_v26 = vadd.f32 %v794_v19, %v732_v17 }
 0x10a   : > { %v875_v31 = vpop.f32.mrf.mxu0 }
 0x10b   : > { %v888_v29 = vadd.f32 %v872_v10, %v810_v26 }
 0x10d   : > { %v900_v36 = vadd.f32 %v1540_v56, %v888_v29 }
 0x10e   : > { %v719_v37 = vpop.f32.mrf.mxu2 }
 0x10f   : > { %v908_v40 = vmax.f32 %v900_v36, 0.0  ;;  %v733_v41 = vadd.f32 %v719_v37, %v654_v8  ;;  %v797_v42 = vpop.f32.mrf.mxu3  ;;  %v642_v50 = vpop.f32.mrf.mxu1 }
 0x110   : > { %v655_v44 = vadd.f32 %v642_v50, %v577_v22 }
 0x111   : > { %v1227_v18 = vpack.c.bf16 %v908_v40, %v907_v39  ;;  %v811_v43 = vadd.f32 %v797_v42, %v733_v41 }
 0x112   : > { %v877_v45 = vpop.f32.mrf.mxu0 }
 0x113   : > { %1239 = vst [vmem:[%s1549_s7 + $0x8] sm:$0xff] %v1227_v18   ;;  %v889_v47 = vadd.f32 %v875_v31, %v811_v43 }
 0x115   : > { %v901_v57 = vadd.f32 %v1540_v56, %v889_v47 }
 0x116   : > { %v721_v46 = vpop.f32.mrf.mxu2 }
 0x117   : > { %v734_v52 = vadd.f32 %v721_v46, %v655_v44  ;;  %v799_v53 = vpop.f32.mrf.mxu3  ;;  %v645_v21 = vpop.f32.mrf.mxu1  ;;  %v909_v62 = vmax.f32 %v901_v57, 0.0 }
 0x118   : > { %v656_v20 = vadd.f32 %v645_v21, %v1534_v33 }
 0x119   : > { %v812_v54 = vadd.f32 %v799_v53, %v734_v52 }
 0x11a   : > { %v880_v2 = vpop.f32.mrf.mxu0 }
 0x11b   : > { %v890_v59 = vadd.f32 %v877_v45, %v812_v54 }
 0x11d   : > { %v902_v49 = vadd.f32 %v1540_v56, %v890_v59 }
 0x11e   : > { %v724_v58 = vpop.f32.mrf.mxu2 }
 0x11f   : > { %v910_v63 = vmax.f32 %v902_v49, 0.0  ;;  %v735_v0 = vadd.f32 %v724_v58, %v656_v20  ;;  %v802_v1 = vpop.f32.mrf.mxu3  ;;  %v647_v30 = vpop.f32.mrf.mxu1 }
 0x120   : > { %v657_v3 = vadd.f32 %v647_v30, %v579_v60 }
 0x121   : > { %v1232_v51 = vpack.c.bf16 %v910_v63, %v909_v62  ;;  %v813_v34 = vadd.f32 %v802_v1, %v735_v0 }
 0x122   : > { %v882_v13 = vpop.f32.mrf.mxu0 }
 0x123   : > { %1240 = vst [vmem:[%s1549_s7 + $0x10] sm:$0xff] %v1232_v51   ;;  %v891_v5 = vadd.f32 %v880_v2, %v813_v34 }
 0x125   : > { %v903_v35 = vadd.f32 %v1540_v56, %v891_v5 }
 0x126   : > { %v726_v4 = vpop.f32.mrf.mxu2 }
 0x127   : > { %v736_v7 = vadd.f32 %v726_v4, %v657_v3  ;;  %v804_v33 = vpop.f32.mrf.mxu3  ;;  %v911_v10 = vmax.f32 %v903_v35, 0.0 }
 0x129   : > { %v814_v12 = vadd.f32 %v804_v33, %v736_v7 }
 0x12b   : > { %v892_v48 = vadd.f32 %v882_v13, %v814_v12 }
 0x12d   : > { %v904_v6 = vadd.f32 %v1540_v56, %v892_v48 }
 0x12f   : > { %v912_v14 = vmax.f32 %v904_v6, 0.0 }
 0x131   : > { %v1237_v15 = vpack.c.bf16 %v912_v14, %v911_v10 }
 0x133   : > { %1241 = vst [vmem:[%s1549_s7 + $0x18] sm:$0xff] %v1237_v15  }
 0x134 PF: > { %s15_s12 = sadd.s32 1, %s1355_s12  }
 0x135   : > { %p12_p7 = scmp.ge.s32.totalorder %s15_s12, 4  }
 0x137   :  { %14 = sbr.rel (!%p12_p7) target bundleno = 2 (0x2), region = 82 }
 0x13c   :  { %950 = vsyncpa [#allocation3], 1 }
 0x13d   :  { %952 = vsyncpa [#allocation3 + $0x1], 1 }
 0x13e   :  { %953 = vsyncpa [#allocation5], 1 }

// kernel: deeplabv3plus_forward.13
= control target key start
LH: loop header
LB: loop body
LE: loop exit
PB: predicated region body
PF: predicated region fallthrough
CT: control target
= control target key end

     0   :  { %16 = vsyncpa [#allocation3], 0  ;;  %s2070_s0 = inlined_call_operand.vmem [shape: bf16[128,128], index: 0, kind: input, shape index: {}]   ;;  %s2071_s1 = inlined_call_operand.vmem [shape: bf16[128,128], index: 1, kind: input, shape index: {}]   ;;  %s2072_s2 = inlined_call_operand.vmem [shape: bf16[128,128], index: 2, kind: input, shape index: {}]   ;;  %s2073_s3 = inlined_call_operand.vmem [shape: bf16[128,128], index: 3, kind: input, shape index: {}]   ;;  %s2074_s4 = inlined_call_operand.vmem [shape: bf16[128,128], index: 4, kind: input, shape index: {}]   ;;  %s2075_s5 = inlined_call_operand.hbm [shape: bf16[128,128], index: 5, kind: input, shape index: {}]   ;;  %s2076_s6 = inlined_call_operand.hbm [shape: bf16[128,128], index: 6, kind: input, shape index: {}]   ;;  %s2077_s7 = inlined_call_operand.hbm [shape: bf16[128,128], index: 7, kind: input, shape index: {}]   ;;  %s2078_s8 = inlined_call_operand.hbm [shape: bf16[128,128], index: 8, kind: input, shape index: {}]   ;;  %s2079_s9 = inlined_call_operand.hbm [shape: bf16[128,128], index: 9, kind: input, shape index: {}]   ;;  %s2080_s10 = inlined_call_operand.hbm [shape: f32[1,128], index: 10, kind: input, shape index: {}]   ;;  %s2081_s11 = inlined_call_operand.vmem [shape: bf16[128,128], index: 11, kind: output, shape index: {}]  }
   0x1   :  { %17 = vsyncpa [#allocation5], 0 }
   0x2   :  { %18 = vsyncpa [#allocation8], 0 }
   0x3   :  { %19 = vsyncpa [#allocation11], 0  ;;  %s47_s19 = sshll.u32 %s2076_s6, 4  ;;  %s1771_s20 = smov [#allocation4]   ;;  %s48_s19 = int_to_ptr.hbm [resolvable:$true] %s47_s19 }
   0x4   :  { %s49_s21 = sshll.u32 %s1771_s20, 4  ;;  %s73_s24 = sshll.u32 %s2078_s8, 4  ;;  %s50_s21 = int_to_ptr.vmem [resolvable:$true] %s49_s21  ;;  %s74_s24 = int_to_ptr.hbm [resolvable:$true] %s73_s24 }
   0x5   :  { %s1772_s25 = smov 64   ;;  %s1773_s26 = smov 4  }
   0x6   :  { %55 = dma.hbm_to_vmem [thread:$0]  %s48_s19, 1024, %s50_s21, [#allocation5], %s1772_s25, %s1772_s25, %s1773_s26  }
   0x7   :  { %s1774_s27 = smov [#allocation7]   ;;  %s34_s6 = sshll.u32 %s2075_s5, 4  ;;  %s35_s6 = int_to_ptr.hbm [resolvable:$true] %s34_s6 }
   0x8   :  { %s75_s28 = sshll.u32 %s1774_s27, 4  ;;  %s60_s13 = sshll.u32 %s2077_s7, 4  ;;  %s76_s28 = int_to_ptr.vmem [resolvable:$true] %s75_s28  ;;  %s61_s13 = int_to_ptr.hbm [resolvable:$true] %s60_s13 }
   0x9   :  { %81 = dma.hbm_to_vmem [thread:$0]  %s74_s24, 1024, %s76_s28, [#allocation8], %s1772_s25, %s1772_s25, %s1773_s26  }
   0xa   :  { %s1775_s14 = smov [#allocation2]   ;;  %s1776_s16 = smov [#allocation6]  }
   0xb   :  { %s36_s15 = sshll.u32 %s1775_s14, 4  ;;  %s62_s5 = sshll.u32 %s1776_s16, 4  ;;  %s37_s15 = int_to_ptr.vmem [resolvable:$true] %s36_s15  ;;  %s63_s5 = int_to_ptr.vmem [resolvable:$true] %s62_s5 }
   0xc   :  { %42 = dma.hbm_to_vmem [thread:$0]  %s35_s6, 1024, %s37_s15, [#allocation3], %s1772_s25, %s1772_s25, %s1773_s26  }
   0xd   :  { %s86_s19 = sshll.u32 %s2079_s9, 4  ;;  %s100_s21 = sshll.u32 %s2080_s10, 4  ;;  %s87_s19 = int_to_ptr.hbm [resolvable:$true] %s86_s19  ;;  %s101_s21 = int_to_ptr.hbm [resolvable:$true] %s100_s21 }
   0xe   :  { %68 = dma.hbm_to_vmem [thread:$0]  %s61_s13, 1024, %s63_s5, [#allocation5], %s1772_s25, %s1772_s25, %s1773_s26  }
   0xf   :  { %s1777_s22 = smov [#allocation9]   ;;  %s1778_s24 = smov [#allocation10]  }
  0x10   :  { %s88_s23 = sshll.u32 %s1777_s22, 4  ;;  %s102_s9 = sshll.u32 %s1778_s24, 4  ;;  %s89_s23 = int_to_ptr.vmem [resolvable:$true] %s88_s23  ;;  %s103_s9 = int_to_ptr.vmem [resolvable:$true] %s102_s9 }
  0x11   :  { %94 = dma.hbm_to_vmem [thread:$0]  %s87_s19, 1024, %s89_s23, [#allocation8], %s1772_s25, %s1772_s25, %s1773_s26  }
  0x12   :  { %105 = dma.hbm_to_vmem [thread:$0]  %s101_s21, 16, %s103_s9, [#allocation11]  }
  0x13   :  { %1763 = dma.done.wait [#allocation3], 1024  }
  0x14   :  { %1764 = vsyncadd [#allocation3], 4294966272 }
  0x15   :  { %1765 = dma.done.wait [#allocation5], 2048  }
  0x16   :  { %1766 = vsyncadd [#allocation5], 4294965248 }
  0x17   :  { %1767 = dma.done.wait [#allocation8], 2048  }
  0x18   :  { %1768 = vsyncadd [#allocation8], 4294965248 }
  0x19   :  { %1769 = dma.done.wait [#allocation11], 16  }
  0x1a   :  { %1770 = vsyncadd [#allocation11], 4294967280  ;;  %v1490_v0 = vld [vmem:[#allocation4 + $0x38] sm:$0xff]  ;;  %v1489_v1 = vld [vmem:[#allocation4 + $0x30] sm:$0xff] }
  0x1b   :  { %1586 = vmatpush.bf16.msra.mxu1 %v1490_v0  ;;  %1587 = vmatpush.bf16.msra.mxu2 %v1490_v0  ;;  %v1488_v2 = vld [vmem:[#allocation4 + $0x28] sm:$0xff]  ;;  %v1487_v3 = vld [vmem:[#allocation4 + $0x20] sm:$0xff]  ;;  %v1486_v4 = vld [vmem:[#allocation4 + $0x18] sm:$0xff] }
  0x1c   :  { %1588 = vmatpush.bf16.msra.mxu3 %v1490_v0  ;;  %290 = vmatpush.bf16.msra.mxu0 %v1490_v0  ;;  %v1485_v5 = vld [vmem:[#allocation4 + $0x10] sm:$0xff]  ;;  %v1484_v6 = vld [vmem:[#allocation4 + $0x8] sm:$0xff]  ;;  %v1483_v7 = vld [vmem:[#allocation4] sm:$0xff] }
  0x1d   :  { %v1506_v8 = vld [vmem:[#allocation6 + $0x38] sm:$0xff]  ;;  %v1477_v10 = vld [vmem:[%s2071_s1 + $0x10] sm:$0xff]  ;;  %v1479_v11 = vld [vmem:[%s2071_s1 + $0x20] sm:$0xff] }
  0x1e   :  { %v1474_v9 = vld [vmem:[#allocation2 + $0x38] sm:$0xff]  ;;  %v1481_v12 = vld [vmem:[%s2071_s1 + $0x30] sm:$0xff]  ;;  %v1475_v13 = vld [vmem:[%s2071_s1] sm:$0xff] }
  0x1f   :  { %1589 = vmatpush.bf16.msra.mxu1 %v1489_v1  ;;  %1590 = vmatpush.bf16.msra.mxu2 %v1489_v1  ;;  %v1522_v14 = vld [vmem:[#allocation7 + $0x38] sm:$0xff]  ;;  %v1505_v16 = vld [vmem:[#allocation6 + $0x30] sm:$0xff]  ;;  %v1504_v20 = vld [vmem:[#allocation6 + $0x28] sm:$0xff] }
  0x20   :  { %1591 = vmatpush.bf16.msra.mxu3 %v1489_v1  ;;  %291 = vmatpush.bf16.msra.mxu0 %v1489_v1  ;;  %v1538_v15 = vld [vmem:[#allocation9 + $0x38] sm:$0xff]  ;;  %v1473_v17 = vld [vmem:[#allocation2 + $0x30] sm:$0xff]  ;;  %v1472_v21 = vld [vmem:[#allocation2 + $0x28] sm:$0xff] }
  0x21   :  { %v1521_v18 = vld [vmem:[#allocation7 + $0x30] sm:$0xff]  ;;  %v1520_v22 = vld [vmem:[#allocation7 + $0x28] sm:$0xff]  ;;  %v1503_v24 = vld [vmem:[#allocation6 + $0x20] sm:$0xff] }
  0x22   :  { %v1537_v19 = vld [vmem:[#allocation9 + $0x30] sm:$0xff]  ;;  %v1536_v23 = vld [vmem:[#allocation9 + $0x28] sm:$0xff]  ;;  %v1471_v25 = vld [vmem:[#allocation2 + $0x20] sm:$0xff] }
  0x23   :  { %1592 = vmatpush.bf16.msra.mxu1 %v1488_v2  ;;  %1593 = vmatpush.bf16.msra.mxu2 %v1488_v2  ;;  %v1519_v26 = vld [vmem:[#allocation7 + $0x20] sm:$0xff]  ;;  %v1502_v28 = vld [vmem:[#allocation6 + $0x18] sm:$0xff]  ;;  %v1480_v31 = vld [vmem:[%s2071_s1 + $0x28] sm:$0xff] }
  0x24   :  { %1594 = vmatpush.bf16.msra.mxu3 %v1488_v2  ;;  %292 = vmatpush.bf16.msra.mxu0 %v1488_v2  ;;  %v1535_v27 = vld [vmem:[#allocation9 + $0x20] sm:$0xff]  ;;  %v1470_v29 = vld [vmem:[#allocation2 + $0x18] sm:$0xff]  ;;  %v1476_v33 = vld [vmem:[%s2071_s1 + $0x8] sm:$0xff] }
  0x25   :  { %v1478_v30 = vld [vmem:[%s2071_s1 + $0x18] sm:$0xff]  ;;  %v1501_v36 = vld [vmem:[#allocation6 + $0x10] sm:$0xff]  ;;  %v1500_v40 = vld [vmem:[#allocation6 + $0x8] sm:$0xff] }
  0x26   :  { %v1482_v32 = vld [vmem:[%s2071_s1 + $0x38] sm:$0xff]  ;;  %v1469_v37 = vld [vmem:[#allocation2 + $0x10] sm:$0xff]  ;;  %v1468_v41 = vld [vmem:[#allocation2 + $0x8] sm:$0xff] }
  0x27   :  { %1595 = vmatpush.bf16.msra.mxu1 %v1487_v3  ;;  %1596 = vmatpush.bf16.msra.mxu2 %v1487_v3  ;;  %v1518_v34 = vld [vmem:[#allocation7 + $0x18] sm:$0xff]  ;;  %v1517_v38 = vld [vmem:[#allocation7 + $0x10] sm:$0xff]  ;;  %v1516_v42 = vld [vmem:[#allocation7 + $0x8] sm:$0xff] }
  0x28   :  { %1597 = vmatpush.bf16.msra.mxu3 %v1487_v3  ;;  %293 = vmatpush.bf16.msra.mxu0 %v1487_v3  ;;  %v1534_v35 = vld [vmem:[#allocation9 + $0x18] sm:$0xff]  ;;  %v1533_v39 = vld [vmem:[#allocation9 + $0x10] sm:$0xff]  ;;  %v1532_v43 = vld [vmem:[#allocation9 + $0x8] sm:$0xff] }
  0x29   :  { %v1499_v44 = vld [vmem:[#allocation6] sm:$0xff]  ;;  %v1460_v52 = vld [vmem:[%s2070_s0 + $0x8] sm:$0xff]  ;;  %v1461_v56 = vld [vmem:[%s2070_s0 + $0x10] sm:$0xff] }
  0x2a   :  { %v1467_v45 = vld [vmem:[#allocation2] sm:$0xff]  ;;  %v1492_v53 = vld [vmem:[%s2072_s2 + $0x8] sm:$0xff]  ;;  %v1493_v57 = vld [vmem:[%s2072_s2 + $0x10] sm:$0xff] }
  0x2b   :  { %1598 = vmatpush.bf16.msra.mxu1 %v1486_v4  ;;  %1599 = vmatpush.bf16.msra.mxu2 %v1486_v4  ;;  %v1515_v46 = vld [vmem:[#allocation7] sm:$0xff]  ;;  %v1508_v54 = vld [vmem:[%s2073_s3 + $0x8] sm:$0xff]  ;;  %v1509_v58 = vld [vmem:[%s2073_s3 + $0x10] sm:$0xff] }
  0x2c   :  { %1600 = vmatpush.bf16.msra.mxu3 %v1486_v4  ;;  %294 = vmatpush.bf16.msra.mxu0 %v1486_v4  ;;  %v1531_v47 = vld [vmem:[#allocation9] sm:$0xff]  ;;  %v1524_v55 = vld [vmem:[%s2074_s4 + $0x8] sm:$0xff]  ;;  %v1525_v59 = vld [vmem:[%s2074_s4 + $0x10] sm:$0xff] }
  0x2d   :  { %v1459_v48 = vld [vmem:[%s2070_s0] sm:$0xff]  ;;  %v1462_v60 = vld [vmem:[%s2070_s0 + $0x18] sm:$0xff]  ;;  %v1464_v4 = vld [vmem:[%s2070_s0 + $0x28] sm:$0xff] }
  0x2e   :  { %v1491_v49 = vld [vmem:[%s2072_s2] sm:$0xff]  ;;  %v1494_v61 = vld [vmem:[%s2072_s2 + $0x18] sm:$0xff] }
  0x2f   :  { %1601 = vmatpush.bf16.msra.mxu1 %v1485_v5  ;;  %1602 = vmatpush.bf16.msra.mxu2 %v1485_v5  ;;  %v1507_v50 = vld [vmem:[%s2073_s3] sm:$0xff]  ;;  %v1510_v62 = vld [vmem:[%s2073_s3 + $0x18] sm:$0xff] }
  0x30   :  { %1603 = vmatpush.bf16.msra.mxu3 %v1485_v5  ;;  %295 = vmatpush.bf16.msra.mxu0 %v1485_v5  ;;  %v1523_v51 = vld [vmem:[%s2074_s4] sm:$0xff]  ;;  %v1526_v63 = vld [vmem:[%s2074_s4 + $0x18] sm:$0xff]  ;;  %v1496_v5 = vld [vmem:[%s2072_s2 + $0x28] sm:$0xff] }
  0x31   :  { %v1463_v0 = vld [vmem:[%s2070_s0 + $0x20] sm:$0xff] }
  0x32   :  { %v1495_v1 = vld [vmem:[%s2072_s2 + $0x20] sm:$0xff] }
  0x33   :  { %1604 = vmatpush.bf16.msra.mxu1 %v1484_v6  ;;  %1605 = vmatpush.bf16.msra.mxu2 %v1484_v6  ;;  %v1511_v2 = vld [vmem:[%s2073_s3 + $0x20] sm:$0xff] }
  0x34   :  { %1606 = vmatpush.bf16.msra.mxu3 %v1484_v6  ;;  %296 = vmatpush.bf16.msra.mxu0 %v1484_v6  ;;  %v1527_v3 = vld [vmem:[%s2074_s4 + $0x20] sm:$0xff]  ;;  %v1512_v6 = vld [vmem:[%s2073_s3 + $0x28] sm:$0xff] }
  0x37   :  { %1607 = vmatpush.bf16.msra.mxu1 %v1483_v7  ;;  %1608 = vmatpush.bf16.msra.mxu2 %v1483_v7 }
  0x38   :  { %1609 = vmatpush.bf16.msra.mxu3 %v1483_v7  ;;  %297 = vmatpush.bf16.msra.mxu0 %v1483_v7  ;;  %v1528_v7 = vld [vmem:[%s2074_s4 + $0x28] sm:$0xff] }
  0x3a   :  { %308 = vmatmul.bf16.vlgmr.msra.gmra.mxu1 %v1477_v10  ;;  %318 = vmatmul.bf16.vlgmr.msra.gmra.mxu2 %v1479_v11  ;;  %v1513_v11 = vld [vmem:[%s2073_s3 + $0x30] sm:$0xff] }
  0x3b   :  { %612 = vmatpush.bf16.msrb.mxu2 %v1506_v8  ;;  %435 = vmatpush.bf16.msrb.mxu1 %v1474_v9  ;;  %v1465_v8 = vld [vmem:[%s2070_s0 + $0x30] sm:$0xff] }
  0x3c   :  { %328 = vmatmul.bf16.vlgmr.msra.gmra.mxu3 %v1481_v12  ;;  %298 = vmatmul.bf16.vlgmr.msra.gmra.mxu0 %v1475_v13  ;;  %v1497_v9 = vld [vmem:[%s2072_s2 + $0x30] sm:$0xff] }
  0x3d   :  { %805 = vmatpush.bf16.msrb.mxu3 %v1522_v14  ;;  %998 = vmatpush.bf16.msrb.mxu0 %v1538_v15  ;;  %v1529_v12 = vld [vmem:[%s2074_s4 + $0x30] sm:$0xff] }
  0x3f   :  { %613 = vmatpush.bf16.msrb.mxu2 %v1505_v16  ;;  %436 = vmatpush.bf16.msrb.mxu1 %v1473_v17 }
  0x41   :  { %806 = vmatpush.bf16.msrb.mxu3 %v1521_v18  ;;  %999 = vmatpush.bf16.msrb.mxu0 %v1537_v19 }
  0x43   :  { %614 = vmatpush.bf16.msrb.mxu2 %v1504_v20  ;;  %437 = vmatpush.bf16.msrb.mxu1 %v1472_v21  ;;  %v1466_v20 = vld [vmem:[%s2070_s0 + $0x38] sm:$0xff] }
  0x44   :  { %v1498_v21 = vld [vmem:[%s2072_s2 + $0x38] sm:$0xff] }
  0x45   :  { %807 = vmatpush.bf16.msrb.mxu3 %v1520_v22  ;;  %1000 = vmatpush.bf16.msrb.mxu0 %v1536_v23  ;;  %v1514_v23 = vld [vmem:[%s2073_s3 + $0x38] sm:$0xff] }
  0x47   :  { %615 = vmatpush.bf16.msrb.mxu2 %v1503_v24  ;;  %438 = vmatpush.bf16.msrb.mxu1 %v1471_v25  ;;  %v1530_v24 = vld [vmem:[%s2074_s4 + $0x38] sm:$0xff] }
  0x49   :  { %808 = vmatpush.bf16.msrb.mxu3 %v1519_v26  ;;  %1001 = vmatpush.bf16.msrb.mxu0 %v1535_v27 }
  0x4a   :  { %313 = vmatmul.bf16.gmra.mxu1 %v1478_v30  ;;  %323 = vmatmul.bf16.gmra.mxu2 %v1480_v31 }
  0x4b   :  { %616 = vmatpush.bf16.msrb.mxu2 %v1502_v28  ;;  %439 = vmatpush.bf16.msrb.mxu1 %v1470_v29 }
  0x4c   :  { %333 = vmatmul.bf16.gmra.mxu3 %v1482_v32  ;;  %303 = vmatmul.bf16.gmra.mxu0 %v1476_v33 }
  0x4d   :  { %809 = vmatpush.bf16.msrb.mxu3 %v1518_v34  ;;  %1002 = vmatpush.bf16.msrb.mxu0 %v1534_v35 }
  0x4f   :  { %617 = vmatpush.bf16.msrb.mxu2 %v1501_v36  ;;  %440 = vmatpush.bf16.msrb.mxu1 %v1469_v37 }
  0x51   :  { %810 = vmatpush.bf16.msrb.mxu3 %v1517_v38  ;;  %1003 = vmatpush.bf16.msrb.mxu0 %v1533_v39 }
  0x53   :  { %618 = vmatpush.bf16.msrb.mxu2 %v1500_v40  ;;  %441 = vmatpush.bf16.msrb.mxu1 %v1468_v41 }
  0x55   :  { %811 = vmatpush.bf16.msrb.mxu3 %v1516_v42  ;;  %1004 = vmatpush.bf16.msrb.mxu0 %v1532_v43 }
  0x57   :  { %619 = vmatpush.bf16.msrb.mxu2 %v1499_v44  ;;  %442 = vmatpush.bf16.msrb.mxu1 %v1467_v45  ;;  %v2016_v44 = vld [vmem:[#allocation10] ss:$0 sm:$0xff] }
  0x59   :  { %812 = vmatpush.bf16.msrb.mxu3 %v1515_v46  ;;  %1005 = vmatpush.bf16.msrb.mxu0 %v1531_v47 }
  0x5a   :  { %443 = vmatmul.bf16.vlgmr.msrb.gmra.mxu1 %v1459_v48  ;;  %620 = vmatmul.bf16.vlgmr.msrb.gmra.mxu2 %v1491_v49 }
  0x5c   :  { %813 = vmatmul.bf16.vlgmr.msrb.gmra.mxu3 %v1507_v50  ;;  %1006 = vmatmul.bf16.vlgmr.msrb.gmra.mxu0 %v1523_v51 }
  0x6a   :  { %448 = vmatmul.bf16.gmra.mxu1 %v1460_v52  ;;  %625 = vmatmul.bf16.gmra.mxu2 %v1492_v53 }
  0x6c   :  { %818 = vmatmul.bf16.gmra.mxu3 %v1508_v54  ;;  %1011 = vmatmul.bf16.gmra.mxu0 %v1524_v55 }
  0x7a   :  { %453 = vmatmul.bf16.gmra.mxu1 %v1461_v56  ;;  %630 = vmatmul.bf16.gmra.mxu2 %v1493_v57 }
  0x7c   :  { %823 = vmatmul.bf16.gmra.mxu3 %v1509_v58  ;;  %1016 = vmatmul.bf16.gmra.mxu0 %v1525_v59 }
  0x8a   :  { %458 = vmatmul.bf16.gmra.mxu1 %v1462_v60  ;;  %635 = vmatmul.bf16.gmra.mxu2 %v1494_v61 }
  0x8c   :  { %828 = vmatmul.bf16.gmra.mxu3 %v1510_v62  ;;  %1021 = vmatmul.bf16.gmra.mxu0 %v1526_v63 }
  0x9a   :  { %463 = vmatmul.bf16.gmra.mxu1 %v1463_v0  ;;  %640 = vmatmul.bf16.gmra.mxu2 %v1495_v1 }
  0x9c   :  { %833 = vmatmul.bf16.gmra.mxu3 %v1511_v2  ;;  %1026 = vmatmul.bf16.gmra.mxu0 %v1527_v3 }
  0xaa   :  { %468 = vmatmul.bf16.gmra.mxu1 %v1464_v4  ;;  %645 = vmatmul.bf16.gmra.mxu2 %v1496_v5 }
  0xac   :  { %838 = vmatmul.bf16.gmra.mxu3 %v1512_v6  ;;  %1031 = vmatmul.bf16.gmra.mxu0 %v1528_v7 }
  0xb7   :  { %v1974_v10 = vpop.f32.mrf.mxu1 }
  0xb9   :  { %v299_v13 = vpop.f32.mrf.mxu0 }
  0xba   :  { %473 = vmatmul.bf16.gmra.mxu1 %v1465_v8  ;;  %650 = vmatmul.bf16.gmra.mxu2 %v1497_v9 }
  0xbc   :  { %843 = vmatmul.bf16.gmra.mxu3 %v1513_v11  ;;  %1036 = vmatmul.bf16.gmra.mxu0 %v1529_v12 }
  0xbd   :  { %v1982_v14 = vpop.f32.mrf.mxu2 }
  0xbf   :  { %v1984_v15 = vpop.f32.mrf.mxu3  ;;  %v1986_v16 = vpop.f32.mrf.mxu1 }
  0xc1   :  { %v301_v17 = vpop.f32.mrf.mxu0 }
  0xc5   :  { %v1988_v18 = vpop.f32.mrf.mxu2 }
  0xc7   :  { %v1990_v19 = vpop.f32.mrf.mxu3  ;;  %v1998_v22 = vpop.f32.mrf.mxu1 }
  0xc9   :  { %v304_v25 = vpop.f32.mrf.mxu0 }
  0xca   :  { %478 = vmatmul.bf16.gmra.mxu1 %v1466_v20  ;;  %655 = vmatmul.bf16.gmra.mxu2 %v1498_v21 }
  0xcc   :  { %848 = vmatmul.bf16.gmra.mxu3 %v1514_v23  ;;  %1041 = vmatmul.bf16.gmra.mxu0 %v1530_v24 }
  0xcd   :  { %v2006_v26 = vpop.f32.mrf.mxu2 }
  0xcf   :  { %v2008_v27 = vpop.f32.mrf.mxu3  ;;  %v2010_v28 = vpop.f32.mrf.mxu1 }
  0xd1   :  { %v306_v29 = vpop.f32.mrf.mxu0 }
  0xd5   :  { %v2012_v30 = vpop.f32.mrf.mxu2 }
  0xd7   :  { %v2014_v31 = vpop.f32.mrf.mxu3  ;;  %v444_v32 = vpop.f32.mrf.mxu1 }
  0xd8   :  { %v445_v34 = vadd.f32 %v444_v32, %v299_v13 }
  0xd9   :  { %v1007_v33 = vpop.f32.mrf.mxu0 }
  0xdd   :  { %v621_v35 = vpop.f32.mrf.mxu2 }
  0xde   :  { %v661_v36 = vadd.f32 %v621_v35, %v445_v34 }
  0xdf   :  { %v814_v37 = vpop.f32.mrf.mxu3  ;;  %v446_v38 = vpop.f32.mrf.mxu1 }
  0xe0   :  { %v854_v40 = vadd.f32 %v814_v37, %v661_v36  ;;  %v447_v41 = vadd.f32 %v446_v38, %v301_v17 }
  0xe1   :  { %v1009_v39 = vpop.f32.mrf.mxu0 }
  0xe2   :  { %v1047_v43 = vadd.f32 %v1007_v33, %v854_v40 }
  0xe4   :  { %v1067_v50 = vadd.f32 %v2016_v44, %v1047_v43 }
  0xe5   :  { %v623_v42 = vpop.f32.mrf.mxu2 }
  0xe6   :  { %v662_v45 = vadd.f32 %v623_v42, %v447_v41  ;;  %v1083_v55 = vmax.f32 %v1067_v50, 0.0 }
  0xe7   :  { %v816_v46 = vpop.f32.mrf.mxu3  ;;  %v449_v47 = vpop.f32.mrf.mxu1 }
  0xe8   :  { %v855_v48 = vadd.f32 %v816_v46, %v662_v45  ;;  %v450_v53 = vadd.f32 %v449_v47, %v304_v25 }
  0xe9   :  { %v1012_v49 = vpop.f32.mrf.mxu0 }
  0xea   :  { %v1048_v51 = vadd.f32 %v1009_v39, %v855_v48 }
  0xec   :  { %v1068_v52 = vadd.f32 %v2016_v44, %v1048_v51 }
  0xed   :  { %v626_v54 = vpop.f32.mrf.mxu2 }
  0xee   :  { %v1084_v56 = vmax.f32 %v1068_v52, 0.0  ;;  %v663_v57 = vadd.f32 %v626_v54, %v450_v53 }
  0xef   :  { %v819_v58 = vpop.f32.mrf.mxu3  ;;  %v451_v59 = vpop.f32.mrf.mxu1 }
  0xf0   :  { %v1542_v60 = vpack.c.bf16 %v1084_v56, %v1083_v55  ;;  %v856_v62 = vadd.f32 %v819_v58, %v663_v57  ;;  %v452_v63 = vadd.f32 %v451_v59, %v306_v29 }
  0xf1   :  { %v1014_v61 = vpop.f32.mrf.mxu0 }
  0xf2   :  { %1543 = vst [vmem:[%s2081_s11] sm:$0xff] %v1542_v60   ;;  %v1049_v1 = vadd.f32 %v1012_v49, %v856_v62 }
  0xf4   :  { %v1069_v7 = vadd.f32 %v2016_v44, %v1049_v1 }
  0xf5   :  { %v628_v0 = vpop.f32.mrf.mxu2 }
  0xf6   :  { %v664_v2 = vadd.f32 %v628_v0, %v452_v63  ;;  %v1085_v13 = vmax.f32 %v1069_v7, 0.0 }
  0xf7   :  { %v821_v3 = vpop.f32.mrf.mxu3  ;;  %v454_v4 = vpop.f32.mrf.mxu1 }
  0xf8   :  { %v857_v5 = vadd.f32 %v821_v3, %v664_v2  ;;  %v455_v11 = vadd.f32 %v454_v4, %v1974_v10 }
  0xf9   :  { %v1017_v6 = vpop.f32.mrf.mxu0 }
  0xfa   :  { %v1050_v8 = vadd.f32 %v1014_v61, %v857_v5 }
  0xfc   :  { %v1070_v9 = vadd.f32 %v2016_v44, %v1050_v8 }
  0xfd   :  { %v631_v12 = vpop.f32.mrf.mxu2 }
  0xfe   :  { %v1086_v17 = vmax.f32 %v1070_v9, 0.0  ;;  %v665_v20 = vadd.f32 %v631_v12, %v455_v11 }
  0xff   :  { %v824_v21 = vpop.f32.mrf.mxu3  ;;  %v456_v23 = vpop.f32.mrf.mxu1 }
 0x100   :  { %v1547_v24 = vpack.c.bf16 %v1086_v17, %v1085_v13  ;;  %v858_v29 = vadd.f32 %v824_v21, %v665_v20  ;;  %v457_v32 = vadd.f32 %v456_v23, %v1986_v16 }
 0x101   :  { %v1019_v25 = vpop.f32.mrf.mxu0 }
 0x102   :  { %1579 = vst [vmem:[%s2081_s11 + $0x8] sm:$0xff] %v1547_v24   ;;  %v1051_v34 = vadd.f32 %v1017_v6, %v858_v29 }
 0x104   :  { %v1071_v39 = vadd.f32 %v2016_v44, %v1051_v34 }
 0x105   :  { %v633_v33 = vpop.f32.mrf.mxu2 }
 0x106   :  { %v666_v35 = vadd.f32 %v633_v33, %v457_v32  ;;  %v1087_v45 = vmax.f32 %v1071_v39, 0.0 }
 0x107   :  { %v826_v36 = vpop.f32.mrf.mxu3  ;;  %v459_v10 = vpop.f32.mrf.mxu1 }
 0x108   :  { %v859_v37 = vadd.f32 %v826_v36, %v666_v35  ;;  %v460_v42 = vadd.f32 %v459_v10, %v1998_v22 }
 0x109   :  { %v1022_v38 = vpop.f32.mrf.mxu0 }
 0x10a   :  { %v1052_v40 = vadd.f32 %v1019_v25, %v859_v37 }
 0x10c   :  { %v1072_v41 = vadd.f32 %v2016_v44, %v1052_v40 }
 0x10d   :  { %v636_v43 = vpop.f32.mrf.mxu2 }
 0x10e   :  { %v1088_v46 = vmax.f32 %v1072_v41, 0.0  ;;  %v667_v47 = vadd.f32 %v636_v43, %v460_v42 }
 0x10f   :  { %v829_v48 = vpop.f32.mrf.mxu3  ;;  %v461_v16 = vpop.f32.mrf.mxu1 }
 0x110   :  { %v1552_v49 = vpack.c.bf16 %v1088_v46, %v1087_v45  ;;  %v860_v51 = vadd.f32 %v829_v48, %v667_v47  ;;  %v462_v52 = vadd.f32 %v461_v16, %v2010_v28 }
 0x111   :  { %v1024_v50 = vpop.f32.mrf.mxu0 }
 0x112   :  { %1580 = vst [vmem:[%s2081_s11 + $0x10] sm:$0xff] %v1552_v49   ;;  %v1053_v54 = vadd.f32 %v1022_v38, %v860_v51 }
 0x114   :  { %v1073_v59 = vadd.f32 %v2016_v44, %v1053_v54 }
 0x115   :  { %v638_v53 = vpop.f32.mrf.mxu2 }
 0x116   :  { %v668_v55 = vadd.f32 %v638_v53, %v462_v52  ;;  %v1089_v0 = vmax.f32 %v1073_v59, 0.0 }
 0x117   :  { %v831_v56 = vpop.f32.mrf.mxu3  ;;  %v464_v22 = vpop.f32.mrf.mxu1 }
 0x118   :  { %v861_v57 = vadd.f32 %v831_v56, %v668_v55  ;;  %v465_v62 = vadd.f32 %v464_v22, %v1982_v14 }
 0x119   :  { %v1027_v58 = vpop.f32.mrf.mxu0 }
 0x11a   :  { %v1054_v60 = vadd.f32 %v1024_v50, %v861_v57 }
 0x11c   :  { %v1074_v61 = vadd.f32 %v2016_v44, %v1054_v60 }
 0x11d   :  { %v641_v63 = vpop.f32.mrf.mxu2 }
 0x11e   :  { %v1090_v1 = vmax.f32 %v1074_v61, 0.0  ;;  %v669_v2 = vadd.f32 %v641_v63, %v465_v62 }
 0x11f   :  { %v834_v3 = vpop.f32.mrf.mxu3  ;;  %v466_v28 = vpop.f32.mrf.mxu1 }
 0x120   :  { %v1557_v4 = vpack.c.bf16 %v1090_v1, %v1089_v0  ;;  %v862_v6 = vadd.f32 %v834_v3, %v669_v2  ;;  %v467_v7 = vadd.f32 %v466_v28, %v1988_v18 }
 0x121   :  { %v1029_v5 = vpop.f32.mrf.mxu0 }
 0x122   :  { %1581 = vst [vmem:[%s2081_s11 + $0x18] sm:$0xff] %v1557_v4   ;;  %v1055_v9 = vadd.f32 %v1027_v58, %v862_v6 }
 0x124   :  { %v1075_v20 = vadd.f32 %v2016_v44, %v1055_v9 }
 0x125   :  { %v643_v8 = vpop.f32.mrf.mxu2 }
 0x126   :  { %v670_v11 = vadd.f32 %v643_v8, %v467_v7  ;;  %v1091_v29 = vmax.f32 %v1075_v20, 0.0 }
 0x127   :  { %v836_v12 = vpop.f32.mrf.mxu3  ;;  %v469_v14 = vpop.f32.mrf.mxu1 }
 0x128   :  { %v863_v13 = vadd.f32 %v836_v12, %v670_v11  ;;  %v470_v24 = vadd.f32 %v469_v14, %v2006_v26 }
 0x129   :  { %v1032_v17 = vpop.f32.mrf.mxu0 }
 0x12a   :  { %v1056_v21 = vadd.f32 %v1029_v5, %v863_v13 }
 0x12c   :  { %v1076_v23 = vadd.f32 %v2016_v44, %v1056_v21 }
 0x12d   :  { %v646_v25 = vpop.f32.mrf.mxu2 }
 0x12e   :  { %v1092_v32 = vmax.f32 %v1076_v23, 0.0  ;;  %v671_v33 = vadd.f32 %v646_v25, %v470_v24 }
 0x12f   :  { %v839_v34 = vpop.f32.mrf.mxu3  ;;  %v471_v18 = vpop.f32.mrf.mxu1 }
 0x130   :  { %v1562_v35 = vpack.c.bf16 %v1092_v32, %v1091_v29  ;;  %v864_v10 = vadd.f32 %v839_v34, %v671_v33  ;;  %v472_v37 = vadd.f32 %v471_v18, %v2012_v30 }
 0x131   :  { %v1034_v36 = vpop.f32.mrf.mxu0 }
 0x132   :  { %1582 = vst [vmem:[%s2081_s11 + $0x20] sm:$0xff] %v1562_v35   ;;  %v1057_v39 = vadd.f32 %v1032_v17, %v864_v10 }
 0x134   :  { %v1077_v43 = vadd.f32 %v2016_v44, %v1057_v39 }
 0x135   :  { %v648_v38 = vpop.f32.mrf.mxu2 }
 0x136   :  { %v672_v40 = vadd.f32 %v648_v38, %v472_v37  ;;  %v1093_v49 = vmax.f32 %v1077_v43, 0.0 }
 0x137   :  { %v841_v41 = vpop.f32.mrf.mxu3  ;;  %v474_v26 = vpop.f32.mrf.mxu1 }
 0x138   :  { %v865_v42 = vadd.f32 %v841_v41, %v672_v40  ;;  %v475_v48 = vadd.f32 %v474_v26, %v1984_v15 }
 0x139   :  { %v1037_v46 = vpop.f32.mrf.mxu0 }
 0x13a   :  { %v1058_v45 = vadd.f32 %v1034_v36, %v865_v42 }
 0x13c   :  { %v1078_v47 = vadd.f32 %v2016_v44, %v1058_v45 }
 0x13d   :  { %v651_v16 = vpop.f32.mrf.mxu2 }
 0x13e   :  { %v1094_v50 = vmax.f32 %v1078_v47, 0.0  ;;  %v673_v51 = vadd.f32 %v651_v16, %v475_v48 }
 0x13f   :  { %v844_v52 = vpop.f32.mrf.mxu3  ;;  %v476_v30 = vpop.f32.mrf.mxu1 }
 0x140   :  { %v1567_v53 = vpack.c.bf16 %v1094_v50, %v1093_v49  ;;  %v866_v54 = vadd.f32 %v844_v52, %v673_v51  ;;  %v477_v55 = vadd.f32 %v476_v30, %v1990_v19 }
 0x141   :  { %v1039_v56 = vpop.f32.mrf.mxu0 }
 0x142   :  { %1583 = vst [vmem:[%s2081_s11 + $0x28] sm:$0xff] %v1567_v53   ;;  %v1059_v57 = vadd.f32 %v1037_v46, %v866_v54 }
 0x144   :  { %v1079_v61 = vadd.f32 %v2016_v44, %v1059_v57 }
 0x145   :  { %v653_v22 = vpop.f32.mrf.mxu2 }
 0x146   :  { %v674_v58 = vadd.f32 %v653_v22, %v477_v55  ;;  %v1095_v2 = vmax.f32 %v1079_v61, 0.0 }
 0x147   :  { %v846_v59 = vpop.f32.mrf.mxu3  ;;  %v479_v15 = vpop.f32.mrf.mxu1 }
 0x148   :  { %v867_v60 = vadd.f32 %v846_v59, %v674_v58  ;;  %v480_v0 = vadd.f32 %v479_v15, %v2008_v27 }
 0x149   :  { %v1042_v19 = vpop.f32.mrf.mxu0 }
 0x14a   :  { %v1060_v62 = vadd.f32 %v1039_v56, %v867_v60 }
 0x14c   :  { %v1080_v63 = vadd.f32 %v2016_v44, %v1060_v62 }
 0x14d   :  { %v656_v1 = vpop.f32.mrf.mxu2 }
 0x14e   :  { %v1096_v3 = vmax.f32 %v1080_v63, 0.0  ;;  %v675_v28 = vadd.f32 %v656_v1, %v480_v0 }
 0x14f   :  { %v849_v4 = vpop.f32.mrf.mxu3  ;;  %v481_v6 = vpop.f32.mrf.mxu1 }
 0x150   :  { %v1572_v5 = vpack.c.bf16 %v1096_v3, %v1095_v2  ;;  %v868_v7 = vadd.f32 %v849_v4, %v675_v28  ;;  %v482_v8 = vadd.f32 %v481_v6, %v2014_v31 }
 0x151   :  { %v1044_v13 = vpop.f32.mrf.mxu0 }
 0x152   :  { %1584 = vst [vmem:[%s2081_s11 + $0x30] sm:$0xff] %v1572_v5   ;;  %v1061_v11 = vadd.f32 %v1042_v19, %v868_v7 }
 0x154   :  { %v1081_v17 = vadd.f32 %v2016_v44, %v1061_v11 }
 0x155   :  { %v658_v9 = vpop.f32.mrf.mxu2 }
 0x156   :  { %v676_v12 = vadd.f32 %v658_v9, %v482_v8  ;;  %v1097_v23 = vmax.f32 %v1081_v17, 0.0 }
 0x157   :  { %v851_v14 = vpop.f32.mrf.mxu3 }
 0x158   :  { %v869_v27 = vadd.f32 %v851_v14, %v676_v12 }
 0x15a   :  { %v1062_v20 = vadd.f32 %v1044_v13, %v869_v27 }
 0x15c   :  { %v1082_v21 = vadd.f32 %v2016_v44, %v1062_v20 }
 0x15e   :  { %v1098_v24 = vmax.f32 %v1082_v21, 0.0 }
 0x160   :  { %v1577_v25 = vpack.c.bf16 %v1098_v24, %v1097_v23 }
 0x162   :  { %1585 = vst [vmem:[%s2081_s11 + $0x38] sm:$0xff] %v1577_v25  }
 0x163   :  { %1135 = vsyncpa [#allocation3], 1 }
 0x164   :  { %1136 = vsyncpa [#allocation5], 1 }
 0x165   :  { %1137 = vsyncpa [#allocation8], 1 }
 0x166   :  { %1138 = vsyncpa [#allocation11], 1 }

// kernel: deeplabv3plus_forward.14
= control target key start
LH: loop header
LB: loop body
LE: loop exit
PB: predicated region body
PF: predicated region fallthrough
CT: control target
= control target key end

     0   :  { %8 = vsyncpa [#allocation3], 0  ;;  %s565_s0 = inlined_call_operand.vmem [shape: bf16[128,128], index: 0, kind: input, shape index: {}]   ;;  %s566_s1 = inlined_call_operand.hbm [shape: bf16[128,128], index: 1, kind: input, shape index: {}]   ;;  %s567_s2 = inlined_call_operand.hbm [shape: f32[1,128], index: 2, kind: input, shape index: {}]   ;;  %s568_s3 = inlined_call_operand.vmem [shape: bf16[128,128], index: 3, kind: output, shape index: {}]  }
   0x1   :  { %s16_s14 = sshll.u32 %s566_s1, 4  ;;  %s17_s14 = int_to_ptr.hbm [resolvable:$true] %s16_s14 }
   0x2   :  { %9 = vsyncpa [#allocation5], 0  ;;  %s487_s15 = smov [#allocation2]   ;;  %s30_s19 = sshll.u32 %s567_s2, 4  ;;  %s31_s19 = int_to_ptr.hbm [resolvable:$true] %s30_s19 }
   0x3   :  { %s18_s16 = sshll.u32 %s487_s15, 4  ;;  %s488_s20 = smov 64   ;;  %s19_s16 = int_to_ptr.vmem [resolvable:$true] %s18_s16 }
   0x4   :  { %s489_s21 = smov 4   ;;  %s490_s22 = smov [#allocation4]  }
   0x5   :  { %24 = dma.hbm_to_vmem [thread:$0]  %s17_s14, 1024, %s19_s16, [#allocation3], %s488_s20, %s488_s20, %s489_s21  }
   0x6   :  { %s32_s23 = sshll.u32 %s490_s22, 4  ;;  %s33_s23 = int_to_ptr.vmem [resolvable:$true] %s32_s23 }
   0x7   :  { %35 = dma.hbm_to_vmem [thread:$0]  %s31_s19, 16, %s33_s23, [#allocation5]  }
   0x8   :  { %483 = dma.done.wait [#allocation3], 1024  }
   0x9   :  { %484 = vsyncadd [#allocation3], 4294966272 }
   0xa   :  { %485 = dma.done.wait [#allocation5], 16  }
   0xb   :  { %486 = vsyncadd [#allocation5], 4294967280  ;;  %v358_v0 = vld [vmem:[#allocation2 + $0x38] sm:$0xff]  ;;  %v357_v1 = vld [vmem:[#allocation2 + $0x30] sm:$0xff] }
   0xc   :  { %176 = vmatpush.bf16.msra.mxu0 %v358_v0  ;;  %406 = vmatpush.bf16.msra.mxu1 %v358_v0  ;;  %v356_v2 = vld [vmem:[#allocation2 + $0x28] sm:$0xff]  ;;  %v355_v3 = vld [vmem:[#allocation2 + $0x20] sm:$0xff]  ;;  %v354_v4 = vld [vmem:[#allocation2 + $0x18] sm:$0xff] }
   0xd   :  { %407 = vmatpush.bf16.msra.mxu2 %v358_v0  ;;  %408 = vmatpush.bf16.msra.mxu3 %v358_v0  ;;  %v353_v5 = vld [vmem:[#allocation2 + $0x10] sm:$0xff]  ;;  %v352_v6 = vld [vmem:[#allocation2 + $0x8] sm:$0xff]  ;;  %v351_v7 = vld [vmem:[#allocation2] sm:$0xff] }
   0xe   :  { %v343_v8 = vld [vmem:[%s565_s0] sm:$0xff]  ;;  %v345_v9 = vld [vmem:[%s565_s0 + $0x10] sm:$0xff]  ;;  %v344_v12 = vld [vmem:[%s565_s0 + $0x8] sm:$0xff] }
   0xf   :  { %v347_v10 = vld [vmem:[%s565_s0 + $0x20] sm:$0xff]  ;;  %v349_v11 = vld [vmem:[%s565_s0 + $0x30] sm:$0xff]  ;;  %v346_v13 = vld [vmem:[%s565_s0 + $0x18] sm:$0xff] }
  0x10   :  { %177 = vmatpush.bf16.msra.mxu0 %v357_v1  ;;  %409 = vmatpush.bf16.msra.mxu1 %v357_v1  ;;  %v348_v14 = vld [vmem:[%s565_s0 + $0x28] sm:$0xff]  ;;  %v350_v15 = vld [vmem:[%s565_s0 + $0x38] sm:$0xff]  ;;  %v434_v18 = vld [vmem:[#allocation4] ss:$0 sm:$0xff] }
  0x11   :  { %410 = vmatpush.bf16.msra.mxu2 %v357_v1  ;;  %411 = vmatpush.bf16.msra.mxu3 %v357_v1 }
  0x14   :  { %178 = vmatpush.bf16.msra.mxu0 %v356_v2  ;;  %412 = vmatpush.bf16.msra.mxu1 %v356_v2 }
  0x15   :  { %413 = vmatpush.bf16.msra.mxu2 %v356_v2  ;;  %414 = vmatpush.bf16.msra.mxu3 %v356_v2 }
  0x18   :  { %179 = vmatpush.bf16.msra.mxu0 %v355_v3  ;;  %415 = vmatpush.bf16.msra.mxu1 %v355_v3 }
  0x19   :  { %416 = vmatpush.bf16.msra.mxu2 %v355_v3  ;;  %417 = vmatpush.bf16.msra.mxu3 %v355_v3 }
  0x1c   :  { %180 = vmatpush.bf16.msra.mxu0 %v354_v4  ;;  %418 = vmatpush.bf16.msra.mxu1 %v354_v4 }
  0x1d   :  { %419 = vmatpush.bf16.msra.mxu2 %v354_v4  ;;  %420 = vmatpush.bf16.msra.mxu3 %v354_v4 }
  0x20   :  { %181 = vmatpush.bf16.msra.mxu0 %v353_v5  ;;  %421 = vmatpush.bf16.msra.mxu1 %v353_v5 }
  0x21   :  { %422 = vmatpush.bf16.msra.mxu2 %v353_v5  ;;  %423 = vmatpush.bf16.msra.mxu3 %v353_v5 }
  0x24   :  { %182 = vmatpush.bf16.msra.mxu0 %v352_v6  ;;  %424 = vmatpush.bf16.msra.mxu1 %v352_v6 }
  0x25   :  { %425 = vmatpush.bf16.msra.mxu2 %v352_v6  ;;  %426 = vmatpush.bf16.msra.mxu3 %v352_v6 }
  0x28   :  { %183 = vmatpush.bf16.msra.mxu0 %v351_v7  ;;  %427 = vmatpush.bf16.msra.mxu1 %v351_v7 }
  0x29   :  { %428 = vmatpush.bf16.msra.mxu2 %v351_v7  ;;  %429 = vmatpush.bf16.msra.mxu3 %v351_v7 }
  0x2b   :  { %184 = vmatmul.bf16.vlgmr.msra.gmra.mxu0 %v343_v8  ;;  %194 = vmatmul.bf16.vlgmr.msra.gmra.mxu1 %v345_v9 }
  0x2c   :  { %204 = vmatmul.bf16.vlgmr.msra.gmra.mxu2 %v347_v10  ;;  %214 = vmatmul.bf16.vlgmr.msra.gmra.mxu3 %v349_v11 }
  0x3b   :  { %189 = vmatmul.bf16.gmra.mxu0 %v344_v12  ;;  %199 = vmatmul.bf16.gmra.mxu1 %v346_v13 }
  0x3c   :  { %209 = vmatmul.bf16.gmra.mxu2 %v348_v14  ;;  %219 = vmatmul.bf16.gmra.mxu3 %v350_v15 }
  0xa8   :  { %v185_v16 = vpop.f32.mrf.mxu0  ;;  %v195_v17 = vpop.f32.mrf.mxu1 }
  0xa9   :  { %v186_v19 = vadd.f32 %v434_v18, %v185_v16  ;;  %v196_v20 = vadd.f32 %v434_v18, %v195_v17 }
  0xab   :  { %v225_v27 = vmax.f32 %v186_v19, 0.0  ;;  %v229_v28 = vmax.f32 %v196_v20, 0.0 }
  0xaf   :  { %v205_v21 = vpop.f32.mrf.mxu2  ;;  %v215_v22 = vpop.f32.mrf.mxu3 }
  0xb0   :  { %v187_v23 = vpop.f32.mrf.mxu0  ;;  %v197_v24 = vpop.f32.mrf.mxu1  ;;  %v206_v33 = vadd.f32 %v434_v18, %v205_v21  ;;  %v216_v34 = vadd.f32 %v434_v18, %v215_v22 }
  0xb1   :  { %v188_v25 = vadd.f32 %v434_v18, %v187_v23  ;;  %v198_v26 = vadd.f32 %v434_v18, %v197_v24 }
  0xb2   :  { %v233_v41 = vmax.f32 %v206_v33, 0.0  ;;  %v237_v42 = vmax.f32 %v216_v34, 0.0 }
  0xb3   :  { %v226_v29 = vmax.f32 %v188_v25, 0.0  ;;  %v230_v30 = vmax.f32 %v198_v26, 0.0 }
  0xb5   :  { %v362_v31 = vpack.c.bf16 %v226_v29, %v225_v27  ;;  %v372_v32 = vpack.c.bf16 %v230_v30, %v229_v28 }
  0xb7   :  { %363 = vst [vmem:[%s568_s3] sm:$0xff] %v362_v31   ;;  %v207_v35 = vpop.f32.mrf.mxu2  ;;  %v217_v36 = vpop.f32.mrf.mxu3 }
  0xb8   :  { %400 = vst [vmem:[%s568_s3 + $0x10] sm:$0xff] %v372_v32   ;;  %v208_v37 = vadd.f32 %v434_v18, %v207_v35  ;;  %v218_v38 = vadd.f32 %v434_v18, %v217_v36  ;;  %v190_v39 = vpop.f32.mrf.mxu0  ;;  %v200_v40 = vpop.f32.mrf.mxu1 }
  0xb9   :  { %v191_v47 = vadd.f32 %v434_v18, %v190_v39  ;;  %v201_v48 = vadd.f32 %v434_v18, %v200_v40 }
  0xba   :  { %v234_v43 = vmax.f32 %v208_v37, 0.0  ;;  %v238_v44 = vmax.f32 %v218_v38, 0.0 }
  0xbb   :  { %v227_v55 = vmax.f32 %v191_v47, 0.0  ;;  %v231_v56 = vmax.f32 %v201_v48, 0.0 }
  0xbc   :  { %v382_v45 = vpack.c.bf16 %v234_v43, %v233_v41  ;;  %v392_v46 = vpack.c.bf16 %v238_v44, %v237_v42 }
  0xbe   :  { %402 = vst [vmem:[%s568_s3 + $0x20] sm:$0xff] %v382_v45  }
  0xbf   :  { %404 = vst [vmem:[%s568_s3 + $0x30] sm:$0xff] %v392_v46   ;;  %v210_v49 = vpop.f32.mrf.mxu2  ;;  %v220_v50 = vpop.f32.mrf.mxu3 }
  0xc0   :  { %v192_v51 = vpop.f32.mrf.mxu0  ;;  %v202_v52 = vpop.f32.mrf.mxu1  ;;  %v211_v61 = vadd.f32 %v434_v18, %v210_v49  ;;  %v221_v62 = vadd.f32 %v434_v18, %v220_v50 }
  0xc1   :  { %v193_v53 = vadd.f32 %v434_v18, %v192_v51  ;;  %v203_v54 = vadd.f32 %v434_v18, %v202_v52 }
  0xc2   :  { %v235_v3 = vmax.f32 %v211_v61, 0.0  ;;  %v239_v4 = vmax.f32 %v221_v62, 0.0 }
  0xc3   :  { %v228_v57 = vmax.f32 %v193_v53, 0.0  ;;  %v232_v58 = vmax.f32 %v203_v54, 0.0 }
  0xc5   :  { %v367_v59 = vpack.c.bf16 %v228_v57, %v227_v55  ;;  %v377_v60 = vpack.c.bf16 %v232_v58, %v231_v56 }
  0xc7   :  { %399 = vst [vmem:[%s568_s3 + $0x8] sm:$0xff] %v367_v59   ;;  %v212_v63 = vpop.f32.mrf.mxu2  ;;  %v222_v0 = vpop.f32.mrf.mxu3 }
  0xc8   :  { %401 = vst [vmem:[%s568_s3 + $0x18] sm:$0xff] %v377_v60   ;;  %v213_v1 = vadd.f32 %v434_v18, %v212_v63  ;;  %v223_v2 = vadd.f32 %v434_v18, %v222_v0 }
  0xca   :  { %v236_v5 = vmax.f32 %v213_v1, 0.0  ;;  %v240_v6 = vmax.f32 %v223_v2, 0.0 }
  0xcc   :  { %v387_v7 = vpack.c.bf16 %v236_v5, %v235_v3  ;;  %v397_v8 = vpack.c.bf16 %v240_v6, %v239_v4 }
  0xce   :  { %403 = vst [vmem:[%s568_s3 + $0x28] sm:$0xff] %v387_v7  }
  0xcf   :  { %405 = vst [vmem:[%s568_s3 + $0x38] sm:$0xff] %v397_v8  }
  0xd0   :  { %277 = vsyncpa [#allocation3], 1 }
  0xd1   :  { %278 = vsyncpa [#allocation5], 1 }

// kernel: deeplabv3plus_forward.17
= control target key start
LH: loop header
LB: loop body
LE: loop exit
PB: predicated region body
PF: predicated region fallthrough
CT: control target
= control target key end

     0   :  { %10 = vsyncpa [#allocation3], 0  ;;  %s893_s0 = inlined_call_operand.vmem [shape: bf16[128,128], index: 0, kind: input, shape index: {}]   ;;  %s894_s1 = inlined_call_operand.vmem [shape: bf16[128,128], index: 1, kind: input, shape index: {}]   ;;  %s895_s2 = inlined_call_operand.hbm [shape: bf16[128,128], index: 2, kind: input, shape index: {}]   ;;  %s896_s3 = inlined_call_operand.hbm [shape: bf16[128,128], index: 3, kind: input, shape index: {}]   ;;  %s897_s4 = inlined_call_operand.hbm [shape: f32[1,128], index: 4, kind: input, shape index: {}]   ;;  %s898_s5 = inlined_call_operand.vmem [shape: f32[128,128], index: 5, kind: output, shape index: {}]  }
   0x1   :  { %11 = vsyncpa [#allocation5], 0  ;;  %s33_s20 = sshll.u32 %s896_s3, 4  ;;  %s735_s21 = smov [#allocation4]   ;;  %s34_s20 = int_to_ptr.hbm [resolvable:$true] %s33_s20 }
   0x2   :  { %s35_s22 = sshll.u32 %s735_s21, 4  ;;  %s20_s25 = sshll.u32 %s895_s2, 4  ;;  %s36_s22 = int_to_ptr.vmem [resolvable:$true] %s35_s22  ;;  %s21_s25 = int_to_ptr.hbm [resolvable:$true] %s20_s25 }
   0x3   :  { %s736_s26 = smov 64   ;;  %s737_s27 = smov 4  }
   0x4   :  { %41 = dma.hbm_to_vmem [thread:$0]  %s34_s20, 1024, %s36_s22, [#allocation5], %s736_s26, %s736_s26, %s737_s27  }
   0x5   :  { %s738_s28 = smov [#allocation2]   ;;  %s47_s7 = sshll.u32 %s897_s4, 4  ;;  %s48_s7 = int_to_ptr.hbm [resolvable:$true] %s47_s7 }
   0x6   :  { %s22_s29 = sshll.u32 %s738_s28, 4  ;;  %s739_s3 = smov [#allocation6]   ;;  %s23_s29 = int_to_ptr.vmem [resolvable:$true] %s22_s29 }
   0x7   :  { %28 = dma.hbm_to_vmem [thread:$0]  %s21_s25, 1024, %s23_s29, [#allocation3], %s736_s26, %s736_s26, %s737_s27  }
   0x8   :  { %s49_s8 = sshll.u32 %s739_s3, 4  ;;  %s50_s8 = int_to_ptr.vmem [resolvable:$true] %s49_s8 }
   0x9   :  { %52 = dma.hbm_to_vmem [thread:$0]  %s48_s7, 16, %s50_s8, [#allocation5]  }
   0xa   :  { %731 = dma.done.wait [#allocation3], 1024  }
   0xb   :  { %732 = vsyncadd [#allocation3], 4294966272 }
   0xc   :  { %733 = dma.done.wait [#allocation5], 1040  }
   0xd   :  { %734 = vsyncadd [#allocation5], 4294966256  ;;  %v636_v0 = vld [vmem:[#allocation4 + $0x38] sm:$0xff]  ;;  %v635_v2 = vld [vmem:[#allocation4 + $0x30] sm:$0xff] }
   0xe   :  { %v620_v1 = vld [vmem:[#allocation2 + $0x38] sm:$0xff]  ;;  %225 = vmatpush.bf16.msra.mxu0 %v636_v0  ;;  %637 = vmatpush.bf16.msra.mxu2 %v636_v0  ;;  %v619_v3 = vld [vmem:[#allocation2 + $0x30] sm:$0xff]  ;;  %v634_v4 = vld [vmem:[#allocation4 + $0x28] sm:$0xff] }
   0xf   :  { %370 = vmatpush.bf16.msra.mxu1 %v620_v1  ;;  %645 = vmatpush.bf16.msra.mxu3 %v620_v1  ;;  %v618_v5 = vld [vmem:[#allocation2 + $0x28] sm:$0xff]  ;;  %v633_v6 = vld [vmem:[#allocation4 + $0x20] sm:$0xff]  ;;  %v632_v8 = vld [vmem:[#allocation4 + $0x18] sm:$0xff] }
  0x10   :  { %v617_v7 = vld [vmem:[#allocation2 + $0x20] sm:$0xff]  ;;  %v616_v9 = vld [vmem:[#allocation2 + $0x18] sm:$0xff]  ;;  %v631_v10 = vld [vmem:[#allocation4 + $0x10] sm:$0xff] }
  0x11   :  { %v615_v11 = vld [vmem:[#allocation2 + $0x10] sm:$0xff]  ;;  %v630_v12 = vld [vmem:[#allocation4 + $0x8] sm:$0xff]  ;;  %v629_v14 = vld [vmem:[#allocation4] sm:$0xff] }
  0x12   :  { %226 = vmatpush.bf16.msra.mxu0 %v635_v2  ;;  %638 = vmatpush.bf16.msra.mxu2 %v635_v2  ;;  %v614_v13 = vld [vmem:[#allocation2 + $0x8] sm:$0xff]  ;;  %v613_v15 = vld [vmem:[#allocation2] sm:$0xff]  ;;  %v623_v24 = vld [vmem:[%s894_s1 + $0x10] sm:$0xff] }
  0x13   :  { %371 = vmatpush.bf16.msra.mxu1 %v619_v3  ;;  %646 = vmatpush.bf16.msra.mxu3 %v619_v3  ;;  %v621_v16 = vld [vmem:[%s894_s1] sm:$0xff]  ;;  %v622_v20 = vld [vmem:[%s894_s1 + $0x8] sm:$0xff]  ;;  %v627_v25 = vld [vmem:[%s894_s1 + $0x30] sm:$0xff] }
  0x14   :  { %v625_v17 = vld [vmem:[%s894_s1 + $0x20] sm:$0xff]  ;;  %v626_v21 = vld [vmem:[%s894_s1 + $0x28] sm:$0xff]  ;;  %v607_v26 = vld [vmem:[%s893_s0 + $0x10] sm:$0xff] }
  0x15   :  { %v605_v18 = vld [vmem:[%s893_s0] sm:$0xff]  ;;  %v606_v22 = vld [vmem:[%s893_s0 + $0x8] sm:$0xff]  ;;  %v611_v27 = vld [vmem:[%s893_s0 + $0x30] sm:$0xff] }
  0x16   :  { %227 = vmatpush.bf16.msra.mxu0 %v634_v4  ;;  %639 = vmatpush.bf16.msra.mxu2 %v634_v4  ;;  %v609_v19 = vld [vmem:[%s893_s0 + $0x20] sm:$0xff]  ;;  %v610_v23 = vld [vmem:[%s893_s0 + $0x28] sm:$0xff]  ;;  %v624_v28 = vld [vmem:[%s894_s1 + $0x18] sm:$0xff] }
  0x17   :  { %372 = vmatpush.bf16.msra.mxu1 %v618_v5  ;;  %647 = vmatpush.bf16.msra.mxu3 %v618_v5  ;;  %v628_v29 = vld [vmem:[%s894_s1 + $0x38] sm:$0xff]  ;;  %v827_v33 = vld [vmem:[#allocation6] ss:$0 sm:$0xff] }
  0x18   :  { %v608_v30 = vld [vmem:[%s893_s0 + $0x18] sm:$0xff] }
  0x19   :  { %v612_v31 = vld [vmem:[%s893_s0 + $0x38] sm:$0xff] }
  0x1a   :  { %228 = vmatpush.bf16.msra.mxu0 %v633_v6  ;;  %640 = vmatpush.bf16.msra.mxu2 %v633_v6 }
  0x1b   :  { %373 = vmatpush.bf16.msra.mxu1 %v617_v7  ;;  %648 = vmatpush.bf16.msra.mxu3 %v617_v7 }
  0x1e   :  { %229 = vmatpush.bf16.msra.mxu0 %v632_v8  ;;  %641 = vmatpush.bf16.msra.mxu2 %v632_v8 }
  0x1f   :  { %374 = vmatpush.bf16.msra.mxu1 %v616_v9  ;;  %649 = vmatpush.bf16.msra.mxu3 %v616_v9 }
  0x22   :  { %230 = vmatpush.bf16.msra.mxu0 %v631_v10  ;;  %642 = vmatpush.bf16.msra.mxu2 %v631_v10 }
  0x23   :  { %375 = vmatpush.bf16.msra.mxu1 %v615_v11  ;;  %650 = vmatpush.bf16.msra.mxu3 %v615_v11 }
  0x26   :  { %231 = vmatpush.bf16.msra.mxu0 %v630_v12  ;;  %643 = vmatpush.bf16.msra.mxu2 %v630_v12 }
  0x27   :  { %376 = vmatpush.bf16.msra.mxu1 %v614_v13  ;;  %651 = vmatpush.bf16.msra.mxu3 %v614_v13 }
  0x2a   :  { %232 = vmatpush.bf16.msra.mxu0 %v629_v14  ;;  %644 = vmatpush.bf16.msra.mxu2 %v629_v14 }
  0x2b   :  { %377 = vmatpush.bf16.msra.mxu1 %v613_v15  ;;  %652 = vmatpush.bf16.msra.mxu3 %v613_v15 }
  0x2d   :  { %233 = vmatmul.bf16.vlgmr.msra.gmra.mxu0 %v621_v16  ;;  %253 = vmatmul.bf16.vlgmr.msra.gmra.mxu2 %v625_v17 }
  0x2e   :  { %378 = vmatmul.bf16.vlgmr.msra.gmra.mxu1 %v605_v18  ;;  %398 = vmatmul.bf16.vlgmr.msra.gmra.mxu3 %v609_v19 }
  0x3d   :  { %238 = vmatmul.bf16.gmra.mxu0 %v622_v20  ;;  %258 = vmatmul.bf16.gmra.mxu2 %v626_v21 }
  0x3e   :  { %383 = vmatmul.bf16.gmra.mxu1 %v606_v22  ;;  %403 = vmatmul.bf16.gmra.mxu3 %v610_v23 }
  0x4d   :  { %243 = vmatmul.bf16.gmra.mxu0 %v623_v24  ;;  %263 = vmatmul.bf16.gmra.mxu2 %v627_v25 }
  0x4e   :  { %388 = vmatmul.bf16.gmra.mxu1 %v607_v26  ;;  %408 = vmatmul.bf16.gmra.mxu3 %v611_v27 }
  0x5d   :  { %248 = vmatmul.bf16.gmra.mxu0 %v624_v28  ;;  %268 = vmatmul.bf16.gmra.mxu2 %v628_v29 }
  0x5e   :  { %393 = vmatmul.bf16.gmra.mxu1 %v608_v30  ;;  %413 = vmatmul.bf16.gmra.mxu3 %v612_v31 }
  0xaa   :  { %v234_v32 = vpop.f32.mrf.mxu0 }
  0xab   :  { %v379_v34 = vpop.f32.mrf.mxu1 }
  0xac   :  { %v380_v35 = vadd.f32 %v379_v34, %v234_v32 }
  0xae   :  { %v423_v36 = vadd.f32 %v827_v33, %v380_v35 }
  0xb0   :  { %v439_v37 = vmax.f32 %v423_v36, 0.0  ;;  %v254_v38 = vpop.f32.mrf.mxu2 }
  0xb1   :  { %v399_v39 = vpop.f32.mrf.mxu3 }
  0xb2   :  { %455 = vst [vmem:[%s898_s5] sm:$0xff] %v439_v37  ;;  %v400_v40 = vadd.f32 %v399_v39, %v254_v38  ;;  %v236_v41 = vpop.f32.mrf.mxu0 }
  0xb3   :  { %v381_v42 = vpop.f32.mrf.mxu1 }
  0xb4   :  { %v431_v43 = vadd.f32 %v827_v33, %v400_v40  ;;  %v382_v44 = vadd.f32 %v381_v42, %v236_v41 }
  0xb6   :  { %v447_v45 = vmax.f32 %v431_v43, 0.0  ;;  %v424_v46 = vadd.f32 %v827_v33, %v382_v44 }
  0xb8   :  { %463 = vst [vmem:[%s898_s5 + $0x40] sm:$0xff] %v447_v45  ;;  %v440_v47 = vmax.f32 %v424_v46, 0.0  ;;  %v256_v48 = vpop.f32.mrf.mxu2 }
  0xb9   :  { %v401_v49 = vpop.f32.mrf.mxu3 }
  0xba   :  { %456 = vst [vmem:[%s898_s5 + $0x8] sm:$0xff] %v440_v47  ;;  %v402_v50 = vadd.f32 %v401_v49, %v256_v48  ;;  %v239_v51 = vpop.f32.mrf.mxu0 }
  0xbb   :  { %v384_v52 = vpop.f32.mrf.mxu1 }
  0xbc   :  { %v432_v53 = vadd.f32 %v827_v33, %v402_v50  ;;  %v385_v54 = vadd.f32 %v384_v52, %v239_v51 }
  0xbe   :  { %v448_v55 = vmax.f32 %v432_v53, 0.0  ;;  %v425_v56 = vadd.f32 %v827_v33, %v385_v54 }
  0xc0   :  { %464 = vst [vmem:[%s898_s5 + $0x48] sm:$0xff] %v448_v55  ;;  %v441_v57 = vmax.f32 %v425_v56, 0.0  ;;  %v259_v58 = vpop.f32.mrf.mxu2 }
  0xc1   :  { %v404_v59 = vpop.f32.mrf.mxu3 }
  0xc2   :  { %457 = vst [vmem:[%s898_s5 + $0x10] sm:$0xff] %v441_v57  ;;  %v405_v60 = vadd.f32 %v404_v59, %v259_v58  ;;  %v241_v61 = vpop.f32.mrf.mxu0 }
  0xc3   :  { %v386_v62 = vpop.f32.mrf.mxu1 }
  0xc4   :  { %v433_v63 = vadd.f32 %v827_v33, %v405_v60  ;;  %v387_v0 = vadd.f32 %v386_v62, %v241_v61 }
  0xc6   :  { %v449_v1 = vmax.f32 %v433_v63, 0.0  ;;  %v426_v2 = vadd.f32 %v827_v33, %v387_v0 }
  0xc8   :  { %465 = vst [vmem:[%s898_s5 + $0x50] sm:$0xff] %v449_v1  ;;  %v442_v3 = vmax.f32 %v426_v2, 0.0  ;;  %v261_v4 = vpop.f32.mrf.mxu2 }
  0xc9   :  { %v406_v5 = vpop.f32.mrf.mxu3 }
  0xca   :  { %458 = vst [vmem:[%s898_s5 + $0x18] sm:$0xff] %v442_v3  ;;  %v407_v6 = vadd.f32 %v406_v5, %v261_v4  ;;  %v244_v7 = vpop.f32.mrf.mxu0 }
  0xcb   :  { %v389_v8 = vpop.f32.mrf.mxu1 }
  0xcc   :  { %v434_v9 = vadd.f32 %v827_v33, %v407_v6  ;;  %v390_v10 = vadd.f32 %v389_v8, %v244_v7 }
  0xce   :  { %v450_v11 = vmax.f32 %v434_v9, 0.0  ;;  %v427_v12 = vadd.f32 %v827_v33, %v390_v10 }
  0xd0   :  { %466 = vst [vmem:[%s898_s5 + $0x58] sm:$0xff] %v450_v11  ;;  %v443_v13 = vmax.f32 %v427_v12, 0.0  ;;  %v264_v14 = vpop.f32.mrf.mxu2 }
  0xd1   :  { %v409_v15 = vpop.f32.mrf.mxu3 }
  0xd2   :  { %459 = vst [vmem:[%s898_s5 + $0x20] sm:$0xff] %v443_v13  ;;  %v410_v16 = vadd.f32 %v409_v15, %v264_v14  ;;  %v246_v17 = vpop.f32.mrf.mxu0 }
  0xd3   :  { %v391_v18 = vpop.f32.mrf.mxu1 }
  0xd4   :  { %v435_v19 = vadd.f32 %v827_v33, %v410_v16  ;;  %v392_v20 = vadd.f32 %v391_v18, %v246_v17 }
  0xd6   :  { %v451_v21 = vmax.f32 %v435_v19, 0.0  ;;  %v428_v22 = vadd.f32 %v827_v33, %v392_v20 }
  0xd8   :  { %467 = vst [vmem:[%s898_s5 + $0x60] sm:$0xff] %v451_v21  ;;  %v444_v23 = vmax.f32 %v428_v22, 0.0  ;;  %v266_v24 = vpop.f32.mrf.mxu2 }
  0xd9   :  { %v411_v25 = vpop.f32.mrf.mxu3 }
  0xda   :  { %460 = vst [vmem:[%s898_s5 + $0x28] sm:$0xff] %v444_v23  ;;  %v412_v26 = vadd.f32 %v411_v25, %v266_v24  ;;  %v249_v27 = vpop.f32.mrf.mxu0 }
  0xdb   :  { %v394_v28 = vpop.f32.mrf.mxu1 }
  0xdc   :  { %v436_v29 = vadd.f32 %v827_v33, %v412_v26  ;;  %v395_v30 = vadd.f32 %v394_v28, %v249_v27 }
  0xde   :  { %v452_v31 = vmax.f32 %v436_v29, 0.0  ;;  %v429_v32 = vadd.f32 %v827_v33, %v395_v30 }
  0xe0   :  { %468 = vst [vmem:[%s898_s5 + $0x68] sm:$0xff] %v452_v31  ;;  %v445_v34 = vmax.f32 %v429_v32, 0.0  ;;  %v269_v35 = vpop.f32.mrf.mxu2 }
  0xe1   :  { %v414_v36 = vpop.f32.mrf.mxu3 }
  0xe2   :  { %461 = vst [vmem:[%s898_s5 + $0x30] sm:$0xff] %v445_v34  ;;  %v415_v37 = vadd.f32 %v414_v36, %v269_v35  ;;  %v251_v38 = vpop.f32.mrf.mxu0 }
  0xe3   :  { %v396_v39 = vpop.f32.mrf.mxu1 }
  0xe4   :  { %v437_v40 = vadd.f32 %v827_v33, %v415_v37  ;;  %v397_v41 = vadd.f32 %v396_v39, %v251_v38 }
  0xe6   :  { %v453_v42 = vmax.f32 %v437_v40, 0.0  ;;  %v430_v43 = vadd.f32 %v827_v33, %v397_v41 }
  0xe8   :  { %469 = vst [vmem:[%s898_s5 + $0x70] sm:$0xff] %v453_v42  ;;  %v446_v44 = vmax.f32 %v430_v43, 0.0  ;;  %v271_v45 = vpop.f32.mrf.mxu2 }
  0xe9   :  { %v416_v46 = vpop.f32.mrf.mxu3 }
  0xea   :  { %462 = vst [vmem:[%s898_s5 + $0x38] sm:$0xff] %v446_v44  ;;  %v417_v47 = vadd.f32 %v416_v46, %v271_v45 }
  0xec   :  { %v438_v48 = vadd.f32 %v827_v33, %v417_v47 }
  0xee   :  { %v454_v49 = vmax.f32 %v438_v48, 0.0 }
  0xf0   :  { %470 = vst [vmem:[%s898_s5 + $0x78] sm:$0xff] %v454_v49 }
  0xf1   :  { %475 = vsyncpa [#allocation3], 1 }
  0xf2   :  { %476 = vsyncpa [#allocation5], 1 }

</bundles_post_ra>
